<compile_context>
chip_gen: v7x
topology: tpu7x:2x2x1
jax: 0.10.0
libtpu: 0.0.40
codegen_flags: <defaults>
</compile_context>

<pallas_src>
import jax
import jax.numpy as jnp
from jax.experimental import pallas as pl
from jax.experimental.pallas import tpu as pltpu

BN_EPS = 1e-5
K = 4            # all ConvTranspose2d layers use kernel_size=4
_TM_MAX = 512    # max rows per M tile
_TK_MAX = 512    # max reduction width per K tile
_VMEM_LIMIT = 32 * 1024 * 1024


# ----------------------------------------------------------------------------
# small static-shape helpers
# ----------------------------------------------------------------------------
def _round_up(x, m):
    return (x + m - 1) // m * m


def _m_tiles(m):
    tm = min(_TM_MAX, _round_up(m, 8))
    return tm, _round_up(m, tm)


def _k_tiles(kd):
    tk = min(_TK_MAX, _round_up(kd, 128))
    return tk, _round_up(kd, tk)


# ----------------------------------------------------------------------------
# Pallas kernels
# ----------------------------------------------------------------------------
def _gemm_stats_kernel(p_ref, w_ref, y_ref, st_ref, acc_ref):
    """One (phase, M-tile) tile of Y = P @ W accumulated over the K grid axis in
    f32, plus per-column sum / sum-of-squares (BatchNorm pass 1)."""
    k = pl.program_id(2)

    @pl.when(k == 0)
    def _init():
        acc_ref[...] = jnp.zeros_like(acc_ref)

    acc_ref[...] += jnp.dot(p_ref[...], w_ref[...],
                            preferred_element_type=jnp.float32)

    @pl.when(k == pl.num_programs(2) - 1)
    def _finalize():
        y = acc_ref[...]
        y_ref[...] = y.astype(y_ref.dtype)
        s = jnp.sum(y, axis=0, keepdims=True)            # (1, Cout)
        ss = jnp.sum(y * y, axis=0, keepdims=True)       # (1, Cout)
        row = jax.lax.broadcasted_iota(jnp.int32, st_ref.shape, 0)
        st_ref[...] = jnp.where(row == 0, s, 0.0) + jnp.where(row == 1, ss, 0.0)


def _affine_relu_kernel(y_ref, sc_ref, sh_ref, o_ref):
    """BatchNorm pass 2: per-column scale/shift (gamma/beta/mean/var folded) + ReLU."""
    o_ref[...] = jnp.maximum(
        y_ref[...].astype(jnp.float32) * sc_ref[...] + sh_ref[...], 0.0
    ).astype(o_ref.dtype)


def _gemm_t_bias_tanh_kernel(w_ref, p_ref, b_ref, o_ref, acc_ref):
    """Final layer, transposed so the big spatial dim sits in lanes:
    (8, TK) @ (TK, TN) -> (8, TN); row 0 is the real Cout=1 output."""
    k = pl.program_id(2)

    @pl.when(k == 0)
    def _init():
        acc_ref[...] = jnp.zeros_like(acc_ref)

    acc_ref[...] += jnp.dot(w_ref[...], p_ref[...],
                            preferred_element_type=jnp.float32)

    @pl.when(k == pl.num_programs(2) - 1)
    def _finalize():
        o_ref[...] = jnp.tanh(acc_ref[...] + b_ref[...])


# ----------------------------------------------------------------------------
# pallas_call wrappers
# ----------------------------------------------------------------------------
def _matmul_with_stats(p_stack, w_stack, tm, tk):
    """p_stack: (P, Mp, Kp) bf16, w_stack: (P, Kp, Cout) bf16 (zero-padded).
    Returns y (P, Mp, Cout) bf16 plus per-channel (sum, sumsq) in f32
    (zero-padded rows/cols contribute nothing)."""
    nph, mp, kp = p_stack.shape
    cout = w_stack.shape[2]
    nm, nk = mp // tm, kp // tk

    y, st = pl.pallas_call(
        _gemm_stats_kernel,
        out_shape=(
            jax.ShapeDtypeStruct((nph, mp, cout), jnp.bfloat16),
            jax.ShapeDtypeStruct((nph, nm * 8, cout), jnp.float32),
        ),
        grid=(nph, nm, nk),
        in_specs=[
            pl.BlockSpec((None, tm, tk), lambda p, i, k: (p, i, k)),
            pl.BlockSpec((None, tk, cout), lambda p, i, k: (p, k, 0)),
        ],
        out_specs=(
            pl.BlockSpec((None, tm, cout), lambda p, i, k: (p, i, 0)),
            pl.BlockSpec((None, 8, cout), lambda p, i, k: (p, i, 0)),
        ),
        scratch_shapes=[pltpu.VMEM((tm, cout), jnp.float32)],
        compiler_params=pltpu.CompilerParams(
            dimension_semantics=("parallel", "parallel", "arbitrary"),
            vmem_limit_bytes=_VMEM_LIMIT,
        ),
    )(p_stack, w_stack)

    st = st.reshape(nph, nm, 8, cout)
    return y, st[:, :, 0, :].sum(axis=(0, 1)), st[:, :, 1, :].sum(axis=(0, 1))


def _affine_relu(y2d, scale_col, shift_col):
    """BatchNorm pass 2 (scale*y + shift, ReLU) emitting bf16.

    Lane-density: when the channel count is < 128, the (rows, cols) array is
    viewed as (rows/f, f*cols) (row-major layout is unchanged) and scale/shift
    are tiled f times, so loads/stores hit full 128-lane vregs instead of
    masked partial stores."""
    rows, cols = y2d.shape

    f = 1
    if cols < 128 and 128 % cols == 0:
        f = 128 // cols
        while f > 1 and (rows % f != 0 or (rows // f) % 8 != 0):
            f //= 2
    rowsf, colsf = rows // f, cols * f

    y2d = y2d.reshape(rowsf, colsf)
    scale = jnp.tile(scale_col.astype(jnp.float32), f).reshape(1, colsf)
    shift = jnp.tile(shift_col.astype(jnp.float32), f).reshape(1, colsf)

    tr = min(_TM_MAX, rowsf)
    while rowsf % tr != 0:          # rowsf is always a multiple of 8
        tr -= 8

    out = pl.pallas_call(
        _affine_relu_kernel,
        out_shape=jax.ShapeDtypeStruct((rowsf, colsf), jnp.bfloat16),
        grid=(rowsf // tr,),
        in_specs=[
            pl.BlockSpec((tr, colsf), lambda i: (i, 0)),
            pl.BlockSpec((1, colsf), lambda i: (0, 0)),
            pl.BlockSpec((1, colsf), lambda i: (0, 0)),
        ],
        out_specs=pl.BlockSpec((tr, colsf), lambda i: (i, 0)),
        compiler_params=pltpu.CompilerParams(
            dimension_semantics=("parallel",),
            vmem_limit_bytes=_VMEM_LIMIT,
        ),
    )(y2d, scale, shift)
    return out.reshape(rows, cols)


def _matmul_t_tanh(w_stack, pt_stack, bias, tk, tn):
    nph, kp, np_ = pt_stack.shape
    nn, nk = np_ // tn, kp // tk
    return pl.pallas_call(
        _gemm_t_bias_tanh_kernel,
        out_shape=jax.ShapeDtypeStruct((nph, 8, np_), jnp.float32),
        grid=(nph, nn, nk),
        in_specs=[
            pl.BlockSpec((None, 8, tk), lambda p, i, k: (p, 0, k)),
            pl.BlockSpec((None, tk, tn), lambda p, i, k: (p, k, i)),
            pl.BlockSpec((1, 1), lambda p, i, k: (0, 0)),
        ],
        out_specs=pl.BlockSpec((None, 8, tn), lambda p, i, k: (p, 0, i)),
        scratch_shapes=[pltpu.VMEM((8, tn), jnp.float32)],
        compiler_params=pltpu.CompilerParams(
            dimension_semantics=("parallel", "parallel", "arbitrary"),
            vmem_limit_bytes=_VMEM_LIMIT,
        ),
    )(w_stack, pt_stack, bias)


# ----------------------------------------------------------------------------
# plain-JAX glue: sub-pixel (phase) decomposition of ConvTranspose2d(k=4,s=2,p=1)
# ----------------------------------------------------------------------------
def _phase_patches(a, transposed=False):
    """Sub-pixel im2col.  a: (N, H, W, C) ->
       (4, N*H*W, 4*C)  if not transposed, or (4, 4*C, N*H*W) if transposed.
    Phase order (ry, rx) in [(0,0),(0,1),(1,0),(1,1)]: phase (ry, rx) holds the
    output pixels (2i+ry, 2j+rx)."""
    n, h, w, c = a.shape
    ap = jnp.pad(a, ((0, 0), (1, 1), (1, 1), (0, 0)))
    phases = []
    for ry in (0, 1):
        for rx in (0, 1):
            taps = [ap[:, ry + dy:ry + dy + h, rx + dx:rx + dx + w, :]
                    for dy in (0, 1) for dx in (0, 1)]          # 4 x (N,H,W,C)
            if transposed:
                t = jnp.stack(taps, axis=0)                     # (4,N,H,W,C)
                t = t.transpose(0, 4, 1, 2, 3).reshape(4 * c, n * h * w)
            else:
                t = jnp.stack(taps, axis=3).reshape(n * h * w, 4 * c)
            phases.append(t)
    return jnp.stack(phases, axis=0)


def _interleave_phases(yp):
    """yp: (4, N, H, W, C) in the phase order above -> (N, 2H, 2W, C)."""
    _, n, h, w, c = yp.shape
    y = yp.reshape(2, 2, n, h, w, c).transpose(2, 3, 0, 4, 1, 5)
    return y.reshape(n, 2 * h, 2 * w, c)


def _phase_weight_mats(wt):
    """ConvTranspose2d weight (Cin, Cout, 4, 4) -> (4, 4*Cin, Cout), matching the
    tap/channel column order of _phase_patches: tap (dy, dx) of phase (ry, rx)
    multiplies kernel element (3-ry-2*dy, 3-rx-2*dx)."""
    cin, cout = wt.shape[0], wt.shape[1]
    mats = []
    for ry in (0, 1):
        for rx in (0, 1):
            taps = [wt[:, :, 3 - ry - 2 * dy, 3 - rx - 2 * dx]
                    for dy in (0, 1) for dx in (0, 1)]          # 4 x (Cin, Cout)
            mats.append(jnp.stack(taps, axis=0).reshape(4 * cin, cout))
    return jnp.stack(mats, axis=0)


# ----------------------------------------------------------------------------
# layer blocks
# ----------------------------------------------------------------------------
def _input_block(x2d, w0m, gamma, beta):
    """ConvTranspose2d(noise, C1, 4, s=1, p=0, bias=False) on 1x1 input + BN + ReLU.
    x2d: (N, noise) bf16, w0m: (1, Kp, 16*C1) bf16 -> (N, 4, 4, C1) bf16 NHWC."""
    n, noise = x2d.shape
    kp, c16 = w0m.shape[1], w0m.shape[2]
    c1 = c16 // (K * K)
    tk = min(_TK_MAX, kp)
    tm, mp = _m_tiles(n)

    p = jnp.pad(x2d, ((0, mp - n), (0, kp - noise)))[None]       # (1, Mp, Kp)
    y, s, ss = _matmul_with_stats(p, w0m, tm, tk)                # y: (1, Mp, 16*C1)

    # fold the 16 spatial taps into per-channel BN statistics
    s = s.reshape(K * K, c1).sum(axis=0)
    ss = ss.reshape(K * K, c1).sum(axis=0)
    cnt = float(K * K) * n
    mean = s / cnt
    var = ss / cnt - mean * mean                                 # biased (training BN)
    scale = gamma * jax.lax.rsqrt(var + BN_EPS)
    shift = beta - mean * scale

    yn = _affine_relu(y.reshape(mp, c16),
                      jnp.tile(scale, K * K), jnp.tile(shift, K * K))
    return yn[:n].reshape(n, K, K, c1)


def _up_block(a, w_stack, gamma, beta):
    """ConvTranspose2d(Cin, Cout, 4, s=2, p=1, bias=False) + BN + ReLU via 4
    sub-pixel phase GEMMs in one pallas_call.  a: (N,H,W,Cin) -> (N,2H,2W,Cout)."""
    n, h, w, cin = a.shape
    kd = 4 * cin
    kp, cout = w_stack.shape[1], w_stack.shape[2]
    tk = min(_TK_MAX, kp)
    m = n * h * w
    tm, mp = _m_tiles(m)

    # TODO(synk): build the phase patches inside the GEMM kernel from a halo'd
    # NHWC tile (manual DMA) instead of materializing the 4x-expanded patch
    # tensor in HBM; phase decomposition + bf16 already removes the naive
    # implementation's 4x dilation-zero and 2x dtype amplification.
    p = _phase_patches(a)                                        # (4, M, Kd) bf16
    p = jnp.pad(p, ((0, 0), (0, mp - m), (0, kp - kd)))
    y, s, ss = _matmul_with_stats(p, w_stack, tm, tk)            # y: (4, Mp, Cout)

    cnt = 4.0 * m                                                # all output pixels
    mean = s / cnt
    var = ss / cnt - mean * mean
    scale = gamma * jax.lax.rsqrt(var + BN_EPS)
    shift = beta - mean * scale

    yn = _affine_relu(y.reshape(4 * mp, cout), scale, shift)
    yn = yn.reshape(4, mp, cout)[:, :m, :].reshape(4, n, h, w, cout)
    return _interleave_phases(yn)


def _output_block(a, w4_stack, bias):
    """Final ConvTranspose2d(C, 1, 4, s=2, p=1) + Tanh, computed transposed so the
    spatial dim is lane-dense.  a: (N,H,W,C) bf16 -> (N, 1, 2H, 2W) f32 NCHW."""
    n, h, w, cin = a.shape
    kd = 4 * cin
    kp = w4_stack.shape[2]
    tk = min(_TK_MAX, kp)
    m = n * h * w
    tn = min(_TM_MAX, _round_up(m, 128))
    np_ = _round_up(m, tn)

    pt = _phase_patches(a, transposed=True)                      # (4, Kd, M) bf16
    pt = jnp.pad(pt, ((0, 0), (0, kp - kd), (0, np_ - m)))
    o = _matmul_t_tanh(w4_stack, pt,
                       bias.reshape(1, 1).astype(jnp.float32), tk, tn)
    o = o[:, 0, :m].reshape(4, n, h, w, 1)                       # row 0 = the Cout=1 output
    img = _interleave_phases(o)                                  # (N, 2H, 2W, 1)
    return img.transpose(0, 3, 1, 2)                             # back to NCHW


# ----------------------------------------------------------------------------
# Generator: parameters + forward
# ----------------------------------------------------------------------------
def init_generator_params(key, noise_sz=100, feature_sz=32):
    """Random parameters in PyTorch layout, pre-flattened once into the padded
    bf16 (phase, K, Cout) GEMM matrices the kernels consume."""
    chans = [noise_sz, feature_sz * 16, feature_sz * 8, feature_sz * 4,
             feature_sz * 2, 1]
    keys = jax.random.split(key, 14)
    ki = 0
    params = {}

    # block 0: ConvTranspose2d(noise, 16f, 4, 1, 0, bias=False) + BN + ReLU
    cin, cout = chans[0], chans[1]
    wt = 0.05 * jax.random.normal(keys[ki], (cin, cout, K, K), jnp.float32); ki += 1
    w0m = wt.transpose(0, 2, 3, 1).reshape(cin, K * K * cout)    # col = (kh, kw, cout)
    _, kp = _k_tiles(cin)
    params["w0m"] = jnp.pad(w0m, ((0, kp - cin), (0, 0)))[None].astype(jnp.bfloat16)
    params["gamma0"] = 1.0 + 0.1 * jax.random.normal(keys[ki], (cout,), jnp.float32); ki += 1
    params["beta0"] = 0.1 * jax.random.normal(keys[ki], (cout,), jnp.float32); ki += 1

    # blocks 1..3: ConvTranspose2d(cin, cout, 4, 2, 1, bias=False) + BN + ReLU
    for i in range(1, 4):
        cin, cout = chans[i], chans[i + 1]
        wt = 0.05 * jax.random.normal(keys[ki], (cin, cout, K, K), jnp.float32); ki += 1
        wm = _phase_weight_mats(wt)                              # (4, 4*cin, cout)
        _, kp = _k_tiles(4 * cin)
        params[f"w{i}m"] = jnp.pad(
            wm, ((0, 0), (0, kp - 4 * cin), (0, 0))).astype(jnp.bfloat16)
        params[f"gamma{i}"] = 1.0 + 0.1 * jax.random.normal(keys[ki], (cout,), jnp.float32); ki += 1
        params[f"beta{i}"] = 0.1 * jax.random.normal(keys[ki], (cout,), jnp.float32); ki += 1

    # final: ConvTranspose2d(2f, 1, 4, 2, 1) + Tanh; stored transposed with the
    # weight vector replicated to 8 rows so the kernel's LHS is a clean (8, K) tile.
    cin, cout = chans[4], chans[5]
    wt = 0.05 * jax.random.normal(keys[ki], (cin, cout, K, K), jnp.float32); ki += 1
    wv = _phase_weight_mats(wt)[:, :, 0]                         # (4, 4*cin)
    wv = jnp.broadcast_to(wv[:, None, :], (4, 8, 4 * cin))
    _, kp = _k_tiles(4 * cin)
    params["w4m"] = jnp.pad(wv, ((0, 0), (0, 0), (0, kp - 4 * cin))).astype(jnp.bfloat16)
    params["b4"] = 0.1 * jax.random.normal(keys[ki], (cout,), jnp.float32); ki += 1
    return params


@jax.jit
def generator_forward(params, x):
    """x: (N, noise_sz, 1, 1) NCHW f32 -> (N, 1, 64, 64) NCHW f32."""
    n = x.shape[0]
    a = _input_block(x.reshape(n, -1).astype(jnp.bfloat16),
                     params["w0m"], params["gamma0"], params["beta0"])
    for i in range(1, 4):
        a = _up_block(a, params[f"w{i}m"], params[f"gamma{i}"], params[f"beta{i}"])
    return _output_block(a, params["w4m"], params["b4"])


if __name__ == "__main__":
    # Small, module-consistent config: noise_sz=16, feature_sz=4, batch=2.
    NOISE_SZ, FEATURE_SZ, BATCH = 16, 4, 2
    key = jax.random.PRNGKey(0)
    pkey, xkey = jax.random.split(key)
    params = init_generator_params(pkey, noise_sz=NOISE_SZ, feature_sz=FEATURE_SZ)
    x = jax.random.normal(xkey, (BATCH, NOISE_SZ, 1, 1), jnp.float32)

    out = jax.block_until_ready(generator_forward(params, x))

    assert out.shape == (BATCH, 1, 64, 64), out.shape
    assert bool(jnp.all(jnp.isfinite(out)))
    print("KERNEL_OK")
</pallas_src>

<mosaic_0001>
module attributes {stable_mosaic.version = 11 : i64} {
  func.func @_gemm_stats_kernel(%arg0: i32, %arg1: i32, %arg2: i32, %arg3: memref<1x8x128xbf16, #tpu.memory_space<vmem>>, %arg4: memref<1x128x1024xbf16, #tpu.memory_space<vmem>>, %arg5: memref<1x8x1024xbf16, #tpu.memory_space<vmem>>, %arg6: memref<1x8x1024xf32, #tpu.memory_space<vmem>>, %arg7: memref<8x1024xf32, #tpu.memory_space<vmem>>) attributes {dimension_semantics = [#tpu.dimension_semantics<parallel>, #tpu.dimension_semantics<parallel>, #tpu.dimension_semantics<arbitrary>], iteration_bounds = array<i64: 1, 1, 1>, scalar_prefetch = 0 : i64, scratch_operands = 1 : i64, tpu.core_type = #tpu.core_type<tc>, window_params = [{transform_indices = @transform_0, window_bounds = array<i64: 1, 8, 128>}, {transform_indices = @transform_1, window_bounds = array<i64: 1, 128, 1024>}, {transform_indices = @transform_2, window_bounds = array<i64: 1, 8, 1024>}, {transform_indices = @transform_3, window_bounds = array<i64: 1, 8, 1024>}]} {
    %c0_i32 = arith.constant 0 : i32
    %0 = arith.cmpi eq, %arg2, %c0_i32 : i32
    %1 = arith.extui %0 : i1 to i32
    %c0_i32_0 = arith.constant 0 : i32
    %2 = arith.cmpi ne, %1, %c0_i32_0 : i32
    scf.if %2 {
      %cst_12 = arith.constant 0.000000e+00 : f32
      %14 = vector.broadcast %cst_12 : f32 to vector<8x1024xf32>
      %c0_13 = arith.constant 0 : index
      %c0_14 = arith.constant 0 : index
      %15 = vector.load %arg7[%c0_13, %c0_14] : memref<8x1024xf32, #tpu.memory_space<vmem>>, vector<8x1024xf32>
      tpu.vector_store %arg7[%c0_13, %c0_14], %14 {strides = array<i32>} : memref<8x1024xf32, #tpu.memory_space<vmem>>, vector<8x1024xf32>,
    } else {
    }
    %c0 = arith.constant 0 : index
    %c0_1 = arith.constant 0 : index
    %3 = vector.load %arg7[%c0, %c0_1] : memref<8x1024xf32, #tpu.memory_space<vmem>>, vector<8x1024xf32>
    %c0_2 = arith.constant 0 : index
    %c0_3 = arith.constant 0 : index
    %c0_4 = arith.constant 0 : index
    %4 = vector.load %arg3[%c0_2, %c0_3, %c0_4] : memref<1x8x128xbf16, #tpu.memory_space<vmem>>, vector<1x8x128xbf16>
    %5 = vector.shape_cast %4 : vector<1x8x128xbf16> to vector<8x128xbf16>
    %c0_5 = arith.constant 0 : index
    %c0_6 = arith.constant 0 : index
    %c0_7 = arith.constant 0 : index
    %6 = vector.load %arg4[%c0_5, %c0_6, %c0_7] : memref<1x128x1024xbf16, #tpu.memory_space<vmem>>, vector<1x128x1024xbf16>
    %7 = vector.shape_cast %6 : vector<1x128x1024xbf16> to vector<128x1024xbf16>
    %cst = arith.constant dense<0.000000e+00> : vector<8x1024xf32>
    %8 = tpu.matmul %5, %7, %cst {dimension_numbers = #tpu.dot_dimension_numbers<[1], [0], [0], [1], [0, 0, 1, 1], [], []>} : vector<8x128xbf16>, vector<128x1024xbf16>, vector<8x1024xf32> -> vector<8x1024xf32>
    %9 = arith.addf %3, %8 : vector<8x1024xf32>
    %c0_8 = arith.constant 0 : index
    %c0_9 = arith.constant 0 : index
    %10 = vector.load %arg7[%c0_8, %c0_9] : memref<8x1024xf32, #tpu.memory_space<vmem>>, vector<8x1024xf32>
    tpu.vector_store %arg7[%c0_8, %c0_9], %9 {strides = array<i32>} : memref<8x1024xf32, #tpu.memory_space<vmem>>, vector<8x1024xf32>,
    %c0_i32_10 = arith.constant 0 : i32
    %11 = arith.cmpi eq, %arg2, %c0_i32_10 : i32
    %12 = arith.extui %11 : i1 to i32
    %c0_i32_11 = arith.constant 0 : i32
    %13 = arith.cmpi ne, %12, %c0_i32_11 : i32
    scf.if %13 {
      %c0_12 = arith.constant 0 : index
      %c0_13 = arith.constant 0 : index
      %14 = vector.load %arg7[%c0_12, %c0_13] : memref<8x1024xf32, #tpu.memory_space<vmem>>, vector<8x1024xf32>
      %15 = arith.truncf %14 : vector<8x1024xf32> to vector<8x1024xbf16>
      %c0_14 = arith.constant 0 : index
      %c0_15 = arith.constant 0 : index
      %c0_16 = arith.constant 0 : index
      %16 = vector.load %arg5[%c0_14, %c0_15, %c0_16] : memref<1x8x1024xbf16, #tpu.memory_space<vmem>>, vector<1x8x1024xbf16>
      %17 = vector.shape_cast %16 : vector<1x8x1024xbf16> to vector<8x1024xbf16>
      %18 = vector.shape_cast %15 : vector<8x1024xbf16> to vector<1x8x1024xbf16>
      tpu.vector_store %arg5[%c0_14, %c0_15, %c0_16], %18 {strides = array<i32>} : memref<1x8x1024xbf16, #tpu.memory_space<vmem>>, vector<1x8x1024xbf16>,
      %cst_17 = arith.constant dense<0.000000e+00> : vector<1024xf32>
      %19 = vector.multi_reduction <add>, %14, %cst_17 [0] : vector<8x1024xf32> to vector<1024xf32>
      %20 = vector.shape_cast %19 : vector<1024xf32> to vector<1x1024xf32>
      %21 = arith.mulf %14, %14 : vector<8x1024xf32>
      %cst_18 = arith.constant dense<0.000000e+00> : vector<1024xf32>
      %22 = vector.multi_reduction <add>, %21, %cst_18 [0] : vector<8x1024xf32> to vector<1024xf32>
      %23 = vector.shape_cast %22 : vector<1024xf32> to vector<1x1024xf32>
      %24 = tpu.iota {dimensions = array<i32: 0>} : vector<8x1024xi32>
      %c0_i32_19 = arith.constant 0 : i32
      %25 = vector.broadcast %c0_i32_19 : i32 to vector<8x1024xi32>
      %26 = arith.cmpi eq, %24, %25 : vector<8x1024xi32>
      %cst_20 = arith.constant 0.000000e+00 : f32
      %27 = vector.shape_cast %20 : vector<1x1024xf32> to vector<1x1024xf32>
      %28 = vector.broadcast %27 : vector<1x1024xf32> to vector<8x1024xf32>
      %29 = vector.broadcast %cst_20 : f32 to vector<8x1024xf32>
      %30 = arith.select %26, %28, %29 : vector<8x1024xi1>, vector<8x1024xf32>
      %c1_i32 = arith.constant 1 : i32
      %31 = vector.broadcast %c1_i32 : i32 to vector<8x1024xi32>
      %32 = arith.cmpi eq, %24, %31 : vector<8x1024xi32>
      %cst_21 = arith.constant 0.000000e+00 : f32
      %33 = vector.shape_cast %23 : vector<1x1024xf32> to vector<1x1024xf32>
      %34 = vector.broadcast %33 : vector<1x1024xf32> to vector<8x1024xf32>
      %35 = vector.broadcast %cst_21 : f32 to vector<8x1024xf32>
      %36 = arith.select %32, %34, %35 : vector<8x1024xi1>, vector<8x1024xf32>
      %37 = arith.addf %30, %36 : vector<8x1024xf32>
      %c0_22 = arith.constant 0 : index
      %c0_23 = arith.constant 0 : index
      %c0_24 = arith.constant 0 : index
      %38 = vector.load %arg6[%c0_22, %c0_23, %c0_24] : memref<1x8x1024xf32, #tpu.memory_space<vmem>>, vector<1x8x1024xf32>
      %39 = vector.shape_cast %38 : vector<1x8x1024xf32> to vector<8x1024xf32>
      %40 = vector.shape_cast %37 : vector<8x1024xf32> to vector<1x8x1024xf32>
      tpu.vector_store %arg6[%c0_22, %c0_23, %c0_24], %40 {strides = array<i32>} : memref<1x8x1024xf32, #tpu.memory_space<vmem>>, vector<1x8x1024xf32>,
    } else {
    }
    return
  }
  func.func @transform_0(%arg0: i32, %arg1: i32, %arg2: i32) -> (i32, i32, i32) {
    %c0_i32 = arith.constant 0 : i32
    return %arg0, %arg1, %arg2 : i32, i32, i32
  }
  func.func @transform_1(%arg0: i32, %arg1: i32, %arg2: i32) -> (i32, i32, i32) {
    %c0_i32 = arith.constant 0 : i32
    %c0_i32_0 = arith.constant 0 : i32
    return %arg0, %arg2, %c0_i32 : i32, i32, i32
  }
  func.func @transform_2(%arg0: i32, %arg1: i32, %arg2: i32) -> (i32, i32, i32) {
    %c0_i32 = arith.constant 0 : i32
    %c0_i32_0 = arith.constant 0 : i32
    return %arg0, %arg1, %c0_i32 : i32, i32, i32
  }
  func.func @transform_3(%arg0: i32, %arg1: i32, %arg2: i32) -> (i32, i32, i32) {
    %c0_i32 = arith.constant 0 : i32
    %c0_i32_0 = arith.constant 0 : i32
    return %arg0, %arg1, %c0_i32 : i32, i32, i32
  }
}

module attributes {stable_mosaic.version = 11 : i64} {
  func.func @_affine_relu_kernel(%arg0: i32, %arg1: memref<8x1024xbf16, #tpu.memory_space<vmem>>, %arg2: memref<1x1024xf32, #tpu.memory_space<vmem>>, %arg3: memref<1x1024xf32, #tpu.memory_space<vmem>>, %arg4: memref<8x1024xbf16, #tpu.memory_space<vmem>>) attributes {dimension_semantics = [#tpu.dimension_semantics<parallel>], iteration_bounds = array<i64: 1>, scalar_prefetch = 0 : i64, scratch_operands = 0 : i64, tpu.core_type = #tpu.core_type<tc>, window_params = [{transform_indices = @transform_0, window_bounds = array<i64: 8, 1024>}, {pipeline_mode = #tpu.pipeline_mode<synchronous>, transform_indices = @transform_1, window_bounds = array<i64: 1, 1024>}, {pipeline_mode = #tpu.pipeline_mode<synchronous>, transform_indices = @transform_2, window_bounds = array<i64: 1, 1024>}, {transform_indices = @transform_3, window_bounds = array<i64: 8, 1024>}]} {
    %c0 = arith.constant 0 : index
    %c0_0 = arith.constant 0 : index
    %0 = vector.load %arg1[%c0, %c0_0] : memref<8x1024xbf16, #tpu.memory_space<vmem>>, vector<8x1024xbf16>
    %1 = arith.extf %0 : vector<8x1024xbf16> to vector<8x1024xf32>
    %c0_1 = arith.constant 0 : index
    %c0_2 = arith.constant 0 : index
    %2 = vector.load %arg2[%c0_1, %c0_2] : memref<1x1024xf32, #tpu.memory_space<vmem>>, vector<1x1024xf32>
    %3 = vector.broadcast %2 : vector<1x1024xf32> to vector<8x1024xf32>
    %4 = arith.mulf %1, %3 : vector<8x1024xf32>
    %c0_3 = arith.constant 0 : index
    %c0_4 = arith.constant 0 : index
    %5 = vector.load %arg3[%c0_3, %c0_4] : memref<1x1024xf32, #tpu.memory_space<vmem>>, vector<1x1024xf32>
    %6 = vector.broadcast %5 : vector<1x1024xf32> to vector<8x1024xf32>
    %7 = arith.addf %4, %6 : vector<8x1024xf32>
    %cst = arith.constant 0.000000e+00 : f32
    %8 = vector.broadcast %cst : f32 to vector<8x1024xf32>
    %9 = arith.maximumf %7, %8 : vector<8x1024xf32>
    %10 = arith.truncf %9 : vector<8x1024xf32> to vector<8x1024xbf16>
    %c0_5 = arith.constant 0 : index
    %c0_6 = arith.constant 0 : index
    %11 = vector.load %arg4[%c0_5, %c0_6] : memref<8x1024xbf16, #tpu.memory_space<vmem>>, vector<8x1024xbf16>
    tpu.vector_store %arg4[%c0_5, %c0_6], %10 {strides = array<i32>} : memref<8x1024xbf16, #tpu.memory_space<vmem>>, vector<8x1024xbf16>,
    return
  }
  func.func @transform_0(%arg0: i32) -> (i32, i32) {
    %c0_i32 = arith.constant 0 : i32
    %c0_i32_0 = arith.constant 0 : i32
    return %arg0, %c0_i32 : i32, i32
  }
  func.func @transform_1(%arg0: i32) -> (i32, i32) {
    %c0_i32 = arith.constant 0 : i32
    %c0_i32_0 = arith.constant 0 : i32
    %c0_i32_1 = arith.constant 0 : i32
    return %c0_i32, %c0_i32_0 : i32, i32
  }
  func.func @transform_2(%arg0: i32) -> (i32, i32) {
    %c0_i32 = arith.constant 0 : i32
    %c0_i32_0 = arith.constant 0 : i32
    %c0_i32_1 = arith.constant 0 : i32
    return %c0_i32, %c0_i32_0 : i32, i32
  }
  func.func @transform_3(%arg0: i32) -> (i32, i32) {
    %c0_i32 = arith.constant 0 : i32
    %c0_i32_0 = arith.constant 0 : i32
    return %arg0, %c0_i32 : i32, i32
  }
}

module attributes {stable_mosaic.version = 11 : i64} {
  func.func @_gemm_stats_kernel(%arg0: i32, %arg1: i32, %arg2: i32, %arg3: memref<1x32x256xbf16, #tpu.memory_space<vmem>>, %arg4: memref<1x256x32xbf16, #tpu.memory_space<vmem>>, %arg5: memref<1x32x32xbf16, #tpu.memory_space<vmem>>, %arg6: memref<1x8x32xf32, #tpu.memory_space<vmem>>, %arg7: memref<32x32xf32, #tpu.memory_space<vmem>>) attributes {dimension_semantics = [#tpu.dimension_semantics<parallel>, #tpu.dimension_semantics<parallel>, #tpu.dimension_semantics<arbitrary>], iteration_bounds = array<i64: 4, 1, 1>, scalar_prefetch = 0 : i64, scratch_operands = 1 : i64, tpu.core_type = #tpu.core_type<tc>, window_params = [{transform_indices = @transform_0, window_bounds = array<i64: 1, 32, 256>}, {transform_indices = @transform_1, window_bounds = array<i64: 1, 256, 32>}, {transform_indices = @transform_2, window_bounds = array<i64: 1, 32, 32>}, {transform_indices = @transform_3, window_bounds = array<i64: 1, 8, 32>}]} {
    %c0_i32 = arith.constant 0 : i32
    %0 = arith.cmpi eq, %arg2, %c0_i32 : i32
    %1 = arith.extui %0 : i1 to i32
    %c0_i32_0 = arith.constant 0 : i32
    %2 = arith.cmpi ne, %1, %c0_i32_0 : i32
    scf.if %2 {
      %cst_12 = arith.constant 0.000000e+00 : f32
      %14 = vector.broadcast %cst_12 : f32 to vector<32x32xf32>
      %c0_13 = arith.constant 0 : index
      %c0_14 = arith.constant 0 : index
      %15 = vector.load %arg7[%c0_13, %c0_14] : memref<32x32xf32, #tpu.memory_space<vmem>>, vector<32x32xf32>
      tpu.vector_store %arg7[%c0_13, %c0_14], %14 {strides = array<i32>} : memref<32x32xf32, #tpu.memory_space<vmem>>, vector<32x32xf32>,
    } else {
    }
    %c0 = arith.constant 0 : index
    %c0_1 = arith.constant 0 : index
    %3 = vector.load %arg7[%c0, %c0_1] : memref<32x32xf32, #tpu.memory_space<vmem>>, vector<32x32xf32>
    %c0_2 = arith.constant 0 : index
    %c0_3 = arith.constant 0 : index
    %c0_4 = arith.constant 0 : index
    %4 = vector.load %arg3[%c0_2, %c0_3, %c0_4] : memref<1x32x256xbf16, #tpu.memory_space<vmem>>, vector<1x32x256xbf16>
    %5 = vector.shape_cast %4 : vector<1x32x256xbf16> to vector<32x256xbf16>
    %c0_5 = arith.constant 0 : index
    %c0_6 = arith.constant 0 : index
    %c0_7 = arith.constant 0 : index
    %6 = vector.load %arg4[%c0_5, %c0_6, %c0_7] : memref<1x256x32xbf16, #tpu.memory_space<vmem>>, vector<1x256x32xbf16>
    %7 = vector.shape_cast %6 : vector<1x256x32xbf16> to vector<256x32xbf16>
    %cst = arith.constant dense<0.000000e+00> : vector<32x32xf32>
    %8 = tpu.matmul %5, %7, %cst {dimension_numbers = #tpu.dot_dimension_numbers<[1], [0], [0], [1], [0, 0, 1, 1], [], []>} : vector<32x256xbf16>, vector<256x32xbf16>, vector<32x32xf32> -> vector<32x32xf32>
    %9 = arith.addf %3, %8 : vector<32x32xf32>
    %c0_8 = arith.constant 0 : index
    %c0_9 = arith.constant 0 : index
    %10 = vector.load %arg7[%c0_8, %c0_9] : memref<32x32xf32, #tpu.memory_space<vmem>>, vector<32x32xf32>
    tpu.vector_store %arg7[%c0_8, %c0_9], %9 {strides = array<i32>} : memref<32x32xf32, #tpu.memory_space<vmem>>, vector<32x32xf32>,
    %c0_i32_10 = arith.constant 0 : i32
    %11 = arith.cmpi eq, %arg2, %c0_i32_10 : i32
    %12 = arith.extui %11 : i1 to i32
    %c0_i32_11 = arith.constant 0 : i32
    %13 = arith.cmpi ne, %12, %c0_i32_11 : i32
    scf.if %13 {
      %c0_12 = arith.constant 0 : index
      %c0_13 = arith.constant 0 : index
      %14 = vector.load %arg7[%c0_12, %c0_13] : memref<32x32xf32, #tpu.memory_space<vmem>>, vector<32x32xf32>
      %15 = arith.truncf %14 : vector<32x32xf32> to vector<32x32xbf16>
      %c0_14 = arith.constant 0 : index
      %c0_15 = arith.constant 0 : index
      %c0_16 = arith.constant 0 : index
      %16 = vector.load %arg5[%c0_14, %c0_15, %c0_16] : memref<1x32x32xbf16, #tpu.memory_space<vmem>>, vector<1x32x32xbf16>
      %17 = vector.shape_cast %16 : vector<1x32x32xbf16> to vector<32x32xbf16>
      %18 = vector.shape_cast %15 : vector<32x32xbf16> to vector<1x32x32xbf16>
      tpu.vector_store %arg5[%c0_14, %c0_15, %c0_16], %18 {strides = array<i32>} : memref<1x32x32xbf16, #tpu.memory_space<vmem>>, vector<1x32x32xbf16>,
      %cst_17 = arith.constant dense<0.000000e+00> : vector<32xf32>
      %19 = vector.multi_reduction <add>, %14, %cst_17 [0] : vector<32x32xf32> to vector<32xf32>
      %20 = vector.shape_cast %19 : vector<32xf32> to vector<1x32xf32>
      %21 = arith.mulf %14, %14 : vector<32x32xf32>
      %cst_18 = arith.constant dense<0.000000e+00> : vector<32xf32>
      %22 = vector.multi_reduction <add>, %21, %cst_18 [0] : vector<32x32xf32> to vector<32xf32>
      %23 = vector.shape_cast %22 : vector<32xf32> to vector<1x32xf32>
      %24 = tpu.iota {dimensions = array<i32: 0>} : vector<8x32xi32>
      %c0_i32_19 = arith.constant 0 : i32
      %25 = vector.broadcast %c0_i32_19 : i32 to vector<8x32xi32>
      %26 = arith.cmpi eq, %24, %25 : vector<8x32xi32>
      %cst_20 = arith.constant 0.000000e+00 : f32
      %27 = vector.shape_cast %20 : vector<1x32xf32> to vector<1x32xf32>
      %28 = vector.broadcast %27 : vector<1x32xf32> to vector<8x32xf32>
      %29 = vector.broadcast %cst_20 : f32 to vector<8x32xf32>
      %30 = arith.select %26, %28, %29 : vector<8x32xi1>, vector<8x32xf32>
      %c1_i32 = arith.constant 1 : i32
      %31 = vector.broadcast %c1_i32 : i32 to vector<8x32xi32>
      %32 = arith.cmpi eq, %24, %31 : vector<8x32xi32>
      %cst_21 = arith.constant 0.000000e+00 : f32
      %33 = vector.shape_cast %23 : vector<1x32xf32> to vector<1x32xf32>
      %34 = vector.broadcast %33 : vector<1x32xf32> to vector<8x32xf32>
      %35 = vector.broadcast %cst_21 : f32 to vector<8x32xf32>
      %36 = arith.select %32, %34, %35 : vector<8x32xi1>, vector<8x32xf32>
      %37 = arith.addf %30, %36 : vector<8x32xf32>
      %c0_22 = arith.constant 0 : index
      %c0_23 = arith.constant 0 : index
      %c0_24 = arith.constant 0 : index
      %38 = vector.load %arg6[%c0_22, %c0_23, %c0_24] : memref<1x8x32xf32, #tpu.memory_space<vmem>>, vector<1x8x32xf32>
      %39 = vector.shape_cast %38 : vector<1x8x32xf32> to vector<8x32xf32>
      %40 = vector.shape_cast %37 : vector<8x32xf32> to vector<1x8x32xf32>
      tpu.vector_store %arg6[%c0_22, %c0_23, %c0_24], %40 {strides = array<i32>} : memref<1x8x32xf32, #tpu.memory_space<vmem>>, vector<1x8x32xf32>,
    } else {
    }
    return
  }
  func.func @transform_0(%arg0: i32, %arg1: i32, %arg2: i32) -> (i32, i32, i32) {
    %c0_i32 = arith.constant 0 : i32
    return %arg0, %arg1, %arg2 : i32, i32, i32
  }
  func.func @transform_1(%arg0: i32, %arg1: i32, %arg2: i32) -> (i32, i32, i32) {
    %c0_i32 = arith.constant 0 : i32
    %c0_i32_0 = arith.constant 0 : i32
    return %arg0, %arg2, %c0_i32 : i32, i32, i32
  }
  func.func @transform_2(%arg0: i32, %arg1: i32, %arg2: i32) -> (i32, i32, i32) {
    %c0_i32 = arith.constant 0 : i32
    %c0_i32_0 = arith.constant 0 : i32
    return %arg0, %arg1, %c0_i32 : i32, i32, i32
  }
  func.func @transform_3(%arg0: i32, %arg1: i32, %arg2: i32) -> (i32, i32, i32) {
    %c0_i32 = arith.constant 0 : i32
    %c0_i32_0 = arith.constant 0 : i32
    return %arg0, %arg1, %c0_i32 : i32, i32, i32
  }
}

module attributes {stable_mosaic.version = 11 : i64} {
  func.func @_affine_relu_kernel(%arg0: i32, %arg1: memref<32x128xbf16, #tpu.memory_space<vmem>>, %arg2: memref<1x128xf32, #tpu.memory_space<vmem>>, %arg3: memref<1x128xf32, #tpu.memory_space<vmem>>, %arg4: memref<32x128xbf16, #tpu.memory_space<vmem>>) attributes {dimension_semantics = [#tpu.dimension_semantics<parallel>], iteration_bounds = array<i64: 1>, scalar_prefetch = 0 : i64, scratch_operands = 0 : i64, tpu.core_type = #tpu.core_type<tc>, window_params = [{transform_indices = @transform_0, window_bounds = array<i64: 32, 128>}, {pipeline_mode = #tpu.pipeline_mode<synchronous>, transform_indices = @transform_1, window_bounds = array<i64: 1, 128>}, {pipeline_mode = #tpu.pipeline_mode<synchronous>, transform_indices = @transform_2, window_bounds = array<i64: 1, 128>}, {transform_indices = @transform_3, window_bounds = array<i64: 32, 128>}]} {
    %c0 = arith.constant 0 : index
    %c0_0 = arith.constant 0 : index
    %0 = vector.load %arg1[%c0, %c0_0] : memref<32x128xbf16, #tpu.memory_space<vmem>>, vector<32x128xbf16>
    %1 = arith.extf %0 : vector<32x128xbf16> to vector<32x128xf32>
    %c0_1 = arith.constant 0 : index
    %c0_2 = arith.constant 0 : index
    %2 = vector.load %arg2[%c0_1, %c0_2] : memref<1x128xf32, #tpu.memory_space<vmem>>, vector<1x128xf32>
    %3 = vector.broadcast %2 : vector<1x128xf32> to vector<32x128xf32>
    %4 = arith.mulf %1, %3 : vector<32x128xf32>
    %c0_3 = arith.constant 0 : index
    %c0_4 = arith.constant 0 : index
    %5 = vector.load %arg3[%c0_3, %c0_4] : memref<1x128xf32, #tpu.memory_space<vmem>>, vector<1x128xf32>
    %6 = vector.broadcast %5 : vector<1x128xf32> to vector<32x128xf32>
    %7 = arith.addf %4, %6 : vector<32x128xf32>
    %cst = arith.constant 0.000000e+00 : f32
    %8 = vector.broadcast %cst : f32 to vector<32x128xf32>
    %9 = arith.maximumf %7, %8 : vector<32x128xf32>
    %10 = arith.truncf %9 : vector<32x128xf32> to vector<32x128xbf16>
    %c0_5 = arith.constant 0 : index
    %c0_6 = arith.constant 0 : index
    %11 = vector.load %arg4[%c0_5, %c0_6] : memref<32x128xbf16, #tpu.memory_space<vmem>>, vector<32x128xbf16>
    tpu.vector_store %arg4[%c0_5, %c0_6], %10 {strides = array<i32>} : memref<32x128xbf16, #tpu.memory_space<vmem>>, vector<32x128xbf16>,
    return
  }
  func.func @transform_0(%arg0: i32) -> (i32, i32) {
    %c0_i32 = arith.constant 0 : i32
    %c0_i32_0 = arith.constant 0 : i32
    return %arg0, %c0_i32 : i32, i32
  }
  func.func @transform_1(%arg0: i32) -> (i32, i32) {
    %c0_i32 = arith.constant 0 : i32
    %c0_i32_0 = arith.constant 0 : i32
    %c0_i32_1 = arith.constant 0 : i32
    return %c0_i32, %c0_i32_0 : i32, i32
  }
  func.func @transform_2(%arg0: i32) -> (i32, i32) {
    %c0_i32 = arith.constant 0 : i32
    %c0_i32_0 = arith.constant 0 : i32
    %c0_i32_1 = arith.constant 0 : i32
    return %c0_i32, %c0_i32_0 : i32, i32
  }
  func.func @transform_3(%arg0: i32) -> (i32, i32) {
    %c0_i32 = arith.constant 0 : i32
    %c0_i32_0 = arith.constant 0 : i32
    return %arg0, %c0_i32 : i32, i32
  }
}

module attributes {stable_mosaic.version = 11 : i64} {
  func.func @_gemm_stats_kernel(%arg0: i32, %arg1: i32, %arg2: i32, %arg3: memref<1x128x128xbf16, #tpu.memory_space<vmem>>, %arg4: memref<1x128x16xbf16, #tpu.memory_space<vmem>>, %arg5: memref<1x128x16xbf16, #tpu.memory_space<vmem>>, %arg6: memref<1x8x16xf32, #tpu.memory_space<vmem>>, %arg7: memref<128x16xf32, #tpu.memory_space<vmem>>) attributes {dimension_semantics = [#tpu.dimension_semantics<parallel>, #tpu.dimension_semantics<parallel>, #tpu.dimension_semantics<arbitrary>], iteration_bounds = array<i64: 4, 1, 1>, scalar_prefetch = 0 : i64, scratch_operands = 1 : i64, tpu.core_type = #tpu.core_type<tc>, window_params = [{transform_indices = @transform_0, window_bounds = array<i64: 1, 128, 128>}, {transform_indices = @transform_1, window_bounds = array<i64: 1, 128, 16>}, {transform_indices = @transform_2, window_bounds = array<i64: 1, 128, 16>}, {transform_indices = @transform_3, window_bounds = array<i64: 1, 8, 16>}]} {
    %c0_i32 = arith.constant 0 : i32
    %0 = arith.cmpi eq, %arg2, %c0_i32 : i32
    %1 = arith.extui %0 : i1 to i32
    %c0_i32_0 = arith.constant 0 : i32
    %2 = arith.cmpi ne, %1, %c0_i32_0 : i32
    scf.if %2 {
      %cst_12 = arith.constant 0.000000e+00 : f32
      %14 = vector.broadcast %cst_12 : f32 to vector<128x16xf32>
      %c0_13 = arith.constant 0 : index
      %c0_14 = arith.constant 0 : index
      %15 = vector.load %arg7[%c0_13, %c0_14] : memref<128x16xf32, #tpu.memory_space<vmem>>, vector<128x16xf32>
      tpu.vector_store %arg7[%c0_13, %c0_14], %14 {strides = array<i32>} : memref<128x16xf32, #tpu.memory_space<vmem>>, vector<128x16xf32>,
    } else {
    }
    %c0 = arith.constant 0 : index
    %c0_1 = arith.constant 0 : index
    %3 = vector.load %arg7[%c0, %c0_1] : memref<128x16xf32, #tpu.memory_space<vmem>>, vector<128x16xf32>
    %c0_2 = arith.constant 0 : index
    %c0_3 = arith.constant 0 : index
    %c0_4 = arith.constant 0 : index
    %4 = vector.load %arg3[%c0_2, %c0_3, %c0_4] : memref<1x128x128xbf16, #tpu.memory_space<vmem>>, vector<1x128x128xbf16>
    %5 = vector.shape_cast %4 : vector<1x128x128xbf16> to vector<128x128xbf16>
    %c0_5 = arith.constant 0 : index
    %c0_6 = arith.constant 0 : index
    %c0_7 = arith.constant 0 : index
    %6 = vector.load %arg4[%c0_5, %c0_6, %c0_7] : memref<1x128x16xbf16, #tpu.memory_space<vmem>>, vector<1x128x16xbf16>
    %7 = vector.shape_cast %6 : vector<1x128x16xbf16> to vector<128x16xbf16>
    %cst = arith.constant dense<0.000000e+00> : vector<128x16xf32>
    %8 = tpu.matmul %5, %7, %cst {dimension_numbers = #tpu.dot_dimension_numbers<[1], [0], [0], [1], [0, 0, 1, 1], [], []>} : vector<128x128xbf16>, vector<128x16xbf16>, vector<128x16xf32> -> vector<128x16xf32>
    %9 = arith.addf %3, %8 : vector<128x16xf32>
    %c0_8 = arith.constant 0 : index
    %c0_9 = arith.constant 0 : index
    %10 = vector.load %arg7[%c0_8, %c0_9] : memref<128x16xf32, #tpu.memory_space<vmem>>, vector<128x16xf32>
    tpu.vector_store %arg7[%c0_8, %c0_9], %9 {strides = array<i32>} : memref<128x16xf32, #tpu.memory_space<vmem>>, vector<128x16xf32>,
    %c0_i32_10 = arith.constant 0 : i32
    %11 = arith.cmpi eq, %arg2, %c0_i32_10 : i32
    %12 = arith.extui %11 : i1 to i32
    %c0_i32_11 = arith.constant 0 : i32
    %13 = arith.cmpi ne, %12, %c0_i32_11 : i32
    scf.if %13 {
      %c0_12 = arith.constant 0 : index
      %c0_13 = arith.constant 0 : index
      %14 = vector.load %arg7[%c0_12, %c0_13] : memref<128x16xf32, #tpu.memory_space<vmem>>, vector<128x16xf32>
      %15 = arith.truncf %14 : vector<128x16xf32> to vector<128x16xbf16>
      %c0_14 = arith.constant 0 : index
      %c0_15 = arith.constant 0 : index
      %c0_16 = arith.constant 0 : index
      %16 = vector.load %arg5[%c0_14, %c0_15, %c0_16] : memref<1x128x16xbf16, #tpu.memory_space<vmem>>, vector<1x128x16xbf16>
      %17 = vector.shape_cast %16 : vector<1x128x16xbf16> to vector<128x16xbf16>
      %18 = vector.shape_cast %15 : vector<128x16xbf16> to vector<1x128x16xbf16>
      tpu.vector_store %arg5[%c0_14, %c0_15, %c0_16], %18 {strides = array<i32>} : memref<1x128x16xbf16, #tpu.memory_space<vmem>>, vector<1x128x16xbf16>,
      %cst_17 = arith.constant dense<0.000000e+00> : vector<16xf32>
      %19 = vector.multi_reduction <add>, %14, %cst_17 [0] : vector<128x16xf32> to vector<16xf32>
      %20 = vector.shape_cast %19 : vector<16xf32> to vector<1x16xf32>
      %21 = arith.mulf %14, %14 : vector<128x16xf32>
      %cst_18 = arith.constant dense<0.000000e+00> : vector<16xf32>
      %22 = vector.multi_reduction <add>, %21, %cst_18 [0] : vector<128x16xf32> to vector<16xf32>
      %23 = vector.shape_cast %22 : vector<16xf32> to vector<1x16xf32>
      %24 = tpu.iota {dimensions = array<i32: 0>} : vector<8x16xi32>
      %c0_i32_19 = arith.constant 0 : i32
      %25 = vector.broadcast %c0_i32_19 : i32 to vector<8x16xi32>
      %26 = arith.cmpi eq, %24, %25 : vector<8x16xi32>
      %cst_20 = arith.constant 0.000000e+00 : f32
      %27 = vector.shape_cast %20 : vector<1x16xf32> to vector<1x16xf32>
      %28 = vector.broadcast %27 : vector<1x16xf32> to vector<8x16xf32>
      %29 = vector.broadcast %cst_20 : f32 to vector<8x16xf32>
      %30 = arith.select %26, %28, %29 : vector<8x16xi1>, vector<8x16xf32>
      %c1_i32 = arith.constant 1 : i32
      %31 = vector.broadcast %c1_i32 : i32 to vector<8x16xi32>
      %32 = arith.cmpi eq, %24, %31 : vector<8x16xi32>
      %cst_21 = arith.constant 0.000000e+00 : f32
      %33 = vector.shape_cast %23 : vector<1x16xf32> to vector<1x16xf32>
      %34 = vector.broadcast %33 : vector<1x16xf32> to vector<8x16xf32>
      %35 = vector.broadcast %cst_21 : f32 to vector<8x16xf32>
      %36 = arith.select %32, %34, %35 : vector<8x16xi1>, vector<8x16xf32>
      %37 = arith.addf %30, %36 : vector<8x16xf32>
      %c0_22 = arith.constant 0 : index
      %c0_23 = arith.constant 0 : index
      %c0_24 = arith.constant 0 : index
      %38 = vector.load %arg6[%c0_22, %c0_23, %c0_24] : memref<1x8x16xf32, #tpu.memory_space<vmem>>, vector<1x8x16xf32>
      %39 = vector.shape_cast %38 : vector<1x8x16xf32> to vector<8x16xf32>
      %40 = vector.shape_cast %37 : vector<8x16xf32> to vector<1x8x16xf32>
      tpu.vector_store %arg6[%c0_22, %c0_23, %c0_24], %40 {strides = array<i32>} : memref<1x8x16xf32, #tpu.memory_space<vmem>>, vector<1x8x16xf32>,
    } else {
    }
    return
  }
  func.func @transform_0(%arg0: i32, %arg1: i32, %arg2: i32) -> (i32, i32, i32) {
    %c0_i32 = arith.constant 0 : i32
    return %arg0, %arg1, %arg2 : i32, i32, i32
  }
  func.func @transform_1(%arg0: i32, %arg1: i32, %arg2: i32) -> (i32, i32, i32) {
    %c0_i32 = arith.constant 0 : i32
    %c0_i32_0 = arith.constant 0 : i32
    return %arg0, %arg2, %c0_i32 : i32, i32, i32
  }
  func.func @transform_2(%arg0: i32, %arg1: i32, %arg2: i32) -> (i32, i32, i32) {
    %c0_i32 = arith.constant 0 : i32
    %c0_i32_0 = arith.constant 0 : i32
    return %arg0, %arg1, %c0_i32 : i32, i32, i32
  }
  func.func @transform_3(%arg0: i32, %arg1: i32, %arg2: i32) -> (i32, i32, i32) {
    %c0_i32 = arith.constant 0 : i32
    %c0_i32_0 = arith.constant 0 : i32
    return %arg0, %arg1, %c0_i32 : i32, i32, i32
  }
}

module attributes {stable_mosaic.version = 11 : i64} {
  func.func @_affine_relu_kernel(%arg0: i32, %arg1: memref<64x128xbf16, #tpu.memory_space<vmem>>, %arg2: memref<1x128xf32, #tpu.memory_space<vmem>>, %arg3: memref<1x128xf32, #tpu.memory_space<vmem>>, %arg4: memref<64x128xbf16, #tpu.memory_space<vmem>>) attributes {dimension_semantics = [#tpu.dimension_semantics<parallel>], iteration_bounds = array<i64: 1>, scalar_prefetch = 0 : i64, scratch_operands = 0 : i64, tpu.core_type = #tpu.core_type<tc>, window_params = [{transform_indices = @transform_0, window_bounds = array<i64: 64, 128>}, {pipeline_mode = #tpu.pipeline_mode<synchronous>, transform_indices = @transform_1, window_bounds = array<i64: 1, 128>}, {pipeline_mode = #tpu.pipeline_mode<synchronous>, transform_indices = @transform_2, window_bounds = array<i64: 1, 128>}, {transform_indices = @transform_3, window_bounds = array<i64: 64, 128>}]} {
    %c0 = arith.constant 0 : index
    %c0_0 = arith.constant 0 : index
    %0 = vector.load %arg1[%c0, %c0_0] : memref<64x128xbf16, #tpu.memory_space<vmem>>, vector<64x128xbf16>
    %1 = arith.extf %0 : vector<64x128xbf16> to vector<64x128xf32>
    %c0_1 = arith.constant 0 : index
    %c0_2 = arith.constant 0 : index
    %2 = vector.load %arg2[%c0_1, %c0_2] : memref<1x128xf32, #tpu.memory_space<vmem>>, vector<1x128xf32>
    %3 = vector.broadcast %2 : vector<1x128xf32> to vector<64x128xf32>
    %4 = arith.mulf %1, %3 : vector<64x128xf32>
    %c0_3 = arith.constant 0 : index
    %c0_4 = arith.constant 0 : index
    %5 = vector.load %arg3[%c0_3, %c0_4] : memref<1x128xf32, #tpu.memory_space<vmem>>, vector<1x128xf32>
    %6 = vector.broadcast %5 : vector<1x128xf32> to vector<64x128xf32>
    %7 = arith.addf %4, %6 : vector<64x128xf32>
    %cst = arith.constant 0.000000e+00 : f32
    %8 = vector.broadcast %cst : f32 to vector<64x128xf32>
    %9 = arith.maximumf %7, %8 : vector<64x128xf32>
    %10 = arith.truncf %9 : vector<64x128xf32> to vector<64x128xbf16>
    %c0_5 = arith.constant 0 : index
    %c0_6 = arith.constant 0 : index
    %11 = vector.load %arg4[%c0_5, %c0_6] : memref<64x128xbf16, #tpu.memory_space<vmem>>, vector<64x128xbf16>
    tpu.vector_store %arg4[%c0_5, %c0_6], %10 {strides = array<i32>} : memref<64x128xbf16, #tpu.memory_space<vmem>>, vector<64x128xbf16>,
    return
  }
  func.func @transform_0(%arg0: i32) -> (i32, i32) {
    %c0_i32 = arith.constant 0 : i32
    %c0_i32_0 = arith.constant 0 : i32
    return %arg0, %c0_i32 : i32, i32
  }
  func.func @transform_1(%arg0: i32) -> (i32, i32) {
    %c0_i32 = arith.constant 0 : i32
    %c0_i32_0 = arith.constant 0 : i32
    %c0_i32_1 = arith.constant 0 : i32
    return %c0_i32, %c0_i32_0 : i32, i32
  }
  func.func @transform_2(%arg0: i32) -> (i32, i32) {
    %c0_i32 = arith.constant 0 : i32
    %c0_i32_0 = arith.constant 0 : i32
    %c0_i32_1 = arith.constant 0 : i32
    return %c0_i32, %c0_i32_0 : i32, i32
  }
  func.func @transform_3(%arg0: i32) -> (i32, i32) {
    %c0_i32 = arith.constant 0 : i32
    %c0_i32_0 = arith.constant 0 : i32
    return %arg0, %c0_i32 : i32, i32
  }
}

module attributes {stable_mosaic.version = 11 : i64} {
  func.func @_gemm_stats_kernel(%arg0: i32, %arg1: i32, %arg2: i32, %arg3: memref<1x512x128xbf16, #tpu.memory_space<vmem>>, %arg4: memref<1x128x8xbf16, #tpu.memory_space<vmem>>, %arg5: memref<1x512x8xbf16, #tpu.memory_space<vmem>>, %arg6: memref<1x8x8xf32, #tpu.memory_space<vmem>>, %arg7: memref<512x8xf32, #tpu.memory_space<vmem>>) attributes {dimension_semantics = [#tpu.dimension_semantics<parallel>, #tpu.dimension_semantics<parallel>, #tpu.dimension_semantics<arbitrary>], iteration_bounds = array<i64: 4, 1, 1>, scalar_prefetch = 0 : i64, scratch_operands = 1 : i64, tpu.core_type = #tpu.core_type<tc>, window_params = [{transform_indices = @transform_0, window_bounds = array<i64: 1, 512, 128>}, {transform_indices = @transform_1, window_bounds = array<i64: 1, 128, 8>}, {transform_indices = @transform_2, window_bounds = array<i64: 1, 512, 8>}, {transform_indices = @transform_3, window_bounds = array<i64: 1, 8, 8>}]} {
    %c0_i32 = arith.constant 0 : i32
    %0 = arith.cmpi eq, %arg2, %c0_i32 : i32
    %1 = arith.extui %0 : i1 to i32
    %c0_i32_0 = arith.constant 0 : i32
    %2 = arith.cmpi ne, %1, %c0_i32_0 : i32
    scf.if %2 {
      %cst_12 = arith.constant 0.000000e+00 : f32
      %14 = vector.broadcast %cst_12 : f32 to vector<512x8xf32>
      %c0_13 = arith.constant 0 : index
      %c0_14 = arith.constant 0 : index
      %15 = vector.load %arg7[%c0_13, %c0_14] : memref<512x8xf32, #tpu.memory_space<vmem>>, vector<512x8xf32>
      tpu.vector_store %arg7[%c0_13, %c0_14], %14 {strides = array<i32>} : memref<512x8xf32, #tpu.memory_space<vmem>>, vector<512x8xf32>,
    } else {
    }
    %c0 = arith.constant 0 : index
    %c0_1 = arith.constant 0 : index
    %3 = vector.load %arg7[%c0, %c0_1] : memref<512x8xf32, #tpu.memory_space<vmem>>, vector<512x8xf32>
    %c0_2 = arith.constant 0 : index
    %c0_3 = arith.constant 0 : index
    %c0_4 = arith.constant 0 : index
    %4 = vector.load %arg3[%c0_2, %c0_3, %c0_4] : memref<1x512x128xbf16, #tpu.memory_space<vmem>>, vector<1x512x128xbf16>
    %5 = vector.shape_cast %4 : vector<1x512x128xbf16> to vector<512x128xbf16>
    %c0_5 = arith.constant 0 : index
    %c0_6 = arith.constant 0 : index
    %c0_7 = arith.constant 0 : index
    %6 = vector.load %arg4[%c0_5, %c0_6, %c0_7] : memref<1x128x8xbf16, #tpu.memory_space<vmem>>, vector<1x128x8xbf16>
    %7 = vector.shape_cast %6 : vector<1x128x8xbf16> to vector<128x8xbf16>
    %cst = arith.constant dense<0.000000e+00> : vector<512x8xf32>
    %8 = tpu.matmul %5, %7, %cst {dimension_numbers = #tpu.dot_dimension_numbers<[1], [0], [0], [1], [0, 0, 1, 1], [], []>} : vector<512x128xbf16>, vector<128x8xbf16>, vector<512x8xf32> -> vector<512x8xf32>
    %9 = arith.addf %3, %8 : vector<512x8xf32>
    %c0_8 = arith.constant 0 : index
    %c0_9 = arith.constant 0 : index
    %10 = vector.load %arg7[%c0_8, %c0_9] : memref<512x8xf32, #tpu.memory_space<vmem>>, vector<512x8xf32>
    tpu.vector_store %arg7[%c0_8, %c0_9], %9 {strides = array<i32>} : memref<512x8xf32, #tpu.memory_space<vmem>>, vector<512x8xf32>,
    %c0_i32_10 = arith.constant 0 : i32
    %11 = arith.cmpi eq, %arg2, %c0_i32_10 : i32
    %12 = arith.extui %11 : i1 to i32
    %c0_i32_11 = arith.constant 0 : i32
    %13 = arith.cmpi ne, %12, %c0_i32_11 : i32
    scf.if %13 {
      %c0_12 = arith.constant 0 : index
      %c0_13 = arith.constant 0 : index
      %14 = vector.load %arg7[%c0_12, %c0_13] : memref<512x8xf32, #tpu.memory_space<vmem>>, vector<512x8xf32>
      %15 = arith.truncf %14 : vector<512x8xf32> to vector<512x8xbf16>
      %c0_14 = arith.constant 0 : index
      %c0_15 = arith.constant 0 : index
      %c0_16 = arith.constant 0 : index
      %16 = vector.load %arg5[%c0_14, %c0_15, %c0_16] : memref<1x512x8xbf16, #tpu.memory_space<vmem>>, vector<1x512x8xbf16>
      %17 = vector.shape_cast %16 : vector<1x512x8xbf16> to vector<512x8xbf16>
      %18 = vector.shape_cast %15 : vector<512x8xbf16> to vector<1x512x8xbf16>
      tpu.vector_store %arg5[%c0_14, %c0_15, %c0_16], %18 {strides = array<i32>} : memref<1x512x8xbf16, #tpu.memory_space<vmem>>, vector<1x512x8xbf16>,
      %cst_17 = arith.constant dense<0.000000e+00> : vector<8xf32>
      %19 = vector.multi_reduction <add>, %14, %cst_17 [0] : vector<512x8xf32> to vector<8xf32>
      %20 = vector.shape_cast %19 : vector<8xf32> to vector<1x8xf32>
      %21 = arith.mulf %14, %14 : vector<512x8xf32>
      %cst_18 = arith.constant dense<0.000000e+00> : vector<8xf32>
      %22 = vector.multi_reduction <add>, %21, %cst_18 [0] : vector<512x8xf32> to vector<8xf32>
      %23 = vector.shape_cast %22 : vector<8xf32> to vector<1x8xf32>
      %24 = tpu.iota {dimensions = array<i32: 0>} : vector<8x8xi32>
      %c0_i32_19 = arith.constant 0 : i32
      %25 = vector.broadcast %c0_i32_19 : i32 to vector<8x8xi32>
      %26 = arith.cmpi eq, %24, %25 : vector<8x8xi32>
      %cst_20 = arith.constant 0.000000e+00 : f32
      %27 = vector.shape_cast %20 : vector<1x8xf32> to vector<1x8xf32>
      %28 = vector.broadcast %27 : vector<1x8xf32> to vector<8x8xf32>
      %29 = vector.broadcast %cst_20 : f32 to vector<8x8xf32>
      %30 = arith.select %26, %28, %29 : vector<8x8xi1>, vector<8x8xf32>
      %c1_i32 = arith.constant 1 : i32
      %31 = vector.broadcast %c1_i32 : i32 to vector<8x8xi32>
      %32 = arith.cmpi eq, %24, %31 : vector<8x8xi32>
      %cst_21 = arith.constant 0.000000e+00 : f32
      %33 = vector.shape_cast %23 : vector<1x8xf32> to vector<1x8xf32>
      %34 = vector.broadcast %33 : vector<1x8xf32> to vector<8x8xf32>
      %35 = vector.broadcast %cst_21 : f32 to vector<8x8xf32>
      %36 = arith.select %32, %34, %35 : vector<8x8xi1>, vector<8x8xf32>
      %37 = arith.addf %30, %36 : vector<8x8xf32>
      %c0_22 = arith.constant 0 : index
      %c0_23 = arith.constant 0 : index
      %c0_24 = arith.constant 0 : index
      %38 = vector.load %arg6[%c0_22, %c0_23, %c0_24] : memref<1x8x8xf32, #tpu.memory_space<vmem>>, vector<1x8x8xf32>
      %39 = vector.shape_cast %38 : vector<1x8x8xf32> to vector<8x8xf32>
      %40 = vector.shape_cast %37 : vector<8x8xf32> to vector<1x8x8xf32>
      tpu.vector_store %arg6[%c0_22, %c0_23, %c0_24], %40 {strides = array<i32>} : memref<1x8x8xf32, #tpu.memory_space<vmem>>, vector<1x8x8xf32>,
    } else {
    }
    return
  }
  func.func @transform_0(%arg0: i32, %arg1: i32, %arg2: i32) -> (i32, i32, i32) {
    %c0_i32 = arith.constant 0 : i32
    return %arg0, %arg1, %arg2 : i32, i32, i32
  }
  func.func @transform_1(%arg0: i32, %arg1: i32, %arg2: i32) -> (i32, i32, i32) {
    %c0_i32 = arith.constant 0 : i32
    %c0_i32_0 = arith.constant 0 : i32
    return %arg0, %arg2, %c0_i32 : i32, i32, i32
  }
  func.func @transform_2(%arg0: i32, %arg1: i32, %arg2: i32) -> (i32, i32, i32) {
    %c0_i32 = arith.constant 0 : i32
    %c0_i32_0 = arith.constant 0 : i32
    return %arg0, %arg1, %c0_i32 : i32, i32, i32
  }
  func.func @transform_3(%arg0: i32, %arg1: i32, %arg2: i32) -> (i32, i32, i32) {
    %c0_i32 = arith.constant 0 : i32
    %c0_i32_0 = arith.constant 0 : i32
    return %arg0, %arg1, %c0_i32 : i32, i32, i32
  }
}

module attributes {stable_mosaic.version = 11 : i64} {
  func.func @_affine_relu_kernel(%arg0: i32, %arg1: memref<128x128xbf16, #tpu.memory_space<vmem>>, %arg2: memref<1x128xf32, #tpu.memory_space<vmem>>, %arg3: memref<1x128xf32, #tpu.memory_space<vmem>>, %arg4: memref<128x128xbf16, #tpu.memory_space<vmem>>) attributes {dimension_semantics = [#tpu.dimension_semantics<parallel>], iteration_bounds = array<i64: 1>, scalar_prefetch = 0 : i64, scratch_operands = 0 : i64, tpu.core_type = #tpu.core_type<tc>, window_params = [{transform_indices = @transform_0, window_bounds = array<i64: 128, 128>}, {pipeline_mode = #tpu.pipeline_mode<synchronous>, transform_indices = @transform_1, window_bounds = array<i64: 1, 128>}, {pipeline_mode = #tpu.pipeline_mode<synchronous>, transform_indices = @transform_2, window_bounds = array<i64: 1, 128>}, {transform_indices = @transform_3, window_bounds = array<i64: 128, 128>}]} {
    %c0 = arith.constant 0 : index
    %c0_0 = arith.constant 0 : index
    %0 = vector.load %arg1[%c0, %c0_0] : memref<128x128xbf16, #tpu.memory_space<vmem>>, vector<128x128xbf16>
    %1 = arith.extf %0 : vector<128x128xbf16> to vector<128x128xf32>
    %c0_1 = arith.constant 0 : index
    %c0_2 = arith.constant 0 : index
    %2 = vector.load %arg2[%c0_1, %c0_2] : memref<1x128xf32, #tpu.memory_space<vmem>>, vector<1x128xf32>
    %3 = vector.broadcast %2 : vector<1x128xf32> to vector<128x128xf32>
    %4 = arith.mulf %1, %3 : vector<128x128xf32>
    %c0_3 = arith.constant 0 : index
    %c0_4 = arith.constant 0 : index
    %5 = vector.load %arg3[%c0_3, %c0_4] : memref<1x128xf32, #tpu.memory_space<vmem>>, vector<1x128xf32>
    %6 = vector.broadcast %5 : vector<1x128xf32> to vector<128x128xf32>
    %7 = arith.addf %4, %6 : vector<128x128xf32>
    %cst = arith.constant 0.000000e+00 : f32
    %8 = vector.broadcast %cst : f32 to vector<128x128xf32>
    %9 = arith.maximumf %7, %8 : vector<128x128xf32>
    %10 = arith.truncf %9 : vector<128x128xf32> to vector<128x128xbf16>
    %c0_5 = arith.constant 0 : index
    %c0_6 = arith.constant 0 : index
    %11 = vector.load %arg4[%c0_5, %c0_6] : memref<128x128xbf16, #tpu.memory_space<vmem>>, vector<128x128xbf16>
    tpu.vector_store %arg4[%c0_5, %c0_6], %10 {strides = array<i32>} : memref<128x128xbf16, #tpu.memory_space<vmem>>, vector<128x128xbf16>,
    return
  }
  func.func @transform_0(%arg0: i32) -> (i32, i32) {
    %c0_i32 = arith.constant 0 : i32
    %c0_i32_0 = arith.constant 0 : i32
    return %arg0, %c0_i32 : i32, i32
  }
  func.func @transform_1(%arg0: i32) -> (i32, i32) {
    %c0_i32 = arith.constant 0 : i32
    %c0_i32_0 = arith.constant 0 : i32
    %c0_i32_1 = arith.constant 0 : i32
    return %c0_i32, %c0_i32_0 : i32, i32
  }
  func.func @transform_2(%arg0: i32) -> (i32, i32) {
    %c0_i32 = arith.constant 0 : i32
    %c0_i32_0 = arith.constant 0 : i32
    %c0_i32_1 = arith.constant 0 : i32
    return %c0_i32, %c0_i32_0 : i32, i32
  }
  func.func @transform_3(%arg0: i32) -> (i32, i32) {
    %c0_i32 = arith.constant 0 : i32
    %c0_i32_0 = arith.constant 0 : i32
    return %arg0, %c0_i32 : i32, i32
  }
}

module attributes {stable_mosaic.version = 11 : i64} {
  func.func @_gemm_t_bias_tanh_kernel(%arg0: i32, %arg1: i32, %arg2: i32, %arg3: memref<1x8x128xbf16, #tpu.memory_space<vmem>>, %arg4: memref<1x128x512xbf16, #tpu.memory_space<vmem>>, %arg5: memref<1x1xf32, #tpu.memory_space<vmem>>, %arg6: memref<1x8x512xf32, #tpu.memory_space<vmem>>, %arg7: memref<8x512xf32, #tpu.memory_space<vmem>>) attributes {dimension_semantics = [#tpu.dimension_semantics<parallel>, #tpu.dimension_semantics<parallel>, #tpu.dimension_semantics<arbitrary>], iteration_bounds = array<i64: 4, 4, 1>, scalar_prefetch = 0 : i64, scratch_operands = 1 : i64, tpu.core_type = #tpu.core_type<tc>, window_params = [{transform_indices = @transform_0, window_bounds = array<i64: 1, 8, 128>}, {transform_indices = @transform_1, window_bounds = array<i64: 1, 128, 512>}, {pipeline_mode = #tpu.pipeline_mode<synchronous>, transform_indices = @transform_2, window_bounds = array<i64: 1, 1>}, {transform_indices = @transform_3, window_bounds = array<i64: 1, 8, 512>}]} {
    %c0_i32 = arith.constant 0 : i32
    %0 = arith.cmpi eq, %arg2, %c0_i32 : i32
    %1 = arith.extui %0 : i1 to i32
    %c0_i32_0 = arith.constant 0 : i32
    %2 = arith.cmpi ne, %1, %c0_i32_0 : i32
    scf.if %2 {
      %cst_12 = arith.constant 0.000000e+00 : f32
      %14 = vector.broadcast %cst_12 : f32 to vector<8x512xf32>
      %c0_13 = arith.constant 0 : index
      %c0_14 = arith.constant 0 : index
      %15 = vector.load %arg7[%c0_13, %c0_14] : memref<8x512xf32, #tpu.memory_space<vmem>>, vector<8x512xf32>
      tpu.vector_store %arg7[%c0_13, %c0_14], %14 {strides = array<i32>} : memref<8x512xf32, #tpu.memory_space<vmem>>, vector<8x512xf32>,
    } else {
    }
    %c0 = arith.constant 0 : index
    %c0_1 = arith.constant 0 : index
    %3 = vector.load %arg7[%c0, %c0_1] : memref<8x512xf32, #tpu.memory_space<vmem>>, vector<8x512xf32>
    %c0_2 = arith.constant 0 : index
    %c0_3 = arith.constant 0 : index
    %c0_4 = arith.constant 0 : index
    %4 = vector.load %arg3[%c0_2, %c0_3, %c0_4] : memref<1x8x128xbf16, #tpu.memory_space<vmem>>, vector<1x8x128xbf16>
    %5 = vector.shape_cast %4 : vector<1x8x128xbf16> to vector<8x128xbf16>
    %c0_5 = arith.constant 0 : index
    %c0_6 = arith.constant 0 : index
    %c0_7 = arith.constant 0 : index
    %6 = vector.load %arg4[%c0_5, %c0_6, %c0_7] : memref<1x128x512xbf16, #tpu.memory_space<vmem>>, vector<1x128x512xbf16>
    %7 = vector.shape_cast %6 : vector<1x128x512xbf16> to vector<128x512xbf16>
    %cst = arith.constant dense<0.000000e+00> : vector<8x512xf32>
    %8 = tpu.matmul %5, %7, %cst {dimension_numbers = #tpu.dot_dimension_numbers<[1], [0], [0], [1], [0, 0, 1, 1], [], []>} : vector<8x128xbf16>, vector<128x512xbf16>, vector<8x512xf32> -> vector<8x512xf32>
    %9 = arith.addf %3, %8 : vector<8x512xf32>
    %c0_8 = arith.constant 0 : index
    %c0_9 = arith.constant 0 : index
    %10 = vector.load %arg7[%c0_8, %c0_9] : memref<8x512xf32, #tpu.memory_space<vmem>>, vector<8x512xf32>
    tpu.vector_store %arg7[%c0_8, %c0_9], %9 {strides = array<i32>} : memref<8x512xf32, #tpu.memory_space<vmem>>, vector<8x512xf32>,
    %c0_i32_10 = arith.constant 0 : i32
    %11 = arith.cmpi eq, %arg2, %c0_i32_10 : i32
    %12 = arith.extui %11 : i1 to i32
    %c0_i32_11 = arith.constant 0 : i32
    %13 = arith.cmpi ne, %12, %c0_i32_11 : i32
    scf.if %13 {
      %c0_12 = arith.constant 0 : index
      %c0_13 = arith.constant 0 : index
      %14 = vector.load %arg7[%c0_12, %c0_13] : memref<8x512xf32, #tpu.memory_space<vmem>>, vector<8x512xf32>
      %c0_14 = arith.constant 0 : index
      %c0_15 = arith.constant 0 : index
      %15 = vector.load %arg5[%c0_14, %c0_15] : memref<1x1xf32, #tpu.memory_space<vmem>>, vector<1x1xf32>
      %16 = vector.broadcast %15 : vector<1x1xf32> to vector<8x512xf32>
      %17 = arith.addf %14, %16 : vector<8x512xf32>
      %18 = math.tanh %17 : vector<8x512xf32>
      %c0_16 = arith.constant 0 : index
      %c0_17 = arith.constant 0 : index
      %c0_18 = arith.constant 0 : index
      %19 = vector.load %arg6[%c0_16, %c0_17, %c0_18] : memref<1x8x512xf32, #tpu.memory_space<vmem>>, vector<1x8x512xf32>
      %20 = vector.shape_cast %19 : vector<1x8x512xf32> to vector<8x512xf32>
      %21 = vector.shape_cast %18 : vector<8x512xf32> to vector<1x8x512xf32>
      tpu.vector_store %arg6[%c0_16, %c0_17, %c0_18], %21 {strides = array<i32>} : memref<1x8x512xf32, #tpu.memory_space<vmem>>, vector<1x8x512xf32>,
    } else {
    }
    return
  }
  func.func @transform_0(%arg0: i32, %arg1: i32, %arg2: i32) -> (i32, i32, i32) {
    %c0_i32 = arith.constant 0 : i32
    %c0_i32_0 = arith.constant 0 : i32
    return %arg0, %c0_i32, %arg2 : i32, i32, i32
  }
  func.func @transform_1(%arg0: i32, %arg1: i32, %arg2: i32) -> (i32, i32, i32) {
    %c0_i32 = arith.constant 0 : i32
    return %arg0, %arg2, %arg1 : i32, i32, i32
  }
  func.func @transform_2(%arg0: i32, %arg1: i32, %arg2: i32) -> (i32, i32) {
    %c0_i32 = arith.constant 0 : i32
    %c0_i32_0 = arith.constant 0 : i32
    %c0_i32_1 = arith.constant 0 : i32
    return %c0_i32, %c0_i32_0 : i32, i32
  }
  func.func @transform_3(%arg0: i32, %arg1: i32, %arg2: i32) -> (i32, i32, i32) {
    %c0_i32 = arith.constant 0 : i32
    %c0_i32_0 = arith.constant 0 : i32
    return %arg0, %c0_i32, %arg1 : i32, i32, i32
  }
}

</mosaic_0001>

<bundles_post_ra>
// kernel: tile.43
= control target key start
LH: loop header
LB: loop body
LE: loop exit
PB: predicated region body
PF: predicated region fallthrough
CT: control target
= control target key end

     0   :  { %s28_s0 = inlined_call_operand.vmem [shape: f32[64], index: 0, kind: input, shape index: {}]   ;;  %s29_s1 = inlined_call_operand.vmem [shape: f32[16,64], index: 1, kind: output, shape index: {}]  }
   0x1   :  { %v4_v0 = vld [vmem:[%s28_s0] ss:$0 sm:$0xff] }
   0x2   :  { %5 = vst [vmem:[%s29_s1] sm:$0xff] %v4_v0  ;;  %8 = vst [vmem:[%s29_s1 + $0x8] sm:$0xff] %v4_v0 }

// kernel: tile.48
= control target key start
LH: loop header
LB: loop body
LE: loop exit
PB: predicated region body
PF: predicated region fallthrough
CT: control target
= control target key end

     0   :  { %vm3_vm0 = vcmask 523264   ;;  %vm10_vm1 = vcmask 1048064   ;;  %s116_s0 = inlined_call_operand.vmem [shape: f32[16,64], index: 0, kind: input, shape index: {}]   ;;  %s117_s1 = inlined_call_operand.vmem [shape: f32[1,1024], index: 1, kind: output, shape index: {}]  }
   0x1   :  { %v66_v0 = vld [vmem:[%s116_s0 + $0x1] ss:$2 sm:$0xff]   ;;  %v2_v1 = vld [vmem:[%s116_s0] ss:$2 sm:$0xff]   ;;  %s75_s0 = smov 64  }
   0x2   :  { %8 = vrot.lane.b32.xlu0 %v66_v0, %s75_s0  ;;  %4 = vst.msk [vmem:[#allocation0] ss:$8 sm:$0xf] %vm3_vm0, %v2_v1   ;;  %5 = vst.msk [vmem:[#allocation0] ss:$8 sm:$0xf0] %vm3_vm0, %v2_v1  }
  0x74   :  { %v9_v2 = vpop.permute.xlu0 %8  }
  0x75   :  { %11 = vst.msk [vmem:[#allocation0] ss:$8 sm:$0xf] %vm10_vm1, %v9_v2   ;;  %12 = vst.msk [vmem:[#allocation0] ss:$8 sm:$0xf0] %vm10_vm1, %v9_v2  }
  0x7c   :  { %v16_v3 = vld [vmem:[#allocation0] sm:$0x1]  ;;  %v20_v4 = vld [vmem:[#allocation0 + $0x8] sm:$0x1]  ;;  %v25_v5 = vld [vmem:[#allocation0 + $0x10] sm:$0x1] }
  0x7d   :  { %18 = vst [vmem:[%s117_s1] sm:$0x1] %v16_v3  ;;  %67 = vst [vmem:[%s117_s1 + $0x1] sm:$0x1] %v20_v4  ;;  %v31_v6 = vld [vmem:[#allocation0 + $0x18] sm:$0x1] }
  0x7e   :  { %68 = vst [vmem:[%s117_s1 + $0x2] sm:$0x1] %v25_v5  ;;  %v37_v7 = vld [vmem:[#allocation0 + $0x20] sm:$0x1]  ;;  %v43_v8 = vld [vmem:[#allocation0 + $0x28] sm:$0x1] }
  0x7f   :  { %69 = vst [vmem:[%s117_s1 + $0x3] sm:$0x1] %v31_v6  ;;  %70 = vst [vmem:[%s117_s1 + $0x4] sm:$0x1] %v37_v7  ;;  %v49_v9 = vld [vmem:[#allocation0 + $0x30] sm:$0x1] }
  0x80   :  { %71 = vst [vmem:[%s117_s1 + $0x5] sm:$0x1] %v43_v8  ;;  %v55_v10 = vld [vmem:[#allocation0 + $0x38] sm:$0x1]  ;;  %72 = vst [vmem:[%s117_s1 + $0x6] sm:$0x1] %v49_v9 }
  0x81   :  { %73 = vst [vmem:[%s117_s1 + $0x7] sm:$0x1] %v55_v10 }

// kernel: generator_forward.10
= control target key start
LH: loop header
LB: loop body
LE: loop exit
PB: predicated region body
PF: predicated region fallthrough
CT: control target
= control target key end

     0   :  { %v28_v0 = vlaneseq  ;;  %s232_s0 = inlined_call_operand.vmem [shape: bf16[8,1024], index: 0, kind: input, shape index: {}]   ;;  %s233_s1 = inlined_call_operand.vmem [shape: f32[1,1024], index: 1, kind: input, shape index: {}]   ;;  %s234_s2 = inlined_call_operand.vmem [shape: f32[1,1024], index: 2, kind: input, shape index: {}]   ;;  %s235_s3 = inlined_call_operand.vmem [shape: bf16[8,1024], index: 3, kind: output, shape index: {}]  }
   0x1   :  { %v14_v1 = vld [vmem:[%s232_s0] sm:$0xff]  ;;  %v15_v5 = vld [vmem:[%s232_s0 + $0x8] sm:$0xff]  ;;  %v16_v6 = vld [vmem:[%s232_s0 + $0x10] sm:$0xff] }
   0x2   :  { %v18_v2 = vunpack.c.l.bf16 %v14_v1  ;;  %v19_v3 = vunpack.c.h.bf16 %v14_v1  ;;  %v29_v4 = vshrl.u32 %v28_v0, 7  ;;  %v17_v7 = vld [vmem:[%s232_s0 + $0x18] sm:$0xff]  ;;  %v26_v8 = vld [vmem:[%s233_s1] sm:$0xff]  ;;  %v20_v10 = vunpack.c.l.bf16 %v15_v5 }
   0x3   :  { %v76_v9 = vld [vmem:[%s234_s2] sm:$0xff]  ;;  %v21_v11 = vunpack.c.h.bf16 %v15_v5  ;;  %v22_v12 = vunpack.c.l.bf16 %v16_v6  ;;  %v23_v13 = vunpack.c.h.bf16 %v16_v6  ;;  %v24_v20 = vunpack.c.l.bf16 %v17_v7 }
   0x4   :  { %v30_v14 = vsub.s32 0, %v29_v4  ;;  %v34_v15 = vsub.s32 1, %v29_v4  ;;  %v38_v16 = vsub.s32 2, %v29_v4  ;;  %v42_v17 = vsub.s32 3, %v29_v4 }
   0x5   :  { %v46_v18 = vsub.s32 4, %v29_v4  ;;  %v50_v19 = vsub.s32 5, %v29_v4  ;;  %v25_v21 = vunpack.c.h.bf16 %v17_v7  ;;  %v54_v44 = vsub.s32 6, %v29_v4 }
   0x6   :  { %v31_v22 = vrot.slane %v26_v8, %v30_v14  ;;  %v35_v23 = vrot.slane %v26_v8, %v34_v15  ;;  %v81_v24 = vrot.slane %v76_v9, %v30_v14  ;;  %v85_v25 = vrot.slane %v76_v9, %v34_v15 }
   0x7   :  { %v39_v26 = vrot.slane %v26_v8, %v38_v16  ;;  %v43_v27 = vrot.slane %v26_v8, %v42_v17  ;;  %v89_v28 = vrot.slane %v76_v9, %v38_v16  ;;  %v93_v29 = vrot.slane %v76_v9, %v42_v17 }
   0x8   :  { %v68_v30 = vmul.f32 %v31_v22, %v18_v2  ;;  %v69_v31 = vmul.f32 %v35_v23, %v19_v3  ;;  %v47_v32 = vrot.slane %v26_v8, %v46_v18  ;;  %v51_v33 = vrot.slane %v26_v8, %v50_v19 }
   0x9   :  { %v70_v34 = vmul.f32 %v39_v26, %v20_v10  ;;  %v71_v35 = vmul.f32 %v43_v27, %v21_v11  ;;  %v97_v36 = vrot.slane %v76_v9, %v46_v18  ;;  %v101_v37 = vrot.slane %v76_v9, %v50_v19 }
   0xa   :  { %v118_v38 = vadd.f32 %v81_v24, %v68_v30  ;;  %v119_v39 = vadd.f32 %v85_v25, %v69_v31  ;;  %v72_v40 = vmul.f32 %v47_v32, %v22_v12  ;;  %v73_v41 = vmul.f32 %v51_v33, %v23_v13 }
   0xb   :  { %v120_v42 = vadd.f32 %v89_v28, %v70_v34  ;;  %v121_v43 = vadd.f32 %v93_v29, %v71_v35  ;;  %v58_v45 = vsub.s32 7, %v29_v4  ;;  %v55_v52 = vrot.slane %v26_v8, %v54_v44 }
   0xc   :  { %v126_v46 = vmax.f32 %v118_v38, 0.0  ;;  %v127_v47 = vmax.f32 %v119_v39, 0.0  ;;  %v122_v48 = vadd.f32 %v97_v36, %v72_v40  ;;  %v123_v49 = vadd.f32 %v101_v37, %v73_v41 }
   0xd   :  { %v128_v50 = vmax.f32 %v120_v42, 0.0  ;;  %v129_v51 = vmax.f32 %v121_v43, 0.0  ;;  %v59_v53 = vrot.slane %v26_v8, %v58_v45  ;;  %v105_v57 = vrot.slane %v76_v9, %v54_v44 }
   0xe   :  { %v178_v54 = vpack.c.bf16 %v127_v47, %v126_v46  ;;  %v130_v55 = vmax.f32 %v122_v48, 0.0  ;;  %v131_v56 = vmax.f32 %v123_v49, 0.0  ;;  %v74_v59 = vmul.f32 %v55_v52, %v24_v20 }
   0xf   :  { %v179_v58 = vpack.c.bf16 %v129_v51, %v128_v50  ;;  %v75_v60 = vmul.f32 %v59_v53, %v25_v21  ;;  %v109_v61 = vrot.slane %v76_v9, %v58_v45 }
  0x10   :  { %166 = vst [vmem:[%s235_s3] sm:$0xff] %v178_v54  ;;  %v180_v62 = vpack.c.bf16 %v131_v56, %v130_v55  ;;  %v124_v63 = vadd.f32 %v105_v57, %v74_v59 }
  0x11   :  { %167 = vst [vmem:[%s235_s3 + $0x8] sm:$0xff] %v179_v58  ;;  %v125_v0 = vadd.f32 %v109_v61, %v75_v60 }
  0x12   :  { %168 = vst [vmem:[%s235_s3 + $0x10] sm:$0xff] %v180_v62  ;;  %v132_v1 = vmax.f32 %v124_v63, 0.0 }
  0x13   :  { %v133_v2 = vmax.f32 %v125_v0, 0.0 }
  0x15   :  { %v181_v3 = vpack.c.bf16 %v133_v2, %v132_v1 }
  0x17   :  { %169 = vst [vmem:[%s235_s3 + $0x18] sm:$0xff] %v181_v3 }

// kernel: generator_forward.9
= control target key start
LH: loop header
LB: loop body
LE: loop exit
PB: predicated region body
PF: predicated region fallthrough
CT: control target
= control target key end

     0   :  { %9 = vsyncpa [#allocation4], 0  ;;  %s909_s12 = smov [#allocation3]   ;;  %s1030_s0 = inlined_call_operand.vmem [shape: bf16[1,8,128], index: 0, kind: input, shape index: {}]   ;;  %s1031_s1 = inlined_call_operand.hbm [shape: bf16[1,128,1024], index: 1, kind: input, shape index: {}]   ;;  %s1032_s2 = inlined_call_operand.vmem [shape: bf16[1,8,1024], index: 2, kind: output, shape index: {0}]   ;;  %s1033_s3 = inlined_call_operand.vmem [shape: f32[1,8,1024], index: 3, kind: output, shape index: {1}]  }
   0x1   :  { %s17_s13 = sshll.u32 %s909_s12, 4  ;;  %s885_s16 = scalar_lea.hbm %s1031_s1, 8192  ;;  %s18_s13 = int_to_ptr.vmem [resolvable:$true] %s17_s13 }
   0x2   :  { %p886_p0 = scmp.ne.s32.totalorder %s1031_s1, %s885_s16  ;;  %p889_p1 = scmp.lt.u32.totalorder %s885_s16, %s1031_s1 }
   0x4   :  { %p891_p2 = pnand %p889_p1, %p886_p0 }
   0x6   :  { %894 = shalt.err (!%p891_p2)
}
   0x7   :  { %s895_s21 = scalar_lea.vmem %s18_s13, 8192  ;;  %p900_p4 = scmp.lt.s32.totalorder %s18_s13, %s18_s13 }
   0x8   :  { %p896_p3 = scmp.ne.s32.totalorder %s18_s13, %s895_s21  ;;  %p901_p5 = scmp.lt.s32.totalorder %s895_s21, %s895_s21 }
   0xa   :  { %p902_p6 = por %p901_p5, %p900_p4 }
   0xc   :  { %p903_p7 = pnand %p902_p6, %p896_p3 }
   0xe   :  { %906 = shalt.err (!%p903_p7)
}
   0xf   :  { %s910_s22 = smov 512   ;;  %s911_s23 = smov 32  }
  0x10   :  { %23 = dma.hbm_to_vmem [thread:$0]  %s1031_s1, 8192, %s18_s13, [#allocation4], %s910_s22, %s910_s22, %s911_s23  }
  0x11   :  { %907 = dma.done.wait [#allocation4], 8192  }
  0x12   :  { %908 = vsyncadd [#allocation4], 4294959104  ;;  %v912_v0 = vmov 0   ;;  %v49_v1 = vld [vmem:[#allocation3] sm:$0xff]  ;;  %v50_v3 = vld [vmem:[#allocation3 + $0x8] sm:$0xff] }
  0x13   :  { %465 = vmatprep.mubr.bf16.mxu0 %v912_v0  ;;  %506 = vmatprep.mubr.bf16.mxu1 %v912_v0  ;;  %v53_v2 = vld [vmem:[#allocation3 + $0x20] sm:$0xff]  ;;  %v54_v5 = vld [vmem:[#allocation3 + $0x28] sm:$0xff]  ;;  %v51_v63 = vld [vmem:[#allocation3 + $0x10] sm:$0xff] }
  0x14   :  { %v810_v4 = vcombine.high %v49_v1, %v53_v2  ;;  %v809_v6 = vcombine.low %v49_v1, %v53_v2  ;;  %v57_v7 = vld [vmem:[#allocation3 + $0x40] sm:$0xff]  ;;  %v812_v9 = vcombine.high %v50_v3, %v54_v5  ;;  %v811_v10 = vcombine.low %v50_v3, %v54_v5  ;;  %v58_v12 = vld [vmem:[#allocation3 + $0x48] sm:$0xff]  ;;  %v55_v1 = vld [vmem:[#allocation3 + $0x30] sm:$0xff] }
  0x15   :  { %v61_v8 = vld [vmem:[#allocation3 + $0x60] sm:$0xff]  ;;  %v62_v13 = vld [vmem:[#allocation3 + $0x68] sm:$0xff]  ;;  %v52_v2 = vld [vmem:[#allocation3 + $0x18] sm:$0xff] }
  0x16   :  { %v818_v11 = vcombine.high %v57_v7, %v61_v8  ;;  %v65_v14 = vld [vmem:[#allocation3 + $0x80] sm:$0xff]  ;;  %433 = vmatprep.subr.bf16.mxu0 %v810_v4  ;;  %v820_v15 = vcombine.high %v58_v12, %v62_v13  ;;  %v66_v17 = vld [vmem:[#allocation3 + $0x88] sm:$0xff]  ;;  %474 = vmatprep.subr.bf16.mxu1 %v812_v9  ;;  %v817_v19 = vcombine.low %v57_v7, %v61_v8  ;;  %v56_v3 = vld [vmem:[#allocation3 + $0x38] sm:$0xff] }
  0x17   :  { %v69_v16 = vld [vmem:[#allocation3 + $0xa0] sm:$0xff]  ;;  %v70_v18 = vld [vmem:[#allocation3 + $0xa8] sm:$0xff]  ;;  %434 = vmatpush1.bf16.msra.mxu0 %v809_v6  ;;  %475 = vmatpush1.bf16.msra.mxu1 %v811_v10  ;;  %v819_v20 = vcombine.low %v58_v12, %v62_v13  ;;  %v814_v6 = vcombine.high %v51_v63, %v55_v1  ;;  %v816_v7 = vcombine.high %v52_v2, %v56_v3  ;;  %v59_v8 = vld [vmem:[#allocation3 + $0x50] sm:$0xff] }
  0x18   :  { %435 = vmatprep.subr.bf16.mxu0 %v818_v11  ;;  %v826_v21 = vcombine.high %v65_v14, %v69_v16  ;;  %476 = vmatprep.subr.bf16.mxu1 %v820_v15  ;;  %v828_v22 = vcombine.high %v66_v17, %v70_v18  ;;  %v73_v23 = vld [vmem:[#allocation3 + $0xc0] sm:$0xff]  ;;  %v74_v25 = vld [vmem:[#allocation3 + $0xc8] sm:$0xff]  ;;  %v825_v27 = vcombine.low %v65_v14, %v69_v16  ;;  %v63_v9 = vld [vmem:[#allocation3 + $0x70] sm:$0xff] }
  0x19   :  { %v77_v24 = vld [vmem:[#allocation3 + $0xe0] sm:$0xff]  ;;  %v78_v26 = vld [vmem:[#allocation3 + $0xe8] sm:$0xff]  ;;  %v827_v28 = vcombine.low %v66_v17, %v70_v18  ;;  %v60_v10 = vld [vmem:[#allocation3 + $0x58] sm:$0xff]  ;;  %v813_v13 = vcombine.low %v51_v63, %v55_v1  ;;  %v815_v14 = vcombine.low %v52_v2, %v56_v3  ;;  %v822_v15 = vcombine.high %v59_v8, %v63_v9 }
  0x1a   :  { %v834_v29 = vcombine.high %v73_v23, %v77_v24  ;;  %v836_v30 = vcombine.high %v74_v25, %v78_v26  ;;  %v81_v31 = vld [vmem:[#allocation3 + $0x100] sm:$0xff]  ;;  %v82_v33 = vld [vmem:[#allocation3 + $0x108] sm:$0xff]  ;;  %v833_v35 = vcombine.low %v73_v23, %v77_v24  ;;  %v835_v36 = vcombine.low %v74_v25, %v78_v26  ;;  %v64_v11 = vld [vmem:[#allocation3 + $0x78] sm:$0xff] }
  0x1b   :  { %436 = vmatpush1.bf16.msra.mxu0 %v817_v19  ;;  %477 = vmatpush1.bf16.msra.mxu1 %v819_v20  ;;  %v85_v32 = vld [vmem:[#allocation3 + $0x120] sm:$0xff]  ;;  %v86_v34 = vld [vmem:[#allocation3 + $0x128] sm:$0xff]  ;;  %v824_v16 = vcombine.high %v60_v10, %v64_v11  ;;  %v67_v17 = vld [vmem:[#allocation3 + $0x90] sm:$0xff]  ;;  %v764_v3 = vlaneseq }
  0x1c   :  { %437 = vmatprep.subr.bf16.mxu0 %v826_v21  ;;  %478 = vmatprep.subr.bf16.mxu1 %v828_v22  ;;  %v842_v37 = vcombine.high %v81_v31, %v85_v32  ;;  %v844_v38 = vcombine.high %v82_v33, %v86_v34  ;;  %v89_v39 = vld [vmem:[#allocation3 + $0x140] sm:$0xff]  ;;  %v90_v41 = vld [vmem:[#allocation3 + $0x148] sm:$0xff]  ;;  %v841_v43 = vcombine.low %v81_v31, %v85_v32  ;;  %v71_v18 = vld [vmem:[#allocation3 + $0xb0] sm:$0xff] }
  0x1d   :  { %v93_v40 = vld [vmem:[#allocation3 + $0x160] sm:$0xff]  ;;  %v94_v42 = vld [vmem:[#allocation3 + $0x168] sm:$0xff]  ;;  %v843_v44 = vcombine.low %v82_v33, %v86_v34  ;;  %v68_v19 = vld [vmem:[#allocation3 + $0x98] sm:$0xff]  ;;  %v821_v21 = vcombine.low %v59_v8, %v63_v9  ;;  %v823_v22 = vcombine.low %v60_v10, %v64_v11  ;;  %v830_v23 = vcombine.high %v67_v17, %v71_v18 }
  0x1e   :  { %v850_v45 = vcombine.high %v89_v39, %v93_v40  ;;  %v852_v46 = vcombine.high %v90_v41, %v94_v42  ;;  %v97_v47 = vld [vmem:[#allocation3 + $0x180] sm:$0xff]  ;;  %v98_v49 = vld [vmem:[#allocation3 + $0x188] sm:$0xff]  ;;  %v849_v51 = vcombine.low %v89_v39, %v93_v40  ;;  %v851_v52 = vcombine.low %v90_v41, %v94_v42  ;;  %v72_v20 = vld [vmem:[#allocation3 + $0xb8] sm:$0xff] }
  0x1f   :  { %438 = vmatpush1.bf16.msra.mxu0 %v825_v27  ;;  %479 = vmatpush1.bf16.msra.mxu1 %v827_v28  ;;  %v101_v48 = vld [vmem:[#allocation3 + $0x1a0] sm:$0xff]  ;;  %v102_v50 = vld [vmem:[#allocation3 + $0x1a8] sm:$0xff]  ;;  %v832_v24 = vcombine.high %v68_v19, %v72_v20  ;;  %v75_v25 = vld [vmem:[#allocation3 + $0xd0] sm:$0xff] }
  0x20   :  { %439 = vmatprep.subr.bf16.mxu0 %v834_v29  ;;  %480 = vmatprep.subr.bf16.mxu1 %v836_v30  ;;  %v858_v53 = vcombine.high %v97_v47, %v101_v48  ;;  %v860_v54 = vcombine.high %v98_v49, %v102_v50  ;;  %v105_v55 = vld [vmem:[#allocation3 + $0x1c0] sm:$0xff]  ;;  %v106_v57 = vld [vmem:[#allocation3 + $0x1c8] sm:$0xff]  ;;  %v857_v59 = vcombine.low %v97_v47, %v101_v48  ;;  %v79_v26 = vld [vmem:[#allocation3 + $0xf0] sm:$0xff] }
  0x21   :  { %v109_v56 = vld [vmem:[#allocation3 + $0x1e0] sm:$0xff]  ;;  %v110_v58 = vld [vmem:[#allocation3 + $0x1e8] sm:$0xff]  ;;  %v859_v60 = vcombine.low %v98_v49, %v102_v50  ;;  %v76_v27 = vld [vmem:[#allocation3 + $0xd8] sm:$0xff]  ;;  %v829_v29 = vcombine.low %v67_v17, %v71_v18  ;;  %v831_v30 = vcombine.low %v68_v19, %v72_v20  ;;  %v838_v31 = vcombine.high %v75_v25, %v79_v26 }
  0x22   :  { %v866_v61 = vcombine.high %v105_v55, %v109_v56  ;;  %v868_v62 = vcombine.high %v106_v57, %v110_v58  ;;  %v865_v4 = vcombine.low %v105_v55, %v109_v56  ;;  %v867_v5 = vcombine.low %v106_v57, %v110_v58  ;;  %v950_v12 = vld [vmem:[%s1030_s0] sm:$0xf]  ;;  %v80_v28 = vld [vmem:[#allocation3 + $0xf8] sm:$0xff]  ;;  %v83_v33 = vld [vmem:[#allocation3 + $0x110] sm:$0xff] }
  0x23   :  { %440 = vmatpush1.bf16.msra.mxu0 %v833_v35  ;;  %481 = vmatpush1.bf16.msra.mxu1 %v835_v36  ;;  %v840_v32 = vcombine.high %v76_v27, %v80_v28  ;;  %v87_v34 = vld [vmem:[#allocation3 + $0x130] sm:$0xff]  ;;  %v84_v35 = vld [vmem:[#allocation3 + $0x118] sm:$0xff] }
  0x24   :  { %441 = vmatprep.subr.bf16.mxu0 %v842_v37  ;;  %482 = vmatprep.subr.bf16.mxu1 %v844_v38  ;;  %v88_v36 = vld [vmem:[#allocation3 + $0x138] sm:$0xff]  ;;  %v837_v37 = vcombine.low %v75_v25, %v79_v26  ;;  %v839_v38 = vcombine.low %v76_v27, %v80_v28  ;;  %v846_v39 = vcombine.high %v83_v33, %v87_v34  ;;  %v91_v40 = vld [vmem:[#allocation3 + $0x150] sm:$0xff] }
  0x25   :  { %v95_v41 = vld [vmem:[#allocation3 + $0x170] sm:$0xff]  ;;  %v92_v42 = vld [vmem:[#allocation3 + $0x158] sm:$0xff] }
  0x26   :  { %v99_v48 = vld [vmem:[#allocation3 + $0x190] sm:$0xff]  ;;  %v100_v50 = vld [vmem:[#allocation3 + $0x198] sm:$0xff] }
  0x27   :  { %442 = vmatpush1.bf16.msra.mxu0 %v841_v43  ;;  %483 = vmatpush1.bf16.msra.mxu1 %v843_v44  ;;  %v96_v43 = vld [vmem:[#allocation3 + $0x178] sm:$0xff]  ;;  %v845_v44 = vcombine.low %v83_v33, %v87_v34  ;;  %v103_v49 = vld [vmem:[#allocation3 + $0x1b0] sm:$0xff] }
  0x28   :  { %443 = vmatprep.subr.bf16.mxu0 %v850_v45  ;;  %484 = vmatprep.subr.bf16.mxu1 %v852_v46  ;;  %v847_v45 = vcombine.low %v84_v35, %v88_v36  ;;  %v854_v46 = vcombine.high %v91_v40, %v95_v41  ;;  %v856_v47 = vcombine.high %v92_v42, %v96_v43  ;;  %v107_v56 = vld [vmem:[#allocation3 + $0x1d0] sm:$0xff]  ;;  %v108_v58 = vld [vmem:[#allocation3 + $0x1d8] sm:$0xff] }
  0x29   :  { %v111_v57 = vld [vmem:[#allocation3 + $0x1f0] sm:$0xff] }
  0x2a   :  { %v869_v1 = vcombine.low %v107_v56, %v111_v57 }
  0x2b   :  { %444 = vmatpush1.bf16.msra.mxu0 %v849_v51  ;;  %485 = vmatpush1.bf16.msra.mxu1 %v851_v52  ;;  %v104_v51 = vld [vmem:[#allocation3 + $0x1b8] sm:$0xff]  ;;  %v853_v52 = vcombine.low %v91_v40, %v95_v41 }
  0x2c   :  { %445 = vmatprep.subr.bf16.mxu0 %v858_v53  ;;  %486 = vmatprep.subr.bf16.mxu1 %v860_v54  ;;  %v855_v53 = vcombine.low %v92_v42, %v96_v43  ;;  %v862_v54 = vcombine.high %v99_v48, %v103_v49  ;;  %v864_v55 = vcombine.high %v100_v50, %v104_v51 }
  0x2f   :  { %446 = vmatpush1.bf16.msra.mxu0 %v857_v59  ;;  %487 = vmatpush1.bf16.msra.mxu1 %v859_v60  ;;  %v112_v59 = vld [vmem:[#allocation3 + $0x1f8] sm:$0xff]  ;;  %v861_v60 = vcombine.low %v99_v48, %v103_v49 }
  0x30   :  { %447 = vmatprep.subr.bf16.mxu0 %v866_v61  ;;  %488 = vmatprep.subr.bf16.mxu1 %v868_v62  ;;  %v863_v61 = vcombine.low %v100_v50, %v104_v51  ;;  %v870_v62 = vcombine.high %v107_v56, %v111_v57  ;;  %v872_v63 = vcombine.high %v108_v58, %v112_v59 }
  0x31   :  { %v871_v2 = vcombine.low %v108_v58, %v112_v59 }
  0x33   :  { %448 = vmatpush1.bf16.msra.mxu0 %v865_v4  ;;  %489 = vmatpush1.bf16.msra.mxu1 %v867_v5  ;;  %v958_v4 = vshrl.u32 %v764_v3, 7 }
  0x34   :  { %515 = vmatprep.subr.bf16.mxu0 %v814_v6  ;;  %556 = vmatprep.subr.bf16.mxu1 %v816_v7 }
  0x35   :  { %vm766_vm0 = vcmp.eq.s32.totalorder %v958_v4, 0  ;;  %vm775_vm1 = vcmp.eq.s32.totalorder %v958_v4, 1 }
  0x36   :  { %466 = vmatmul.mubr.bf16.vlgmr.msra.gmra.mrb[0].mxu0 %v950_v12  ;;  %507 = vmatmul.mubr.bf16.vlgmr.msra.gmra.mrb[0].mxu1 %v950_v12 }
  0x37   :  { %516 = vmatpush1.bf16.msra.mxu0 %v813_v13  ;;  %557 = vmatpush1.bf16.msra.mxu1 %v815_v14 }
  0x38   :  { %517 = vmatprep.subr.bf16.mxu0 %v822_v15  ;;  %558 = vmatprep.subr.bf16.mxu1 %v824_v16 }
  0x39   :  { %547 = vmatprep.mubr.bf16.mxu0 %v912_v0  ;;  %588 = vmatprep.mubr.bf16.mxu1 %v912_v0  ;;  %v848_v0 = vcombine.high %v84_v35, %v88_v36 }
  0x3b   :  { %518 = vmatpush1.bf16.msra.mxu0 %v821_v21  ;;  %559 = vmatpush1.bf16.msra.mxu1 %v823_v22 }
  0x3c   :  { %519 = vmatprep.subr.bf16.mxu0 %v830_v23  ;;  %560 = vmatprep.subr.bf16.mxu1 %v832_v24 }
  0x3f   :  { %520 = vmatpush1.bf16.msra.mxu0 %v829_v29  ;;  %561 = vmatpush1.bf16.msra.mxu1 %v831_v30 }
  0x40   :  { %521 = vmatprep.subr.bf16.mxu0 %v838_v31  ;;  %562 = vmatprep.subr.bf16.mxu1 %v840_v32 }
  0x43   :  { %522 = vmatpush1.bf16.msra.mxu0 %v837_v37  ;;  %563 = vmatpush1.bf16.msra.mxu1 %v839_v38 }
  0x44   :  { %523 = vmatprep.subr.bf16.mxu0 %v846_v39  ;;  %564 = vmatprep.subr.bf16.mxu1 %v848_v0 }
  0x47   :  { %524 = vmatpush1.bf16.msra.mxu0 %v845_v44  ;;  %565 = vmatpush1.bf16.msra.mxu1 %v847_v45 }
  0x48   :  { %525 = vmatprep.subr.bf16.mxu0 %v854_v46  ;;  %566 = vmatprep.subr.bf16.mxu1 %v856_v47 }
  0x4b   :  { %526 = vmatpush1.bf16.msra.mxu0 %v853_v52  ;;  %567 = vmatpush1.bf16.msra.mxu1 %v855_v53 }
  0x4c   :  { %527 = vmatprep.subr.bf16.mxu0 %v862_v54  ;;  %568 = vmatprep.subr.bf16.mxu1 %v864_v55 }
  0x4f   :  { %528 = vmatpush1.bf16.msra.mxu0 %v861_v60  ;;  %569 = vmatpush1.bf16.msra.mxu1 %v863_v61 }
  0x50   :  { %529 = vmatprep.subr.bf16.mxu0 %v870_v62  ;;  %570 = vmatprep.subr.bf16.mxu1 %v872_v63 }
  0x53   :  { %530 = vmatpush1.bf16.msra.mxu0 %v869_v1  ;;  %571 = vmatpush1.bf16.msra.mxu1 %v871_v2 }
  0x56   :  { %548 = vmatmul.mubr.bf16.vlgmr.msra.gmra.mrb[4].mxu0 %v950_v12  ;;  %589 = vmatmul.mubr.bf16.vlgmr.msra.gmra.mrb[4].mxu1 %v950_v12 }
 0x109   :  { %v467_v5 = vpop.f32.mrb[0].mxu0  ;;  %v508_v8 = vpop.f32.mrb[0].mxu1 }
 0x10a   :  { %v660_v6 = vrot.slane %v467_v5, 4  ;;  %v708_v7 = vmul.f32 %v467_v5, %v467_v5  ;;  %v469_v9 = vpop.f32.mrb[1].mxu0  ;;  %v672_v10 = vrot.slane %v508_v8, 4  ;;  %v710_v11 = vmul.f32 %v508_v8, %v508_v8  ;;  %v510_v15 = vpop.f32.mrb[1].mxu1 }
 0x10b   :  { %v877_v13 = vpack.c.bf16 %v469_v9, %v467_v5  ;;  %v666_v14 = vrot.slane %v469_v9, 4  ;;  %v471_v16 = vpop.f32.mrb[2].mxu0  ;;  %v709_v19 = vmul.f32 %v469_v9, %v469_v9  ;;  %v878_v12 = vpack.c.bf16 %v510_v15, %v508_v8  ;;  %v512_v20 = vpop.f32.mrb[2].mxu1 }
 0x10c   :  { %v661_v17 = vadd.f32 %v660_v6, %v467_v5  ;;  %v716_v18 = vrot.slane %v708_v7, 4  ;;  %v472_v21 = vpop.f32.mrb[3].mxu0  ;;  %v673_v22 = vadd.f32 %v672_v10, %v508_v8  ;;  %v728_v23 = vrot.slane %v710_v11, 4  ;;  %v513_v26 = vpop.f32.mrb[3].mxu1 }
 0x10d   :  { %656 = vst [vmem:[%s1032_s2] sm:$0xff] %v877_v13  ;;  %v667_v24 = vadd.f32 %v666_v14, %v469_v9  ;;  %v678_v25 = vrot.slane %v510_v15, 4  ;;  %v722_v29 = vrot.slane %v709_v19, 4  ;;  %657 = vst [vmem:[%s1032_s2 + $0x8] sm:$0xff] %v878_v12  ;;  %v711_v30 = vmul.f32 %v510_v15, %v510_v15 }
 0x10e   :  { %v662_v27 = vrot.slane %v661_v17, 2  ;;  %v717_v28 = vadd.f32 %v716_v18, %v708_v7  ;;  %v674_v31 = vrot.slane %v673_v22, 2  ;;  %v729_v32 = vadd.f32 %v728_v23, %v710_v11 }
 0x10f   :  { %v668_v33 = vrot.slane %v667_v24, 2  ;;  %v679_v34 = vadd.f32 %v678_v25, %v510_v15  ;;  %v723_v37 = vadd.f32 %v722_v29, %v709_v19  ;;  %v734_v38 = vrot.slane %v711_v30, 4 }
 0x110   :  { %v663_v35 = vadd.f32 %v662_v27, %v661_v17  ;;  %v718_v36 = vrot.slane %v717_v28, 2  ;;  %v675_v39 = vadd.f32 %v674_v31, %v673_v22  ;;  %v730_v0 = vrot.slane %v729_v32, 2 }
 0x111   :  { %v669_v40 = vadd.f32 %v668_v33, %v667_v24  ;;  %v680_v41 = vrot.slane %v679_v34, 2  ;;  %v724_v44 = vrot.slane %v723_v37, 2  ;;  %v735_v45 = vadd.f32 %v734_v38, %v711_v30 }
 0x112   :  { %v664_v42 = vrot.slane %v663_v35, 1  ;;  %v719_v43 = vadd.f32 %v718_v36, %v717_v28  ;;  %v676_v46 = vrot.slane %v675_v39, 1  ;;  %v731_v47 = vadd.f32 %v730_v0, %v729_v32 }
 0x113   :  { %v670_v48 = vrot.slane %v669_v40, 1  ;;  %v681_v49 = vadd.f32 %v680_v41, %v679_v34  ;;  %v725_v52 = vadd.f32 %v724_v44, %v723_v37  ;;  %v736_v53 = vrot.slane %v735_v45, 2 }
 0x114   :  { %v665_v50 = vadd.f32 %v664_v42, %v663_v35  ;;  %v720_v51 = vrot.slane %v719_v43, 1  ;;  %v677_v54 = vadd.f32 %v676_v46, %v675_v39  ;;  %v732_v55 = vrot.slane %v731_v47, 1 }
 0x115   :  { %v682_v56 = vrot.slane %v681_v49, 1  ;;  %v671_v58 = vadd.f32 %v670_v48, %v669_v40  ;;  %v726_v59 = vrot.slane %v725_v52, 1  ;;  %v737_v60 = vadd.f32 %v736_v53, %v735_v45 }
 0x116   :  { %v721_v57 = vadd.f32 %v720_v51, %v719_v43  ;;  %v767_v61 = vsel %vm766_vm0, %v665_v50, 0.0  ;;  %v733_v62 = vadd.f32 %v732_v55, %v731_v47  ;;  %v769_v6 = vsel %vm766_vm0, %v677_v54, 0.0 }
 0x117   :  { %v727_v1 = vadd.f32 %v726_v59, %v725_v52  ;;  %v683_v2 = vadd.f32 %v682_v56, %v681_v49  ;;  %v738_v3 = vrot.slane %v737_v60, 1  ;;  %v768_v9 = vsel %vm766_vm0, %v671_v58, 0.0 }
 0x118   :  { %v776_v63 = vsel %vm775_vm1, %v721_v57, 0.0  ;;  %v778_v7 = vsel %vm775_vm1, %v733_v62, 0.0 }
 0x119   :  { %v784_v5 = vadd.f32 %v776_v63, %v767_v61  ;;  %v786_v8 = vadd.f32 %v778_v7, %v769_v6  ;;  %v777_v10 = vsel %vm775_vm1, %v727_v1, 0.0  ;;  %v739_v11 = vadd.f32 %v738_v3, %v737_v60 }
 0x11a   :  { %v785_v13 = vadd.f32 %v777_v10, %v768_v9  ;;  %v770_v14 = vsel %vm766_vm0, %v683_v2, 0.0 }
 0x11b   :  { %792 = vst [vmem:[%s1033_s3] sm:$0xff] %v784_v5  ;;  %794 = vst [vmem:[%s1033_s3 + $0x10] sm:$0xff] %v786_v8  ;;  %v779_v15 = vsel %vm775_vm1, %v739_v11, 0.0 }
 0x11c   :  { %793 = vst [vmem:[%s1033_s3 + $0x8] sm:$0xff] %v785_v13  ;;  %v787_v16 = vadd.f32 %v779_v15, %v770_v14 }
 0x11e   :  { %795 = vst [vmem:[%s1033_s3 + $0x18] sm:$0xff] %v787_v16 }
 0x129   :  { %v549_v17 = vpop.f32.mrb[4].mxu0  ;;  %v590_v12 = vpop.f32.mrb[4].mxu1 }
 0x12a   :  { %v684_v18 = vrot.slane %v549_v17, 4  ;;  %v712_v19 = vmul.f32 %v549_v17, %v549_v17  ;;  %v551_v20 = vpop.f32.mrb[5].mxu0  ;;  %v696_v21 = vrot.slane %v590_v12, 4  ;;  %v714_v22 = vmul.f32 %v590_v12, %v590_v12  ;;  %v592_v25 = vpop.f32.mrb[5].mxu1 }
 0x12b   :  { %v879_v23 = vpack.c.bf16 %v551_v20, %v549_v17  ;;  %v690_v24 = vrot.slane %v551_v20, 4  ;;  %v553_v26 = vpop.f32.mrb[6].mxu0  ;;  %v713_v29 = vmul.f32 %v551_v20, %v551_v20  ;;  %v880_v30 = vpack.c.bf16 %v592_v25, %v590_v12  ;;  %v594_v31 = vpop.f32.mrb[6].mxu1 }
 0x12c   :  { %v685_v27 = vadd.f32 %v684_v18, %v549_v17  ;;  %v740_v28 = vrot.slane %v712_v19, 4  ;;  %v554_v32 = vpop.f32.mrb[7].mxu0  ;;  %v697_v33 = vadd.f32 %v696_v21, %v590_v12  ;;  %v752_v34 = vrot.slane %v714_v22, 4  ;;  %v595_v37 = vpop.f32.mrb[7].mxu1 }
 0x12d   :  { %658 = vst [vmem:[%s1032_s2 + $0x10] sm:$0xff] %v879_v23  ;;  %v691_v35 = vadd.f32 %v690_v24, %v551_v20  ;;  %v702_v36 = vrot.slane %v592_v25, 4  ;;  %v746_v0 = vrot.slane %v713_v29, 4  ;;  %659 = vst [vmem:[%s1032_s2 + $0x18] sm:$0xff] %v880_v30  ;;  %v715_v40 = vmul.f32 %v592_v25, %v592_v25 }
 0x12e   :  { %v686_v38 = vrot.slane %v685_v27, 2  ;;  %v741_v39 = vadd.f32 %v740_v28, %v712_v19  ;;  %v698_v41 = vrot.slane %v697_v33, 2  ;;  %v753_v42 = vadd.f32 %v752_v34, %v714_v22 }
 0x12f   :  { %v692_v43 = vrot.slane %v691_v35, 2  ;;  %v703_v44 = vadd.f32 %v702_v36, %v592_v25  ;;  %v747_v47 = vadd.f32 %v746_v0, %v713_v29  ;;  %v758_v48 = vrot.slane %v715_v40, 4 }
 0x130   :  { %v687_v45 = vadd.f32 %v686_v38, %v685_v27  ;;  %v742_v46 = vrot.slane %v741_v39, 2  ;;  %v699_v49 = vadd.f32 %v698_v41, %v697_v33  ;;  %v754_v50 = vrot.slane %v753_v42, 2 }
 0x131   :  { %v693_v51 = vadd.f32 %v692_v43, %v691_v35  ;;  %v704_v52 = vrot.slane %v703_v44, 2  ;;  %v748_v55 = vrot.slane %v747_v47, 2  ;;  %v759_v56 = vadd.f32 %v758_v48, %v715_v40 }
 0x132   :  { %v688_v53 = vrot.slane %v687_v45, 1  ;;  %v743_v54 = vadd.f32 %v742_v46, %v741_v39  ;;  %v700_v57 = vrot.slane %v699_v49, 1  ;;  %v755_v58 = vadd.f32 %v754_v50, %v753_v42 }
 0x133   :  { %v694_v59 = vrot.slane %v693_v51, 1  ;;  %v705_v60 = vadd.f32 %v704_v52, %v703_v44  ;;  %v749_v63 = vadd.f32 %v748_v55, %v747_v47  ;;  %v760_v1 = vrot.slane %v759_v56, 2 }
 0x134   :  { %v689_v61 = vadd.f32 %v688_v53, %v687_v45  ;;  %v744_v62 = vrot.slane %v743_v54, 1  ;;  %v701_v2 = vadd.f32 %v700_v57, %v699_v49  ;;  %v756_v3 = vrot.slane %v755_v58, 1 }
 0x135   :  { %v706_v5 = vrot.slane %v705_v60, 1  ;;  %v695_v7 = vadd.f32 %v694_v59, %v693_v51  ;;  %v750_v8 = vrot.slane %v749_v63, 1  ;;  %v761_v9 = vadd.f32 %v760_v1, %v759_v56 }
 0x136   :  { %v745_v6 = vadd.f32 %v744_v62, %v743_v54  ;;  %v771_v10 = vsel %vm766_vm0, %v689_v61, 0.0  ;;  %v757_v11 = vadd.f32 %v756_v3, %v755_v58  ;;  %v773_v18 = vsel %vm766_vm0, %v701_v2, 0.0 }
 0x137   :  { %v751_v14 = vadd.f32 %v750_v8, %v749_v63  ;;  %v707_v15 = vadd.f32 %v706_v5, %v705_v60  ;;  %v762_v16 = vrot.slane %v761_v9, 1  ;;  %v772_v20 = vsel %vm766_vm0, %v695_v7, 0.0 }
 0x138   :  { %v780_v13 = vsel %vm775_vm1, %v745_v6, 0.0  ;;  %v782_v19 = vsel %vm775_vm1, %v757_v11, 0.0 }
 0x139   :  { %v788_v17 = vadd.f32 %v780_v13, %v771_v10  ;;  %v790_v12 = vadd.f32 %v782_v19, %v773_v18  ;;  %v781_v21 = vsel %vm775_vm1, %v751_v14, 0.0  ;;  %v763_v22 = vadd.f32 %v762_v16, %v761_v9 }
 0x13a   :  { %v789_v23 = vadd.f32 %v781_v21, %v772_v20  ;;  %v774_v24 = vsel %vm766_vm0, %v707_v15, 0.0 }
 0x13b   :  { %796 = vst [vmem:[%s1033_s3 + $0x20] sm:$0xff] %v788_v17  ;;  %798 = vst [vmem:[%s1033_s3 + $0x30] sm:$0xff] %v790_v12  ;;  %v783_v25 = vsel %vm775_vm1, %v763_v22, 0.0 }
 0x13c   :  { %797 = vst [vmem:[%s1033_s3 + $0x28] sm:$0xff] %v789_v23  ;;  %v791_v26 = vadd.f32 %v783_v25, %v774_v24 }
 0x13e   :  { %799 = vst [vmem:[%s1033_s3 + $0x38] sm:$0xff] %v791_v26 }
 0x13f   :  { %808 = vsyncpa [#allocation4], 1 }

// kernel: tile.53
= control target key start
LH: loop header
LB: loop body
LE: loop exit
PB: predicated region body
PF: predicated region fallthrough
CT: control target
= control target key end

     0   :  { %s22_s0 = inlined_call_operand.vmem [shape: f32[32], index: 0, kind: input, shape index: {}]   ;;  %s23_s1 = inlined_call_operand.vmem [shape: f32[4,32], index: 1, kind: output, shape index: {}]  }
   0x1   :  { %v4_v0 = vld [vmem:[%s22_s0] ss:$0 sm:$0xff] }
   0x2   :  { %5 = vst [vmem:[%s23_s1] sm:$0xf] %v4_v0 }

// kernel: tile.54
= control target key start
LH: loop header
LB: loop body
LE: loop exit
PB: predicated region body
PF: predicated region fallthrough
CT: control target
= control target key end

     0   :  { %vm7_vm0 = vcmask 261120   ;;  %s37_s8 = smov 32   ;;  %s38_s9 = smov 64   ;;  %vm13_vm1 = vcmask 1048320   ;;  %vm19_vm2 = vcmask 785920   ;;  %vm25_vm3 = vcmask 523520   ;;  %s55_s0 = inlined_call_operand.vmem [shape: f32[4,32], index: 0, kind: input, shape index: {}]   ;;  %s56_s1 = inlined_call_operand.vmem [shape: f32[1,128], index: 1, kind: output, shape index: {}]  }
   0x1   :  { %v4_v0 = vld [vmem:[%s55_s0] sm:$0xf]  ;;  %s36_s0 = smov 96  }
   0x2   :  { %5 = vst [vmem:[#allocation1] sm:$0xf] %v4_v0 }
   0x9   :  { %v10_v1 = vld [vmem:[#allocation1 + $0x3] sm:$0x1]   ;;  %v22_v2 = vld [vmem:[#allocation1 + $0x1] sm:$0x1]   ;;  %v6_v3 = vld [vmem:[#allocation1] sm:$0x1]  }
   0xa   :  { %11 = vrot.lane.b32.xlu0 %v10_v1, %s36_s0  ;;  %23 = vrot.lane.b32.xlu1 %v22_v2, %s37_s8  ;;  %v16_v4 = vld [vmem:[#allocation1 + $0x2] sm:$0x1]   ;;  %8 = vst.msk [vmem:[#allocation0] sm:$0x1] %vm7_vm0, %v6_v3  }
   0xe   :  { %17 = vrot.lane.b32.xlu0 %v16_v4, %s38_s9 }
  0x7c   :  { %v12_v5 = vpop.permute.xlu0 %11   ;;  %v24_v6 = vpop.permute.xlu1 %23  }
  0x7d   :  { %14 = vst.msk [vmem:[#allocation0] sm:$0x1] %vm13_vm1, %v12_v5  }
  0x80   :  { %v18_v7 = vpop.permute.xlu0 %17  }
  0x81   :  { %20 = vst.msk [vmem:[#allocation0] sm:$0x1] %vm19_vm2, %v18_v7  }
  0x82   :  { %26 = vst.msk [vmem:[#allocation0] sm:$0x1] %vm25_vm3, %v24_v6  }
  0x89   :  { %v30_v8 = vld [vmem:[#allocation0] sm:$0x1] }
  0x8a   :  { %32 = vst [vmem:[%s56_s1] sm:$0x1] %v30_v8 }

// kernel: generator_forward.11
= control target key start
LH: loop header
LB: loop body
LE: loop exit
PB: predicated region body
PF: predicated region fallthrough
CT: control target
= control target key end

     0   :  { %s917_s12 = smov 0   ;;  %s919_s13 = smov 0   ;;  %s1001_s0 = inlined_call_operand.vmem [shape: bf16[4,32,256], index: 0, kind: input, shape index: {}]   ;;  %s1002_s1 = inlined_call_operand.vmem [shape: bf16[4,256,32], index: 1, kind: input, shape index: {}]   ;;  %s1003_s2 = inlined_call_operand.vmem [shape: bf16[4,32,32], index: 2, kind: output, shape index: {0}]   ;;  %s1004_s3 = inlined_call_operand.vmem [shape: f32[4,8,32], index: 3, kind: output, shape index: {1}]  }
   0x1   :  { %s921_s14 = smov 0  }
   0x2 LB: > { %s33_s15 = sadd.s32 1, %s890_s13  ;;  %p740_p0 = scmp.ge.s32.totalorder %s894_s14, 1  ;;  %s894_s14 = sphi %s921_s14, %s14_s14   ;;  %s890_s13 = sphi %s919_s13, %s1006_s13   ;;  %s886_s12 = sphi %s917_s12, %s1005_s12  }
   0x3   : > { %p35_p1 = scmp.ge.s32.totalorder %s33_s15, 4  ;;  %p195_p2 = scmp.lt.s32.totalorder %s894_s14, 5 }
   0x5   : > { %s1008_s15 = smov (%p35_p1, %s33_s15), 0  ;;  %p196_p3 = pnand %p740_p0, %p195_p2 }
   0x6   : > { %p250_p4 = scmp.lt.s32.totalorder (!%p196_p3), %s886_s12, 3  ;;  %vm296_vm0 = vcmask (!%p196_p3), 261120   ;;  %v896_v20 = vmov (!%p196_p3), 0.0   ;;  %vm538_vm1 = vcmask (!%p196_p3), 257024  }
   0x7   : > { %199 = sbr.rel (%p196_p3) target bundleno = 302 (0x12e), region = 28  ;;  %297 = vst.msk [vmem:[#allocation2] sm:$0xff] (!%p196_p3), %vm296_vm0, %v896_v20  ;;  %298 = vst.msk [vmem:[#allocation2 + $0x8] sm:$0xff] (!%p196_p3), %vm296_vm0, %v896_v20 }
   0x8   : > { %299 = vst.msk [vmem:[#allocation2 + $0x10] sm:$0xff] (!%p196_p3), %vm296_vm0, %v896_v20  ;;  %300 = vst.msk [vmem:[#allocation2 + $0x18] sm:$0xff] (!%p196_p3), %vm296_vm0, %v896_v20 }
   0xe   : > { %s1010_s12 = smov (!%p250_p4, %s886_s12), 3  ;;  %v301_v23 = vld [vmem:[#allocation2] sm:$0xff]  ;;  %v302_v31 = vld [vmem:[#allocation2 + $0x8] sm:$0xff] }
   0xf   : > { %s775_s16 = sshll.u32 %s1010_s12, 7  ;;  %s774_s20 = sshll.u32 %s1010_s12, 5  ;;  %v303_v25 = vld [vmem:[#allocation2 + $0x10] sm:$0xff]  ;;  %v304_v33 = vld [vmem:[#allocation2 + $0x18] sm:$0xff] }
  0x10   : > { %s941_s19 = scalar_lea.vmem %s1002_s1, %s775_s16  ;;  %s261_s23 = scalar_lea.vmem %s1001_s0, %s774_s20 }
  0x11   : > { %v850_v0 = vld [vmem:[%s941_s19 + $0x40] sm:$0xff]   ;;  %v852_v2 = vld [vmem:[%s941_s19 + $0x48] sm:$0xff]   ;;  %v854_v4 = vld [vmem:[%s941_s19 + $0x50] sm:$0xff]   ;;  %s776_s24 = sshll.u32 %s1010_s12, 4  ;;  %s747_s28 = sshll.u32 %s1010_s12, 3 }
  0x12   : > { %v851_v1 = vld [vmem:[%s941_s19] sm:$0xff]   ;;  %781 = vmatprep.subr.bf16.mxu0 %v850_v0  ;;  %809 = vmatprep.subr.bf16.mxu1 %v850_v0  ;;  %v853_v3 = vld [vmem:[%s941_s19 + $0x8] sm:$0xff]   ;;  %v855_v5 = vld [vmem:[%s941_s19 + $0x10] sm:$0xff]   ;;  %s282_s27 = scalar_lea.vmem %s1003_s2, %s776_s24  ;;  %s290_s4 = scalar_lea.vmem %s1004_s3, %s747_s28 }
  0x13   : > { %782 = vmatpush3.bf16.msra.mxu0 %v851_v1  ;;  %817 = vmatpush3.bf16.msra.mxu1 %v851_v1  ;;  %v856_v6 = vld [vmem:[%s941_s19 + $0x58] sm:$0xff]   ;;  %v858_v8 = vld [vmem:[%s941_s19 + $0x60] sm:$0xff]   ;;  %v860_v10 = vld [vmem:[%s941_s19 + $0x68] sm:$0xff]  }
  0x14   : > { %783 = vmatprep.subr.bf16.mxu0 %v852_v2  ;;  %810 = vmatprep.subr.bf16.mxu1 %v852_v2  ;;  %v857_v7 = vld [vmem:[%s941_s19 + $0x18] sm:$0xff]   ;;  %v859_v9 = vld [vmem:[%s941_s19 + $0x20] sm:$0xff]   ;;  %v861_v13 = vld [vmem:[%s941_s19 + $0x28] sm:$0xff]  }
  0x15   : > { %v868_v11 = vld [vmem:[%s261_s23 + $0x4] ss:$8 sps:$4 sm:$0xff]   ;;  %v871_v12 = vld [vmem:[%s261_s23 + $0x14] ss:$8 sps:$4 sm:$0xff]   ;;  %v866_v18 = vld [vmem:[%s261_s23] ss:$8 sps:$4 sm:$0xff]  }
  0x16   : > { %v862_v14 = vld [vmem:[%s941_s19 + $0x70] sm:$0xff]   ;;  %489 = vmatprep.mubr.bf16.mxu0 %v868_v11  ;;  %497 = vmatprep.mubr.bf16.mxu1 %v871_v12  ;;  %v864_v16 = vld [vmem:[%s941_s19 + $0x78] sm:$0xff]  }
  0x17   : > { %784 = vmatpush3.bf16.msra.mxu0 %v853_v3  ;;  %818 = vmatpush3.bf16.msra.mxu1 %v853_v3  ;;  %v863_v15 = vld [vmem:[%s941_s19 + $0x30] sm:$0xff]   ;;  %v865_v17 = vld [vmem:[%s941_s19 + $0x38] sm:$0xff]  }
  0x18   : > { %785 = vmatprep.subr.bf16.mxu0 %v854_v4  ;;  %811 = vmatprep.subr.bf16.mxu1 %v854_v4  ;;  %v869_v19 = vld [vmem:[%s261_s23 + $0x10] ss:$8 sps:$4 sm:$0xff]  }
  0x1b   : > { %786 = vmatpush3.bf16.msra.mxu0 %v855_v5  ;;  %819 = vmatpush3.bf16.msra.mxu1 %v855_v5 }
  0x1c   : > { %787 = vmatprep.subr.bf16.mxu0 %v856_v6  ;;  %812 = vmatprep.subr.bf16.mxu1 %v856_v6  ;;  %v573_v6 = vlaneseq }
  0x1e   : > { %v574_v11 = vshrl.u32 %v573_v6, 7 }
  0x1f   : > { %788 = vmatpush3.bf16.msra.mxu0 %v857_v7  ;;  %820 = vmatpush3.bf16.msra.mxu1 %v857_v7 }
  0x20   : > { %789 = vmatprep.subr.bf16.mxu0 %v858_v8  ;;  %813 = vmatprep.subr.bf16.mxu1 %v858_v8  ;;  %vm575_vm2 = vcmp.eq.s32.totalorder %v574_v11, 0  ;;  %vm577_vm3 = vcmp.eq.s32.totalorder %v574_v11, 1 }
  0x23   : > { %790 = vmatpush3.bf16.msra.mxu0 %v859_v9  ;;  %821 = vmatpush3.bf16.msra.mxu1 %v859_v9 }
  0x24   : > { %791 = vmatprep.subr.bf16.mxu0 %v860_v10  ;;  %814 = vmatprep.subr.bf16.mxu1 %v860_v10 }
  0x27   : > { %792 = vmatpush3.bf16.msra.mxu0 %v861_v13  ;;  %822 = vmatpush3.bf16.msra.mxu1 %v861_v13 }
  0x28   : > { %793 = vmatprep.subr.bf16.mxu0 %v862_v14  ;;  %815 = vmatprep.subr.bf16.mxu1 %v862_v14 }
  0x2b   : > { %794 = vmatpush3.bf16.msra.mxu0 %v863_v15  ;;  %823 = vmatpush3.bf16.msra.mxu1 %v863_v15 }
  0x2c   : > { %795 = vmatprep.subr.bf16.mxu0 %v864_v16  ;;  %816 = vmatprep.subr.bf16.mxu1 %v864_v16 }
  0x2f   : > { %796 = vmatpush3.bf16.msra.mxu0 %v865_v17  ;;  %824 = vmatpush3.bf16.msra.mxu1 %v865_v17 }
  0x32   : > { %490 = vmatmul.mubr.bf16.vlgmr.msra.gmra.mrb[0].mxu0 %v866_v18  ;;  %498 = vmatmul.mubr.bf16.vlgmr.msra.gmra.mrb[0].mxu1 %v869_v19 }
 0x105   : > { %v797_v21 = vpop.f32.mrb[0].mxu0  ;;  %v803_v22 = vpop.f32.mrb[0].mxu1 }
 0x106   : > { %v798_v24 = vpop.f32.mrb[1].mxu0  ;;  %v804_v26 = vpop.f32.mrb[1].mxu1 }
 0x107   : > { %v799_v27 = vadd.f32 %v798_v24, %v797_v21  ;;  %v800_v28 = vpop.f32.mrb[2].mxu0  ;;  %v805_v29 = vadd.f32 %v804_v26, %v803_v22  ;;  %v806_v30 = vpop.f32.mrb[2].mxu1 }
 0x108   : > { %v801_v32 = vpop.f32.mrb[3].mxu0  ;;  %v807_v34 = vpop.f32.mrb[3].mxu1 }
 0x109   : > { %v506_v35 = vadd.f32 %v799_v27, %v301_v23  ;;  %v508_v36 = vadd.f32 %v805_v29, %v303_v25  ;;  %v802_v37 = vadd.f32 %v801_v32, %v800_v28  ;;  %v808_v38 = vadd.f32 %v807_v34, %v806_v30 }
 0x10b   : > { %511 = vst.msk [vmem:[#allocation2] sm:$0xff] %vm296_vm0, %v506_v35  ;;  %513 = vst.msk [vmem:[#allocation2 + $0x10] sm:$0xff] %vm296_vm0, %v508_v36  ;;  %v507_v39 = vadd.f32 %v802_v37, %v302_v31  ;;  %v509_v40 = vadd.f32 %v808_v38, %v304_v33 }
 0x10d   : > { %512 = vst.msk [vmem:[#allocation2 + $0x8] sm:$0xff] %vm296_vm0, %v507_v39  ;;  %514 = vst.msk [vmem:[#allocation2 + $0x18] sm:$0xff] %vm296_vm0, %v509_v40 }
 0x112   : > { %v518_v41 = vld [vmem:[#allocation2] sm:$0xff]  ;;  %v520_v42 = vld [vmem:[#allocation2 + $0x10] sm:$0xff] }
 0x113   : > { %v777_v43 = vpack.c.bf16 %v518_v41, %v518_v41  ;;  %v556_v44 = vmul.f32 %v518_v41, %v518_v41  ;;  %v779_v45 = vpack.c.bf16 %v520_v42, %v520_v42  ;;  %v543_v46 = vsel %vm296_vm0, %v518_v41, 0.0 }
 0x114   : > { %v558_v47 = vmul.f32 %v520_v42, %v520_v42  ;;  %v519_v48 = vld [vmem:[#allocation2 + $0x8] sm:$0xff]  ;;  %v521_v49 = vld [vmem:[#allocation2 + $0x18] sm:$0xff]  ;;  %v546_v50 = vsel %vm296_vm0, %v520_v42, 0.0 }
 0x115   : > { %539 = vst.msk [vmem:[%s282_s27] sm:$0xf] %vm538_vm1, %v777_v43  ;;  %541 = vst.msk [vmem:[%s282_s27 + $0x8] sm:$0xf] %vm538_vm1, %v779_v45  ;;  %v778_v51 = vpack.c.bf16 %v519_v48, %v519_v48  ;;  %v544_v52 = vsel %vm296_vm0, %v519_v48, 0.0  ;;  %v557_v53 = vmul.f32 %v519_v48, %v519_v48  ;;  %v780_v55 = vpack.c.bf16 %v521_v49, %v521_v49 }
 0x116   : > { %v545_v54 = vadd.f32 %v544_v52, %v543_v46  ;;  %v560_v56 = vsel %vm296_vm0, %v556_v44, 0.0  ;;  %v563_v57 = vsel %vm296_vm0, %v558_v47, 0.0  ;;  %v559_v59 = vmul.f32 %v521_v49, %v521_v49 }
 0x117   : > { %540 = vst.msk [vmem:[%s282_s27 + $0x4] sm:$0xf] %vm538_vm1, %v778_v51  ;;  %v561_v58 = vsel %vm296_vm0, %v557_v53, 0.0  ;;  %542 = vst.msk [vmem:[%s282_s27 + $0xc] sm:$0xf] %vm538_vm1, %v780_v55  ;;  %v548_v62 = vsel %vm296_vm0, %v521_v49, 0.0 }
 0x118   : > { %v562_v60 = vadd.f32 %v561_v58, %v560_v56  ;;  %v547_v61 = vadd.f32 %v546_v50, %v545_v54  ;;  %v565_v1 = vsel %vm296_vm0, %v559_v59, 0.0 }
 0x11a   : > { %v549_v63 = vadd.f32 %v548_v62, %v547_v61  ;;  %v564_v0 = vadd.f32 %v563_v57, %v562_v60 }
 0x11c   : > { %v550_v2 = vrot.slane %v549_v63, 4  ;;  %v566_v3 = vadd.f32 %v565_v1, %v564_v0 }
 0x11e   : > { %v551_v4 = vadd.f32 %v550_v2, %v549_v63  ;;  %v567_v5 = vrot.slane %v566_v3, 4 }
 0x120   : > { %v552_v7 = vrot.slane %v551_v4, 2  ;;  %v568_v8 = vadd.f32 %v567_v5, %v566_v3 }
 0x122   : > { %v553_v9 = vadd.f32 %v552_v7, %v551_v4  ;;  %v569_v10 = vrot.slane %v568_v8, 2 }
 0x124   : > { %v554_v12 = vrot.slane %v553_v9, 1  ;;  %v570_v13 = vadd.f32 %v569_v10, %v568_v8 }
 0x126   : > { %v555_v14 = vadd.f32 %v554_v12, %v553_v9  ;;  %v571_v15 = vrot.slane %v570_v13, 1 }
 0x128   : > { %v572_v16 = vadd.f32 %v571_v15, %v570_v13  ;;  %v576_v17 = vsel %vm575_vm2, %v555_v14, 0.0 }
 0x12a   : > { %v578_v18 = vsel %vm577_vm3, %v572_v16, 0.0 }
 0x12b   : > { %v579_v19 = vadd.f32 %v578_v18, %v576_v17 }
 0x12d   : > { %580 = vst.msk [vmem:[%s290_s4] sm:$0xff] %vm296_vm0, %v579_v19 }
 0x12e PF: > { %s14_s14 = sadd.s32 1, %s894_s14   ;;  %s1005_s12 = smov %s890_s13 }
 0x12f   : > { %p11_p5 = scmp.ge.s32.totalorder %s14_s14, 6   ;;  %s1006_s13 = smov %s1008_s15 }
 0x131   :  { %13 = sbr.rel (!%p11_p5) target bundleno = 2 (0x2), region = 81 }

// kernel: generator_forward.12
= control target key start
LH: loop header
LB: loop body
LE: loop exit
PB: predicated region body
PF: predicated region fallthrough
CT: control target
= control target key end

     0   :  { %s140_s0 = inlined_call_operand.vmem [shape: bf16[32,128], index: 0, kind: input, shape index: {}]   ;;  %s141_s1 = inlined_call_operand.vmem [shape: f32[1,128], index: 1, kind: input, shape index: {}]   ;;  %s142_s2 = inlined_call_operand.vmem [shape: f32[1,128], index: 2, kind: input, shape index: {}]   ;;  %s143_s3 = inlined_call_operand.vmem [shape: bf16[32,128], index: 3, kind: output, shape index: {}]  }
   0x1   :  { %v83_v0 = vld [vmem:[%s140_s0] sm:$0xff]   ;;  %v100_v4 = vld [vmem:[%s140_s0 + $0x8] sm:$0xff]  }
   0x2   :  { %v72_v1 = vld [vmem:[%s141_s1] ss:$0 sm:$0xff]  ;;  %v84_v2 = vunpack.c.l.bf16 %v83_v0  ;;  %v85_v3 = vunpack.c.h.bf16 %v83_v0  ;;  %v88_v6 = vunpack.c.l.bf16 %v100_v4  ;;  %v89_v7 = vunpack.c.h.bf16 %v100_v4 }
   0x3   :  { %v73_v5 = vld [vmem:[%s142_s2] ss:$0 sm:$0xff] }
   0x4   :  { %v29_v8 = vmul.f32 %v84_v2, %v72_v1  ;;  %v30_v9 = vmul.f32 %v85_v3, %v72_v1  ;;  %v31_v10 = vmul.f32 %v88_v6, %v72_v1  ;;  %v32_v11 = vmul.f32 %v89_v7, %v72_v1 }
   0x6   :  { %v40_v12 = vadd.f32 %v73_v5, %v29_v8  ;;  %v41_v13 = vadd.f32 %v73_v5, %v30_v9  ;;  %v42_v14 = vadd.f32 %v73_v5, %v31_v10  ;;  %v43_v15 = vadd.f32 %v73_v5, %v32_v11 }
   0x8   :  { %v44_v16 = vmax.f32 %v40_v12, 0.0  ;;  %v45_v17 = vmax.f32 %v41_v13, 0.0  ;;  %v46_v18 = vmax.f32 %v42_v14, 0.0  ;;  %v47_v19 = vmax.f32 %v43_v15, 0.0 }
   0xa   :  { %v93_v20 = vpack.c.bf16 %v45_v17, %v44_v16  ;;  %v98_v21 = vpack.c.bf16 %v47_v19, %v46_v18 }
   0xc   :  { %94 = vst [vmem:[%s143_s3] sm:$0xff] %v93_v20   ;;  %101 = vst [vmem:[%s143_s3 + $0x8] sm:$0xff] %v98_v21  }

// kernel: tile.63
= control target key start
LH: loop header
LB: loop body
LE: loop exit
PB: predicated region body
PF: predicated region fallthrough
CT: control target
= control target key end

     0   :  { %s22_s0 = inlined_call_operand.vmem [shape: f32[16], index: 0, kind: input, shape index: {}]   ;;  %s23_s1 = inlined_call_operand.vmem [shape: f32[8,16], index: 1, kind: output, shape index: {}]  }
   0x1   :  { %v4_v0 = vld [vmem:[%s22_s0] ss:$0 sm:$0xff] }
   0x2   :  { %5 = vst [vmem:[%s23_s1] sm:$0xff] %v4_v0 }

// kernel: tile.64
= control target key start
LH: loop header
LB: loop body
LE: loop exit
PB: predicated region body
PF: predicated region fallthrough
CT: control target
= control target key end

     0   :  { %s67_s10 = smov 112   ;;  %s68_s11 = smov 80   ;;  %vm3_vm0 = vcmask 130048   ;;  %vm9_vm1 = vcmask 1048448   ;;  %vm15_vm2 = vcmask 917248   ;;  %vm21_vm3 = vcmask 786048   ;;  %s111_s0 = inlined_call_operand.vmem [shape: f32[8,16], index: 0, kind: input, shape index: {}]   ;;  %s112_s1 = inlined_call_operand.vmem [shape: f32[1,128], index: 1, kind: output, shape index: {}]  }
   0x1   :  { %v53_v0 = vld [vmem:[%s111_s0 + $0x7] sm:$0x1]   ;;  %v55_v1 = vld [vmem:[%s111_s0 + $0x5] sm:$0x1]   ;;  %v54_v2 = vld [vmem:[%s111_s0 + $0x6] sm:$0x1]  }
   0x2   :  { %7 = vrot.lane.b32.xlu0 %v53_v0, %s67_s10  ;;  %19 = vrot.lane.b32.xlu1 %v55_v1, %s68_s11  ;;  %v56_v3 = vld [vmem:[%s111_s0 + $0x4] sm:$0x1]   ;;  %v2_v4 = vld [vmem:[%s111_s0] sm:$0x1]   ;;  %s69_s18 = smov 96   ;;  %s70_s19 = smov 64  }
   0x3   :  { %4 = vst.msk [vmem:[#allocation0] sm:$0x1] %vm3_vm0, %v2_v4   ;;  %v57_v5 = vld [vmem:[%s111_s0 + $0x3] sm:$0x1]   ;;  %v58_v6 = vld [vmem:[%s111_s0 + $0x2] sm:$0x1]  }
   0x4   :  { %s71_s24 = smov 48   ;;  %s72_s25 = smov 32   ;;  %v59_v7 = vld [vmem:[%s111_s0 + $0x1] sm:$0x1]   ;;  %vm27_vm4 = vcmask 654848   ;;  %vm33_vm5 = vcmask 523648  }
   0x5   :  { %s73_s0 = smov 16   ;;  %vm39_vm6 = vcmask 392448   ;;  %vm45_vm7 = vcmask 261248  }
   0x6   :  { %13 = vrot.lane.b32.xlu0 %v54_v2, %s69_s18  ;;  %25 = vrot.lane.b32.xlu1 %v56_v3, %s70_s19 }
   0xa   :  { %31 = vrot.lane.b32.xlu0 %v57_v5, %s71_s24  ;;  %37 = vrot.lane.b32.xlu1 %v58_v6, %s72_s25 }
   0xe   :  { %43 = vrot.lane.b32.xlu0 %v59_v7, %s73_s0 }
  0x74   :  { %v8_v8 = vpop.permute.xlu0 %7   ;;  %v20_v9 = vpop.permute.xlu1 %19  }
  0x75   :  { %10 = vst.msk [vmem:[#allocation0] sm:$0x1] %vm9_vm1, %v8_v8  }
  0x78   :  { %v14_v10 = vpop.permute.xlu0 %13   ;;  %v26_v11 = vpop.permute.xlu1 %25  }
  0x79   :  { %16 = vst.msk [vmem:[#allocation0] sm:$0x1] %vm15_vm2, %v14_v10  }
  0x7a   :  { %22 = vst.msk [vmem:[#allocation0] sm:$0x1] %vm21_vm3, %v20_v9  }
  0x7b   :  { %28 = vst.msk [vmem:[#allocation0] sm:$0x1] %vm27_vm4, %v26_v11  }
  0x7c   :  { %v32_v12 = vpop.permute.xlu0 %31   ;;  %v38_v13 = vpop.permute.xlu1 %37  }
  0x7d   :  { %34 = vst.msk [vmem:[#allocation0] sm:$0x1] %vm33_vm5, %v32_v12  }
  0x7e   :  { %40 = vst.msk [vmem:[#allocation0] sm:$0x1] %vm39_vm6, %v38_v13  }
  0x80   :  { %v44_v14 = vpop.permute.xlu0 %43  }
  0x81   :  { %46 = vst.msk [vmem:[#allocation0] sm:$0x1] %vm45_vm7, %v44_v14  }
  0x88   :  { %v50_v15 = vld [vmem:[#allocation0] sm:$0x1] }
  0x89   :  { %52 = vst [vmem:[%s112_s1] sm:$0x1] %v50_v15 }

// kernel: generator_forward.13
= control target key start
LH: loop header
LB: loop body
LE: loop exit
PB: predicated region body
PF: predicated region fallthrough
CT: control target
= control target key end

     0   :  { %s1144_s12 = smov 0   ;;  %s1146_s13 = smov 0   ;;  %s1353_s0 = inlined_call_operand.vmem [shape: bf16[4,128,128], index: 0, kind: input, shape index: {}]   ;;  %s1354_s1 = inlined_call_operand.vmem [shape: bf16[4,128,16], index: 1, kind: input, shape index: {}]   ;;  %s1355_s2 = inlined_call_operand.vmem [shape: bf16[4,128,16], index: 2, kind: output, shape index: {0}]   ;;  %s1356_s3 = inlined_call_operand.vmem [shape: f32[4,8,16], index: 3, kind: output, shape index: {1}]  }
   0x1   :  { %s1148_s14 = smov 0  }
   0x2 LB: > { %s33_s15 = sadd.s32 1, %s1117_s13  ;;  %p933_p0 = scmp.ge.s32.totalorder %s1121_s14, 1  ;;  %s1121_s14 = sphi %s1148_s14, %s14_s14   ;;  %s1117_s13 = sphi %s1146_s13, %s1358_s13   ;;  %s1113_s12 = sphi %s1144_s12, %s1357_s12  }
   0x3   : > { %p35_p1 = scmp.ge.s32.totalorder %s33_s15, 4  ;;  %p192_p2 = scmp.lt.s32.totalorder %s1121_s14, 5 }
   0x5   : > { %s1360_s15 = smov (%p35_p1, %s33_s15), 0  ;;  %p193_p3 = pnand %p933_p0, %p192_p2 }
   0x6   : > { %p244_p4 = scmp.lt.s32.totalorder (!%p193_p3), %s1113_s12, 3  ;;  %vm288_vm0 = vcmask (!%p193_p3), 130048   ;;  %v1123_v0 = vmov (!%p193_p3), 0.0   ;;  %vm662_vm1 = vcmask (!%p193_p3), 125952  }
   0x7   : > { %196 = sbr.rel (%p193_p3) target bundleno = 325 (0x145), region = 28  ;;  %291 = vst.msk [vmem:[#allocation2 + $0x10] sm:$0xff] (!%p193_p3), %vm288_vm0, %v1123_v0  ;;  %289 = vst.msk [vmem:[#allocation2] sm:$0xff] (!%p193_p3), %vm288_vm0, %v1123_v0 }
   0x8   : > { %290 = vst.msk [vmem:[#allocation2 + $0x8] sm:$0xff] (!%p193_p3), %vm288_vm0, %v1123_v0  ;;  %292 = vst.msk [vmem:[#allocation2 + $0x18] sm:$0xff] (!%p193_p3), %vm288_vm0, %v1123_v0 }
   0x9   : > { %293 = vst.msk [vmem:[#allocation2 + $0x20] sm:$0xff] (!%p193_p3), %vm288_vm0, %v1123_v0  ;;  %294 = vst.msk [vmem:[#allocation2 + $0x28] sm:$0xff] (!%p193_p3), %vm288_vm0, %v1123_v0 }
   0xa   : > { %295 = vst.msk [vmem:[#allocation2 + $0x30] sm:$0xff] (!%p193_p3), %vm288_vm0, %v1123_v0  ;;  %296 = vst.msk [vmem:[#allocation2 + $0x38] sm:$0xff] (!%p193_p3), %vm288_vm0, %v1123_v0 }
   0xb   : > { %297 = vst.msk [vmem:[#allocation2 + $0x40] sm:$0xff] (!%p193_p3), %vm288_vm0, %v1123_v0  ;;  %298 = vst.msk [vmem:[#allocation2 + $0x48] sm:$0xff] (!%p193_p3), %vm288_vm0, %v1123_v0 }
   0xc   : > { %299 = vst.msk [vmem:[#allocation2 + $0x50] sm:$0xff] (!%p193_p3), %vm288_vm0, %v1123_v0  ;;  %300 = vst.msk [vmem:[#allocation2 + $0x58] sm:$0xff] (!%p193_p3), %vm288_vm0, %v1123_v0 }
   0xd   : > { %301 = vst.msk [vmem:[#allocation2 + $0x60] sm:$0xff] (!%p193_p3), %vm288_vm0, %v1123_v0  ;;  %302 = vst.msk [vmem:[#allocation2 + $0x68] sm:$0xff] (!%p193_p3), %vm288_vm0, %v1123_v0 }
   0xe   : > { %303 = vst.msk [vmem:[#allocation2 + $0x70] sm:$0xff] %vm288_vm0, %v1123_v0  ;;  %304 = vst.msk [vmem:[#allocation2 + $0x78] sm:$0xff] %vm288_vm0, %v1123_v0  ;;  %s1362_s12 = smov (!%p244_p4, %s1113_s12), 3  ;;  %v307_v17 = vld [vmem:[#allocation2 + $0x10] sm:$0xff]  ;;  %v305_v19 = vld [vmem:[#allocation2] sm:$0xff] }
   0xf   : > { %s1182_s16 = sshll.u32 %s1362_s12, 6  ;;  %v308_v22 = vld [vmem:[#allocation2 + $0x18] sm:$0xff]  ;;  %v306_v27 = vld [vmem:[#allocation2 + $0x8] sm:$0xff]  ;;  %s940_s26 = sshll.u32 %s1362_s12, 3 }
  0x10   : > { %s1188_s19 = scalar_lea.vmem %s1354_s1, %s1182_s16  ;;  %s1197_s22 = scalar_lea.vmem %s1353_s0, %s1182_s16  ;;  %v309_v43 = vld [vmem:[#allocation2 + $0x20] sm:$0xff]  ;;  %v310_v50 = vld [vmem:[#allocation2 + $0x28] sm:$0xff] }
  0x11   : > { %v1083_v1 = vld [vmem:[%s1188_s19] sm:$0xff]   ;;  %v1084_v2 = vld [vmem:[%s1188_s19 + $0x8] sm:$0xff]   ;;  %v1085_v3 = vld [vmem:[%s1188_s19 + $0x10] sm:$0xff]   ;;  %s1224_s25 = scalar_lea.vmem %s1355_s2, %s1182_s16  ;;  %s282_s29 = scalar_lea.vmem %s1356_s3, %s940_s26 }
  0x12   : > { %1010 = vmatprep.subr.bf16.mxu0 %v1083_v1  ;;  %1042 = vmatprep.subr.bf16.mxu1 %v1083_v1  ;;  %v1086_v4 = vld [vmem:[%s1188_s19 + $0x18] sm:$0xff]   ;;  %v1091_v5 = vld [vmem:[%s1197_s22] sm:$0xff]   ;;  %v1088_v8 = vld [vmem:[%s1188_s19 + $0x28] sm:$0xff]  }
  0x13   : > { %1011 = vmatpush3.bf16.msra.mxu0 %v1083_v1  ;;  %1050 = vmatpush3.bf16.msra.mxu1 %v1083_v1  ;;  %v1087_v6 = vld [vmem:[%s1188_s19 + $0x20] sm:$0xff]   ;;  %v1089_v9 = vld [vmem:[%s1188_s19 + $0x30] sm:$0xff]   ;;  %v1090_v10 = vld [vmem:[%s1188_s19 + $0x38] sm:$0xff]  }
  0x14   : > { %1012 = vmatprep.subr.bf16.mxu0 %v1084_v2  ;;  %1043 = vmatprep.subr.bf16.mxu1 %v1084_v2  ;;  %v1095_v7 = vld [vmem:[%s1197_s22 + $0x20] sm:$0xff]   ;;  %v1092_v11 = vld [vmem:[%s1197_s22 + $0x8] sm:$0xff]   ;;  %v1093_v13 = vld [vmem:[%s1197_s22 + $0x10] sm:$0xff]  }
  0x15   : > { %1026 = vmatprep.mubr.bf16.mxu0 %v1091_v5  ;;  %1034 = vmatprep.mubr.bf16.mxu1 %v1095_v7  ;;  %v1096_v12 = vld [vmem:[%s1197_s22 + $0x28] sm:$0xff]   ;;  %v1097_v14 = vld [vmem:[%s1197_s22 + $0x30] sm:$0xff]   ;;  %v1094_v15 = vld [vmem:[%s1197_s22 + $0x18] sm:$0xff]  }
  0x16   : > { %v1098_v16 = vld [vmem:[%s1197_s22 + $0x38] sm:$0xff]   ;;  %v315_v18 = vld [vmem:[#allocation2 + $0x50] sm:$0xff]  ;;  %v313_v20 = vld [vmem:[#allocation2 + $0x40] sm:$0xff] }
  0x17   : > { %1013 = vmatpush3.bf16.msra.mxu0 %v1084_v2  ;;  %1051 = vmatpush3.bf16.msra.mxu1 %v1084_v2  ;;  %v316_v24 = vld [vmem:[#allocation2 + $0x58] sm:$0xff]  ;;  %v314_v30 = vld [vmem:[#allocation2 + $0x48] sm:$0xff]  ;;  %v311_v41 = vld [vmem:[#allocation2 + $0x30] sm:$0xff] }
  0x18   : > { %1014 = vmatprep.subr.bf16.mxu0 %v1085_v3  ;;  %1044 = vmatprep.subr.bf16.mxu1 %v1085_v3  ;;  %v319_v42 = vld [vmem:[#allocation2 + $0x70] sm:$0xff]  ;;  %v317_v44 = vld [vmem:[#allocation2 + $0x60] sm:$0xff]  ;;  %v312_v46 = vld [vmem:[#allocation2 + $0x38] sm:$0xff] }
  0x1b   : > { %1015 = vmatpush3.bf16.msra.mxu0 %v1085_v3  ;;  %1052 = vmatpush3.bf16.msra.mxu1 %v1085_v3 }
  0x1c   : > { %1016 = vmatprep.subr.bf16.mxu0 %v1086_v4  ;;  %1045 = vmatprep.subr.bf16.mxu1 %v1086_v4 }
  0x1f   : > { %1017 = vmatpush3.bf16.msra.mxu0 %v1086_v4  ;;  %1053 = vmatpush3.bf16.msra.mxu1 %v1086_v4 }
  0x20   : > { %1018 = vmatprep.subr.bf16.mxu0 %v1087_v6  ;;  %1046 = vmatprep.subr.bf16.mxu1 %v1087_v6 }
  0x23   : > { %1019 = vmatpush3.bf16.msra.mxu0 %v1087_v6  ;;  %1054 = vmatpush3.bf16.msra.mxu1 %v1087_v6 }
  0x24   : > { %1020 = vmatprep.subr.bf16.mxu0 %v1088_v8  ;;  %1047 = vmatprep.subr.bf16.mxu1 %v1088_v8 }
  0x27   : > { %1021 = vmatpush3.bf16.msra.mxu0 %v1088_v8  ;;  %1055 = vmatpush3.bf16.msra.mxu1 %v1088_v8 }
  0x28   : > { %1022 = vmatprep.subr.bf16.mxu0 %v1089_v9  ;;  %1048 = vmatprep.subr.bf16.mxu1 %v1089_v9 }
  0x2b   : > { %1023 = vmatpush3.bf16.msra.mxu0 %v1089_v9  ;;  %1056 = vmatpush3.bf16.msra.mxu1 %v1089_v9 }
  0x2c   : > { %1024 = vmatprep.subr.bf16.mxu0 %v1090_v10  ;;  %1049 = vmatprep.subr.bf16.mxu1 %v1090_v10 }
  0x2f   : > { %1025 = vmatpush3.bf16.msra.mxu0 %v1090_v10  ;;  %1057 = vmatpush3.bf16.msra.mxu1 %v1090_v10 }
  0x32   : > { %1027 = vmatmul.mubr.bf16.vlgmr.msra.gmra.mrb[0].mxu0 %v1092_v11  ;;  %1035 = vmatmul.mubr.bf16.vlgmr.msra.gmra.mrb[0].mxu1 %v1096_v12 }
  0x33   : > { %1030 = vmatprep.mubr.bf16.mxu0 %v1093_v13  ;;  %1038 = vmatprep.mubr.bf16.mxu1 %v1097_v14 }
  0x3a   : > { %1031 = vmatmul.mubr.bf16.gmra.mrb[4].mxu0 %v1094_v15  ;;  %1039 = vmatmul.mubr.bf16.gmra.mrb[4].mxu1 %v1098_v16 }
 0x105   : > { %v1028_v21 = vpop.f32.mrb[0].mxu0  ;;  %v1036_v23 = vpop.f32.mrb[0].mxu1 }
 0x106   : > { %v548_v25 = vadd.f32 %v1028_v21, %v307_v17  ;;  %v483_v26 = vpop.f32.mrb[1].mxu0  ;;  %v556_v28 = vadd.f32 %v1036_v23, %v315_v18  ;;  %v515_v29 = vpop.f32.mrb[1].mxu1 }
 0x107   : > { %v546_v31 = vadd.f32 %v483_v26, %v305_v19  ;;  %v1029_v32 = vpop.f32.mrb[2].mxu0  ;;  %v554_v33 = vadd.f32 %v515_v29, %v313_v20  ;;  %v1037_v34 = vpop.f32.mrb[2].mxu1 }
 0x108   : > { %565 = vst.msk [vmem:[#allocation2 + $0x10] sm:$0xff] %vm288_vm0, %v548_v25  ;;  %v549_v35 = vadd.f32 %v1029_v32, %v308_v22  ;;  %v486_v36 = vpop.f32.mrb[3].mxu0  ;;  %573 = vst.msk [vmem:[#allocation2 + $0x50] sm:$0xff] %vm288_vm0, %v556_v28  ;;  %v557_v37 = vadd.f32 %v1037_v34, %v316_v24  ;;  %v518_v38 = vpop.f32.mrb[3].mxu1 }
 0x109   : > { %563 = vst.msk [vmem:[#allocation2] sm:$0xff] %vm288_vm0, %v546_v31  ;;  %v547_v39 = vadd.f32 %v486_v36, %v306_v27  ;;  %571 = vst.msk [vmem:[#allocation2 + $0x40] sm:$0xff] %vm288_vm0, %v554_v33  ;;  %v555_v40 = vadd.f32 %v518_v38, %v314_v30 }
 0x10a   : > { %566 = vst.msk [vmem:[#allocation2 + $0x18] sm:$0xff] %vm288_vm0, %v549_v35  ;;  %574 = vst.msk [vmem:[#allocation2 + $0x58] sm:$0xff] %vm288_vm0, %v557_v37 }
 0x10b   : > { %564 = vst.msk [vmem:[#allocation2 + $0x8] sm:$0xff] %vm288_vm0, %v547_v39  ;;  %572 = vst.msk [vmem:[#allocation2 + $0x48] sm:$0xff] %vm288_vm0, %v555_v40 }
 0x10d   : > { %v1032_v45 = vpop.f32.mrb[4].mxu0  ;;  %v1040_v47 = vpop.f32.mrb[4].mxu1 }
 0x10e   : > { %v552_v48 = vadd.f32 %v1032_v45, %v311_v41  ;;  %v499_v49 = vpop.f32.mrb[5].mxu0  ;;  %v560_v51 = vadd.f32 %v1040_v47, %v319_v42  ;;  %v531_v52 = vpop.f32.mrb[5].mxu1 }
 0x10f   : > { %v584_v53 = vld [vmem:[#allocation2 + $0x10] sm:$0xff]  ;;  %v550_v54 = vadd.f32 %v499_v49, %v309_v43  ;;  %v1033_v55 = vpop.f32.mrb[6].mxu0  ;;  %v558_v56 = vadd.f32 %v531_v52, %v317_v44  ;;  %v1226_v57 = vpop.f32.mrb[6].mxu1 }
 0x110   : > { %v980_v58 = vpack.c.bf16 %v584_v53, %v584_v53  ;;  %v582_v59 = vld [vmem:[#allocation2] sm:$0xff]  ;;  %569 = vst.msk [vmem:[#allocation2 + $0x30] sm:$0xff] %vm288_vm0, %v552_v48  ;;  %v553_v60 = vadd.f32 %v1033_v55, %v312_v46  ;;  %v502_v61 = vpop.f32.mrb[7].mxu0  ;;  %577 = vst.msk [vmem:[#allocation2 + $0x70] sm:$0xff] %vm288_vm0, %v560_v51  ;;  %v1230_v62 = vpop.f32.mrb[7].mxu1  ;;  %v1233_v3 = vld [vmem:[#allocation2 + $0x50] sm:$0xff]  ;;  %v718_v4 = vmul.f32 %v584_v53, %v584_v53 }
 0x111   : > { %v978_v63 = vpack.c.bf16 %v582_v59, %v582_v59  ;;  %v716_v0 = vmul.f32 %v582_v59, %v582_v59  ;;  %v585_v1 = vld [vmem:[#allocation2 + $0x18] sm:$0xff]  ;;  %567 = vst.msk [vmem:[#allocation2 + $0x20] sm:$0xff] %vm288_vm0, %v550_v54  ;;  %v551_v2 = vadd.f32 %v502_v61, %v310_v50  ;;  %575 = vst.msk [vmem:[#allocation2 + $0x60] sm:$0xff] %vm288_vm0, %v558_v56  ;;  %v1239_v7 = vld [vmem:[#allocation2 + $0x40] sm:$0xff]  ;;  %v679_v8 = vsel %vm288_vm0, %v582_v59, 0.0 }
 0x112   : > { %665 = vst.msk [vmem:[%s1224_s25 + $0x8] sm:$0xf] %vm662_vm1, %v980_v58  ;;  %v981_v5 = vpack.c.bf16 %v585_v1, %v585_v1  ;;  %v583_v6 = vld [vmem:[#allocation2 + $0x8] sm:$0xff]  ;;  %v1246_v12 = vld [vmem:[#allocation2 + $0x58] sm:$0xff]  ;;  %v719_v13 = vmul.f32 %v585_v1, %v585_v1  ;;  %v988_v15 = vpack.c.bf16 %v1233_v3, %v1233_v3  ;;  %v682_v17 = vsel %vm288_vm0, %v584_v53, 0.0 }
 0x113   : > { %570 = vst.msk [vmem:[#allocation2 + $0x38] sm:$0xff] %vm288_vm0, %v553_v60  ;;  %v979_v9 = vpack.c.bf16 %v583_v6, %v583_v6  ;;  %v680_v10 = vsel %vm288_vm0, %v583_v6, 0.0  ;;  %v717_v11 = vmul.f32 %v583_v6, %v583_v6  ;;  %568 = vst.msk [vmem:[#allocation2 + $0x28] sm:$0xff] %vm288_vm0, %v551_v2  ;;  %v1252_v16 = vld [vmem:[#allocation2 + $0x48] sm:$0xff]  ;;  %v732_v18 = vsel %vm288_vm0, %v716_v0, 0.0  ;;  %v320_v51 = vld [vmem:[#allocation2 + $0x78] sm:$0xff] }
 0x114   : > { %663 = vst.msk [vmem:[%s1224_s25] sm:$0xf] %vm662_vm1, %v978_v63  ;;  %666 = vst.msk [vmem:[%s1224_s25 + $0xc] sm:$0xf] %vm662_vm1, %v981_v5  ;;  %v681_v14 = vadd.f32 %v680_v10, %v679_v8  ;;  %v986_v20 = vpack.c.bf16 %v1239_v7, %v1239_v7  ;;  %v989_v23 = vpack.c.bf16 %v1246_v12, %v1246_v12  ;;  %v735_v24 = vsel %vm288_vm0, %v718_v4, 0.0  ;;  %v318_v56 = vld [vmem:[#allocation2 + $0x68] sm:$0xff] }
 0x115   : > { %664 = vst.msk [vmem:[%s1224_s25 + $0x4] sm:$0xf] %vm662_vm1, %v979_v9  ;;  %v733_v19 = vsel %vm288_vm0, %v717_v11, 0.0  ;;  %673 = vst.msk [vmem:[%s1224_s25 + $0x28] sm:$0xf] %vm662_vm1, %v988_v15  ;;  %v987_v26 = vpack.c.bf16 %v1252_v16, %v1252_v16  ;;  %v684_v27 = vsel %vm288_vm0, %v585_v1, 0.0  ;;  %v724_v50 = vmul.f32 %v1239_v7, %v1239_v7 }
 0x116   : > { %v683_v21 = vadd.f32 %v682_v17, %v681_v14  ;;  %v734_v22 = vadd.f32 %v733_v19, %v732_v18  ;;  %671 = vst.msk [vmem:[%s1224_s25 + $0x20] sm:$0xf] %vm662_vm1, %v986_v20  ;;  %v737_v28 = vsel %vm288_vm0, %v719_v13, 0.0  ;;  %674 = vst.msk [vmem:[%s1224_s25 + $0x2c] sm:$0xf] %vm662_vm1, %v989_v23  ;;  %v694_v0 = vsel %vm288_vm0, %v1239_v7, 0.0 }
 0x117   : > { %v588_v25 = vld [vmem:[#allocation2 + $0x30] sm:$0xff]  ;;  %672 = vst.msk [vmem:[%s1224_s25 + $0x24] sm:$0xf] %vm662_vm1, %v987_v26  ;;  %v561_v1 = vadd.f32 %v1226_v57, %v320_v51  ;;  %v559_v5 = vadd.f32 %v1230_v62, %v318_v56  ;;  %v747_v8 = vsel %vm288_vm0, %v724_v50, 0.0  ;;  %v725_v9 = vmul.f32 %v1252_v16, %v1252_v16 }
 0x118   : > { %v736_v29 = vadd.f32 %v735_v24, %v734_v22  ;;  %v984_v30 = vpack.c.bf16 %v588_v25, %v588_v25  ;;  %v586_v31 = vld [vmem:[#allocation2 + $0x20] sm:$0xff]  ;;  %v685_v33 = vadd.f32 %v684_v27, %v683_v21  ;;  %v1282_v43 = vld [vmem:[#allocation2 + $0x70] sm:$0xff]  ;;  %v722_v44 = vmul.f32 %v588_v25, %v588_v25 }
 0x119   : > { %v982_v32 = vpack.c.bf16 %v586_v31, %v586_v31  ;;  %v686_v34 = vsel %vm288_vm0, %v586_v31, 0.0  ;;  %v720_v35 = vmul.f32 %v586_v31, %v586_v31  ;;  %v594_v48 = vld [vmem:[#allocation2 + $0x60] sm:$0xff]  ;;  %v690_v52 = vsel %vm288_vm0, %v588_v25, 0.0  ;;  %578 = vst.msk [vmem:[#allocation2 + $0x78] sm:$0xff] %vm288_vm0, %v561_v1  ;;  %576 = vst.msk [vmem:[#allocation2 + $0x68] sm:$0xff] %vm288_vm0, %v559_v5 }
 0x11a   : > { %v589_v36 = vld [vmem:[#allocation2 + $0x38] sm:$0xff]  ;;  %669 = vst.msk [vmem:[%s1224_s25 + $0x18] sm:$0xf] %vm662_vm1, %v984_v30  ;;  %v738_v37 = vadd.f32 %v737_v28, %v736_v29  ;;  %v587_v39 = vld [vmem:[#allocation2 + $0x28] sm:$0xff]  ;;  %v687_v40 = vadd.f32 %v686_v34, %v685_v33  ;;  %v992_v55 = vpack.c.bf16 %v1282_v43, %v1282_v43  ;;  %v990_v60 = vpack.c.bf16 %v594_v48, %v594_v48 }
 0x11b   : > { %v985_v38 = vpack.c.bf16 %v589_v36, %v589_v36  ;;  %667 = vst.msk [vmem:[%s1224_s25 + $0x10] sm:$0xf] %vm662_vm1, %v982_v32  ;;  %v739_v41 = vsel %vm288_vm0, %v720_v35, 0.0  ;;  %v983_v42 = vpack.c.bf16 %v587_v39, %v587_v39  ;;  %v688_v46 = vsel %vm288_vm0, %v587_v39, 0.0 }
 0x11c   : > { %v740_v45 = vadd.f32 %v739_v41, %v738_v37  ;;  %v721_v47 = vmul.f32 %v587_v39, %v587_v39  ;;  %v689_v49 = vadd.f32 %v688_v46, %v687_v40  ;;  %v723_v53 = vmul.f32 %v589_v36, %v589_v36  ;;  %677 = vst.msk [vmem:[%s1224_s25 + $0x38] sm:$0xf] %vm662_vm1, %v992_v55 }
 0x11d   : > { %670 = vst.msk [vmem:[%s1224_s25 + $0x1c] sm:$0xf] %vm662_vm1, %v985_v38  ;;  %668 = vst.msk [vmem:[%s1224_s25 + $0x14] sm:$0xf] %vm662_vm1, %v983_v42  ;;  %v743_v61 = vsel %vm288_vm0, %v722_v44, 0.0  ;;  %v692_v63 = vsel %vm288_vm0, %v589_v36, 0.0  ;;  %v726_v57 = vmul.f32 %v1233_v3, %v1233_v3  ;;  %v727_v15 = vmul.f32 %v1246_v12, %v1246_v12 }
 0x11e   : > { %v741_v54 = vsel %vm288_vm0, %v721_v47, 0.0  ;;  %v691_v58 = vadd.f32 %v690_v52, %v689_v49  ;;  %675 = vst.msk [vmem:[%s1224_s25 + $0x30] sm:$0xf] %vm662_vm1, %v990_v60  ;;  %v745_v6 = vsel %vm288_vm0, %v723_v53, 0.0  ;;  %v696_v11 = vsel %vm288_vm0, %v1252_v16, 0.0 }
 0x11f   : > { %v742_v59 = vadd.f32 %v741_v54, %v740_v45  ;;  %v698_v14 = vsel %vm288_vm0, %v1233_v3, 0.0  ;;  %v749_v17 = vsel %vm288_vm0, %v725_v9, 0.0  ;;  %v728_v18 = vmul.f32 %v594_v48, %v594_v48 }
 0x120   : > { %v693_v4 = vadd.f32 %v692_v63, %v691_v58  ;;  %v751_v21 = vsel %vm288_vm0, %v726_v57, 0.0  ;;  %v700_v22 = vsel %vm288_vm0, %v1246_v12, 0.0  ;;  %v702_v16 = vsel %vm288_vm0, %v594_v48, 0.0  ;;  %v597_v3 = vld [vmem:[#allocation2 + $0x78] sm:$0xff]  ;;  %v595_v28 = vld [vmem:[#allocation2 + $0x68] sm:$0xff] }
 0x121   : > { %v744_v2 = vadd.f32 %v743_v61, %v742_v59  ;;  %v753_v25 = vsel %vm288_vm0, %v727_v15, 0.0  ;;  %v755_v26 = vsel %vm288_vm0, %v728_v18, 0.0  ;;  %v993_v27 = vpack.c.bf16 %v597_v3, %v597_v3 }
 0x122   : > { %v695_v7 = vadd.f32 %v694_v0, %v693_v4  ;;  %v991_v31 = vpack.c.bf16 %v595_v28, %v595_v28  ;;  %v730_v32 = vmul.f32 %v1282_v43, %v1282_v43  ;;  %v704_v12 = vsel %vm288_vm0, %v595_v28, 0.0 }
 0x123   : > { %v746_v10 = vadd.f32 %v745_v6, %v744_v2  ;;  %678 = vst.msk [vmem:[%s1224_s25 + $0x3c] sm:$0xf] %vm662_vm1, %v993_v27  ;;  %v729_v33 = vmul.f32 %v595_v28, %v595_v28  ;;  %v706_v36 = vsel %vm288_vm0, %v1282_v43, 0.0  ;;  %v731_v37 = vmul.f32 %v597_v3, %v597_v3 }
 0x124   : > { %v697_v13 = vadd.f32 %v696_v11, %v695_v7  ;;  %676 = vst.msk [vmem:[%s1224_s25 + $0x34] sm:$0xf] %vm662_vm1, %v991_v31  ;;  %v759_v41 = vsel %vm288_vm0, %v730_v32, 0.0  ;;  %v708_v42 = vsel %vm288_vm0, %v597_v3, 0.0  ;;  %v769_v51 = vlaneseq }
 0x125   : > { %v748_v62 = vadd.f32 %v747_v8, %v746_v10  ;;  %v757_v38 = vsel %vm288_vm0, %v729_v33, 0.0  ;;  %v761_v46 = vsel %vm288_vm0, %v731_v37, 0.0 }
 0x126   : > { %v699_v19 = vadd.f32 %v698_v14, %v697_v13  ;;  %v770_v55 = vshrl.u32 %v769_v51, 7 }
 0x127   : > { %v750_v20 = vadd.f32 %v749_v17, %v748_v62 }
 0x128   : > { %v701_v24 = vadd.f32 %v700_v22, %v699_v19  ;;  %vm771_vm2 = vcmp.eq.s32.totalorder %v770_v55, 0  ;;  %vm773_vm3 = vcmp.eq.s32.totalorder %v770_v55, 1 }
 0x129   : > { %v752_v23 = vadd.f32 %v751_v21, %v750_v20 }
 0x12a   : > { %v703_v29 = vadd.f32 %v702_v16, %v701_v24 }
 0x12b   : > { %v754_v30 = vadd.f32 %v753_v25, %v752_v23 }
 0x12c   : > { %v705_v35 = vadd.f32 %v704_v12, %v703_v29 }
 0x12d   : > { %v756_v34 = vadd.f32 %v755_v26, %v754_v30 }
 0x12e   : > { %v707_v39 = vadd.f32 %v706_v36, %v705_v35 }
 0x12f   : > { %v758_v40 = vadd.f32 %v757_v38, %v756_v34 }
 0x130   : > { %v709_v44 = vadd.f32 %v708_v42, %v707_v39 }
 0x131   : > { %v760_v45 = vadd.f32 %v759_v41, %v758_v40 }
 0x132   : > { %v710_v47 = vrot.slane %v709_v44, 4 }
 0x133   : > { %v762_v48 = vadd.f32 %v761_v46, %v760_v45 }
 0x134   : > { %v711_v49 = vadd.f32 %v710_v47, %v709_v44 }
 0x135   : > { %v763_v50 = vrot.slane %v762_v48, 4 }
 0x136   : > { %v712_v43 = vrot.slane %v711_v49, 2 }
 0x137   : > { %v764_v52 = vadd.f32 %v763_v50, %v762_v48 }
 0x138   : > { %v713_v53 = vadd.f32 %v712_v43, %v711_v49 }
 0x139   : > { %v765_v54 = vrot.slane %v764_v52, 2 }
 0x13a   : > { %v714_v56 = vrot.slane %v713_v53, 1 }
 0x13b   : > { %v766_v58 = vadd.f32 %v765_v54, %v764_v52 }
 0x13c   : > { %v715_v59 = vadd.f32 %v714_v56, %v713_v53 }
 0x13d   : > { %v767_v60 = vrot.slane %v766_v58, 1 }
 0x13e   : > { %v772_v63 = vsel %vm771_vm2, %v715_v59, 0.0 }
 0x13f   : > { %v768_v61 = vadd.f32 %v767_v60, %v766_v58 }
 0x141   : > { %v774_v0 = vsel %vm773_vm3, %v768_v61, 0.0 }
 0x142   : > { %v775_v1 = vadd.f32 %v774_v0, %v772_v63 }
 0x144   : > { %776 = vst.msk [vmem:[%s282_s29] sm:$0xff] %vm288_vm0, %v775_v1 }
 0x145 PF: > { %s14_s14 = sadd.s32 1, %s1121_s14   ;;  %s1357_s12 = smov %s1117_s13 }
 0x146   : > { %p11_p5 = scmp.ge.s32.totalorder %s14_s14, 6   ;;  %s1358_s13 = smov %s1360_s15 }
 0x148   :  { %13 = sbr.rel (!%p11_p5) target bundleno = 2 (0x2), region = 81 }

// kernel: generator_forward.14
= control target key start
LH: loop header
LB: loop body
LE: loop exit
PB: predicated region body
PF: predicated region fallthrough
CT: control target
= control target key end

     0   :  { %s222_s0 = inlined_call_operand.vmem [shape: bf16[64,128], index: 0, kind: input, shape index: {}]   ;;  %s223_s1 = inlined_call_operand.vmem [shape: f32[1,128], index: 1, kind: input, shape index: {}]   ;;  %s224_s2 = inlined_call_operand.vmem [shape: f32[1,128], index: 2, kind: input, shape index: {}]   ;;  %s225_s3 = inlined_call_operand.vmem [shape: bf16[64,128], index: 3, kind: output, shape index: {}]  }
   0x1   :  { %v131_v0 = vld [vmem:[%s222_s0] sm:$0xff]   ;;  %v166_v4 = vld [vmem:[%s222_s0 + $0x8] sm:$0xff]   ;;  %v167_v5 = vld [vmem:[%s222_s0 + $0x10] sm:$0xff]  }
   0x2   :  { %v112_v1 = vld [vmem:[%s223_s1] ss:$0 sm:$0xff]  ;;  %v132_v2 = vunpack.c.l.bf16 %v131_v0  ;;  %v133_v3 = vunpack.c.h.bf16 %v131_v0  ;;  %v168_v6 = vld [vmem:[%s222_s0 + $0x18] sm:$0xff]   ;;  %v136_v8 = vunpack.c.l.bf16 %v166_v4  ;;  %v137_v9 = vunpack.c.h.bf16 %v166_v4 }
   0x3   :  { %v113_v7 = vld [vmem:[%s224_s2] ss:$0 sm:$0xff]  ;;  %v140_v10 = vunpack.c.l.bf16 %v167_v5  ;;  %v141_v11 = vunpack.c.h.bf16 %v167_v5  ;;  %v144_v14 = vunpack.c.l.bf16 %v168_v6  ;;  %v145_v15 = vunpack.c.h.bf16 %v168_v6 }
   0x4   :  { %v37_v12 = vmul.f32 %v132_v2, %v112_v1  ;;  %v38_v13 = vmul.f32 %v133_v3, %v112_v1  ;;  %v39_v16 = vmul.f32 %v136_v8, %v112_v1  ;;  %v40_v17 = vmul.f32 %v137_v9, %v112_v1 }
   0x5   :  { %v41_v18 = vmul.f32 %v140_v10, %v112_v1  ;;  %v42_v19 = vmul.f32 %v141_v11, %v112_v1  ;;  %v43_v22 = vmul.f32 %v144_v14, %v112_v1  ;;  %v44_v23 = vmul.f32 %v145_v15, %v112_v1 }
   0x6   :  { %v52_v20 = vadd.f32 %v113_v7, %v37_v12  ;;  %v53_v21 = vadd.f32 %v113_v7, %v38_v13  ;;  %v54_v24 = vadd.f32 %v113_v7, %v39_v16  ;;  %v55_v25 = vadd.f32 %v113_v7, %v40_v17 }
   0x7   :  { %v56_v26 = vadd.f32 %v113_v7, %v41_v18  ;;  %v57_v27 = vadd.f32 %v113_v7, %v42_v19  ;;  %v58_v30 = vadd.f32 %v113_v7, %v43_v22  ;;  %v59_v31 = vadd.f32 %v113_v7, %v44_v23 }
   0x8   :  { %v60_v28 = vmax.f32 %v52_v20, 0.0  ;;  %v61_v29 = vmax.f32 %v53_v21, 0.0  ;;  %v62_v32 = vmax.f32 %v54_v24, 0.0  ;;  %v63_v33 = vmax.f32 %v55_v25, 0.0 }
   0x9   :  { %v64_v34 = vmax.f32 %v56_v26, 0.0  ;;  %v65_v35 = vmax.f32 %v57_v27, 0.0  ;;  %v66_v37 = vmax.f32 %v58_v30, 0.0  ;;  %v67_v38 = vmax.f32 %v59_v31, 0.0 }
   0xa   :  { %v149_v36 = vpack.c.bf16 %v61_v29, %v60_v28  ;;  %v154_v39 = vpack.c.bf16 %v63_v33, %v62_v32 }
   0xb   :  { %v159_v40 = vpack.c.bf16 %v65_v35, %v64_v34  ;;  %v164_v41 = vpack.c.bf16 %v67_v38, %v66_v37 }
   0xc   :  { %150 = vst [vmem:[%s225_s3] sm:$0xff] %v149_v36   ;;  %169 = vst [vmem:[%s225_s3 + $0x8] sm:$0xff] %v154_v39  }
   0xd   :  { %170 = vst [vmem:[%s225_s3 + $0x10] sm:$0xff] %v159_v40   ;;  %171 = vst [vmem:[%s225_s3 + $0x18] sm:$0xff] %v164_v41  }

// kernel: tile.73
= control target key start
LH: loop header
LB: loop body
LE: loop exit
PB: predicated region body
PF: predicated region fallthrough
CT: control target
= control target key end

     0   :  { %s28_s0 = inlined_call_operand.vmem [shape: f32[8], index: 0, kind: input, shape index: {}]   ;;  %s29_s1 = inlined_call_operand.vmem [shape: f32[16,8], index: 1, kind: output, shape index: {}]  }
   0x1   :  { %v4_v0 = vld [vmem:[%s28_s0] ss:$0 sm:$0xff] }
   0x2   :  { %5 = vst [vmem:[%s29_s1] sm:$0xff] %v4_v0  ;;  %8 = vst [vmem:[%s29_s1 + $0x8] sm:$0xff] %v4_v0 }

// kernel: tile.74
= control target key start
LH: loop header
LB: loop body
LE: loop exit
PB: predicated region body
PF: predicated region fallthrough
CT: control target
= control target key end

     0   :  { %s131_s10 = smov 120   ;;  %s132_s11 = smov 104   ;;  %vm3_vm0 = vcmask 64512   ;;  %vm9_vm1 = vcmask 1048512   ;;  %vm15_vm2 = vcmask 982912   ;;  %vm21_vm3 = vcmask 917312   ;;  %s207_s0 = inlined_call_operand.vmem [shape: f32[16,8], index: 0, kind: input, shape index: {}]   ;;  %s208_s1 = inlined_call_operand.vmem [shape: f32[1,128], index: 1, kind: output, shape index: {}]  }
   0x1   :  { %v101_v0 = vld [vmem:[%s207_s0 + $0xf] sm:$0x1]   ;;  %v103_v1 = vld [vmem:[%s207_s0 + $0xd] sm:$0x1]   ;;  %v102_v2 = vld [vmem:[%s207_s0 + $0xe] sm:$0x1]  }
   0x2   :  { %7 = vrot.lane.b32.xlu0 %v101_v0, %s131_s10  ;;  %19 = vrot.lane.b32.xlu1 %v103_v1, %s132_s11  ;;  %v104_v3 = vld [vmem:[%s207_s0 + $0xc] sm:$0x1]   ;;  %s133_s16 = smov 112   ;;  %s134_s17 = smov 96   ;;  %v105_v4 = vld [vmem:[%s207_s0 + $0xb] sm:$0x1]  }
   0x3   :  { %v106_v5 = vld [vmem:[%s207_s0 + $0xa] sm:$0x1]   ;;  %v2_v6 = vld [vmem:[%s207_s0] sm:$0x1]   ;;  %s135_s24 = smov 88   ;;  %s136_s25 = smov 80  }
   0x4   :  { %4 = vst.msk [vmem:[#allocation0] sm:$0x1] %vm3_vm0, %v2_v6   ;;  %v107_v7 = vld [vmem:[%s207_s0 + $0x9] sm:$0x1]   ;;  %v108_v8 = vld [vmem:[%s207_s0 + $0x8] sm:$0x1]  }
   0x5   :  { %s137_s30 = smov 72   ;;  %s138_s2 = smov 64   ;;  %v109_v9 = vld [vmem:[%s207_s0 + $0x7] sm:$0x1]   ;;  %v110_v10 = vld [vmem:[%s207_s0 + $0x6] sm:$0x1]  }
   0x6   :  { %13 = vrot.lane.b32.xlu0 %v102_v2, %s133_s16  ;;  %25 = vrot.lane.b32.xlu1 %v104_v3, %s134_s17  ;;  %s139_s7 = smov 56   ;;  %s140_s8 = smov 48   ;;  %v111_v11 = vld [vmem:[%s207_s0 + $0x5] sm:$0x1]   ;;  %v112_v12 = vld [vmem:[%s207_s0 + $0x4] sm:$0x1]  }
   0x7   :  { %s141_s13 = smov 40   ;;  %s142_s14 = smov 32   ;;  %v113_v13 = vld [vmem:[%s207_s0 + $0x3] sm:$0x1]   ;;  %v114_v14 = vld [vmem:[%s207_s0 + $0x2] sm:$0x1]  }
   0x8   :  { %s143_s19 = smov 24   ;;  %s144_s20 = smov 16   ;;  %v115_v15 = vld [vmem:[%s207_s0 + $0x1] sm:$0x1]   ;;  %vm27_vm4 = vcmask 851712   ;;  %vm33_vm5 = vcmask 786112  }
   0x9   :  { %s145_s0 = smov 8   ;;  %vm39_vm6 = vcmask 720512   ;;  %vm45_vm7 = vcmask 654912   ;;  %vm51_vm8 = vcmask 589312   ;;  %vm57_vm9 = vcmask 523712  }
   0xa   :  { %31 = vrot.lane.b32.xlu0 %v105_v4, %s135_s24  ;;  %37 = vrot.lane.b32.xlu1 %v106_v5, %s136_s25  ;;  %vm63_vm10 = vcmask 458112   ;;  %vm69_vm11 = vcmask 392512   ;;  %vm75_vm12 = vcmask 326912   ;;  %vm81_vm13 = vcmask 261312  }
   0xb   :  { %vm87_vm14 = vcmask 195712   ;;  %vm93_vm15 = vcmask 130112  }
   0xe   :  { %43 = vrot.lane.b32.xlu0 %v107_v7, %s137_s30  ;;  %49 = vrot.lane.b32.xlu1 %v108_v8, %s138_s2 }
  0x12   :  { %55 = vrot.lane.b32.xlu0 %v109_v9, %s139_s7  ;;  %61 = vrot.lane.b32.xlu1 %v110_v10, %s140_s8 }
  0x16   :  { %67 = vrot.lane.b32.xlu0 %v111_v11, %s141_s13  ;;  %73 = vrot.lane.b32.xlu1 %v112_v12, %s142_s14 }
  0x1a   :  { %79 = vrot.lane.b32.xlu0 %v113_v13, %s143_s19  ;;  %85 = vrot.lane.b32.xlu1 %v114_v14, %s144_s20 }
  0x1e   :  { %91 = vrot.lane.b32.xlu0 %v115_v15, %s145_s0 }
  0x74   :  { %v8_v16 = vpop.permute.xlu0 %7   ;;  %v20_v17 = vpop.permute.xlu1 %19  }
  0x75   :  { %10 = vst.msk [vmem:[#allocation0] sm:$0x1] %vm9_vm1, %v8_v16  }
  0x78   :  { %v14_v18 = vpop.permute.xlu0 %13   ;;  %v26_v19 = vpop.permute.xlu1 %25  }
  0x79   :  { %16 = vst.msk [vmem:[#allocation0] sm:$0x1] %vm15_vm2, %v14_v18  }
  0x7a   :  { %22 = vst.msk [vmem:[#allocation0] sm:$0x1] %vm21_vm3, %v20_v17  }
  0x7b   :  { %28 = vst.msk [vmem:[#allocation0] sm:$0x1] %vm27_vm4, %v26_v19  }
  0x7c   :  { %v32_v20 = vpop.permute.xlu0 %31   ;;  %v38_v21 = vpop.permute.xlu1 %37  }
  0x7d   :  { %34 = vst.msk [vmem:[#allocation0] sm:$0x1] %vm33_vm5, %v32_v20  }
  0x7e   :  { %40 = vst.msk [vmem:[#allocation0] sm:$0x1] %vm39_vm6, %v38_v21  }
  0x80   :  { %v44_v22 = vpop.permute.xlu0 %43   ;;  %v50_v23 = vpop.permute.xlu1 %49  }
  0x81   :  { %46 = vst.msk [vmem:[#allocation0] sm:$0x1] %vm45_vm7, %v44_v22  }
  0x82   :  { %52 = vst.msk [vmem:[#allocation0] sm:$0x1] %vm51_vm8, %v50_v23  }
  0x84   :  { %v56_v24 = vpop.permute.xlu0 %55   ;;  %v62_v25 = vpop.permute.xlu1 %61  }
  0x85   :  { %58 = vst.msk [vmem:[#allocation0] sm:$0x1] %vm57_vm9, %v56_v24  }
  0x86   :  { %64 = vst.msk [vmem:[#allocation0] sm:$0x1] %vm63_vm10, %v62_v25  }
  0x88   :  { %v68_v26 = vpop.permute.xlu0 %67   ;;  %v74_v27 = vpop.permute.xlu1 %73  }
  0x89   :  { %70 = vst.msk [vmem:[#allocation0] sm:$0x1] %vm69_vm11, %v68_v26  }
  0x8a   :  { %76 = vst.msk [vmem:[#allocation0] sm:$0x1] %vm75_vm12, %v74_v27  }
  0x8c   :  { %v80_v28 = vpop.permute.xlu0 %79   ;;  %v86_v29 = vpop.permute.xlu1 %85  }
  0x8d   :  { %82 = vst.msk [vmem:[#allocation0] sm:$0x1] %vm81_vm13, %v80_v28  }
  0x8e   :  { %88 = vst.msk [vmem:[#allocation0] sm:$0x1] %vm87_vm14, %v86_v29  }
  0x90   :  { %v92_v30 = vpop.permute.xlu0 %91  }
  0x91   :  { %94 = vst.msk [vmem:[#allocation0] sm:$0x1] %vm93_vm15, %v92_v30  }
  0x98   :  { %v98_v31 = vld [vmem:[#allocation0] sm:$0x1] }
  0x99   :  { %100 = vst [vmem:[%s208_s1] sm:$0x1] %v98_v31 }

// kernel: generator_forward.15
= control target key start
LH: loop header
LB: loop body
LE: loop exit
PB: predicated region body
PF: predicated region fallthrough
CT: control target
= control target key end

     0   :  { %s2464_s12 = smov 0   ;;  %s2466_s13 = smov 0   ;;  %s3348_s0 = inlined_call_operand.vmem [shape: bf16[4,512,128], index: 0, kind: input, shape index: {}]   ;;  %s3349_s1 = inlined_call_operand.vmem [shape: bf16[4,128,8], index: 1, kind: input, shape index: {}]   ;;  %s3350_s2 = inlined_call_operand.vmem [shape: bf16[4,512,8], index: 2, kind: output, shape index: {0}]   ;;  %s3351_s3 = inlined_call_operand.vmem [shape: f32[4,8,8], index: 3, kind: output, shape index: {1}]  }
   0x1   :  { %s2468_s14 = smov 0  }
   0x2 LB: > { %s33_s15 = sadd.s32 1, %s2437_s13  ;;  %p2037_p0 = scmp.ge.s32.totalorder %s2441_s14, 1  ;;  %s2441_s14 = sphi %s2468_s14, %s14_s14   ;;  %s2437_s13 = sphi %s2466_s13, %s3353_s13   ;;  %s2433_s12 = sphi %s2464_s12, %s3352_s12  }
   0x3   : > { %p35_p1 = scmp.ge.s32.totalorder %s33_s15, 4  ;;  %p192_p2 = scmp.lt.s32.totalorder %s2441_s14, 5 }
   0x5   : > { %s3355_s15 = smov (%p35_p1, %s33_s15), 0  ;;  %p193_p3 = pnand %p2037_p0, %p192_p2 }
   0x6   : > { %p244_p4 = scmp.lt.s32.totalorder (!%p193_p3), %s2433_s12, 3  ;;  %vm288_vm0 = vcmask (!%p193_p3), 64512   ;;  %v2443_v0 = vmov (!%p193_p3), 0.0   ;;  %vm1478_vm1 = vcmask (!%p193_p3), 60416  }
   0x7   : > { %196 = sbr.rel (%p193_p3) target bundleno = 424 (0x1a8), region = 28  ;;  %291 = vst.msk [vmem:[#allocation2 + $0x10] sm:$0xff] (!%p193_p3), %vm288_vm0, %v2443_v0  ;;  %289 = vst.msk [vmem:[#allocation2] sm:$0xff] (!%p193_p3), %vm288_vm0, %v2443_v0 }
   0x8   : > { %290 = vst.msk [vmem:[#allocation2 + $0x8] sm:$0xff] (!%p193_p3), %vm288_vm0, %v2443_v0  ;;  %292 = vst.msk [vmem:[#allocation2 + $0x18] sm:$0xff] (!%p193_p3), %vm288_vm0, %v2443_v0 }
   0x9   : > { %293 = vst.msk [vmem:[#allocation2 + $0x20] sm:$0xff] (!%p193_p3), %vm288_vm0, %v2443_v0  ;;  %294 = vst.msk [vmem:[#allocation2 + $0x28] sm:$0xff] (!%p193_p3), %vm288_vm0, %v2443_v0 }
   0xa   : > { %295 = vst.msk [vmem:[#allocation2 + $0x30] sm:$0xff] (!%p193_p3), %vm288_vm0, %v2443_v0  ;;  %296 = vst.msk [vmem:[#allocation2 + $0x38] sm:$0xff] (!%p193_p3), %vm288_vm0, %v2443_v0 }
   0xb   : > { %297 = vst.msk [vmem:[#allocation2 + $0x40] sm:$0xff] (!%p193_p3), %vm288_vm0, %v2443_v0  ;;  %298 = vst.msk [vmem:[#allocation2 + $0x48] sm:$0xff] (!%p193_p3), %vm288_vm0, %v2443_v0 }
   0xc   : > { %299 = vst.msk [vmem:[#allocation2 + $0x50] sm:$0xff] (!%p193_p3), %vm288_vm0, %v2443_v0  ;;  %300 = vst.msk [vmem:[#allocation2 + $0x58] sm:$0xff] (!%p193_p3), %vm288_vm0, %v2443_v0 }
   0xd   : > { %301 = vst.msk [vmem:[#allocation2 + $0x60] sm:$0xff] (!%p193_p3), %vm288_vm0, %v2443_v0  ;;  %302 = vst.msk [vmem:[#allocation2 + $0x68] sm:$0xff] (!%p193_p3), %vm288_vm0, %v2443_v0 }
   0xe   : > { %303 = vst.msk [vmem:[#allocation2 + $0x70] sm:$0xff] %vm288_vm0, %v2443_v0  ;;  %304 = vst.msk [vmem:[#allocation2 + $0x78] sm:$0xff] %vm288_vm0, %v2443_v0  ;;  %s3357_s12 = smov (!%p244_p4, %s2433_s12), 3  ;;  %v355_v41 = vld [vmem:[#allocation2 + $0x10] sm:$0xff]  ;;  %v353_v43 = vld [vmem:[#allocation2] sm:$0xff] }
   0xf   : > { %305 = vst.msk [vmem:[#allocation2 + $0x80] sm:$0xff] %vm288_vm0, %v2443_v0  ;;  %306 = vst.msk [vmem:[#allocation2 + $0x88] sm:$0xff] %vm288_vm0, %v2443_v0  ;;  %s2152_s16 = sshll.u32 %s3357_s12, 6  ;;  %s2151_s20 = sshll.u32 %s3357_s12, 8  ;;  %v356_v46 = vld [vmem:[#allocation2 + $0x18] sm:$0xff]  ;;  %v354_v51 = vld [vmem:[#allocation2 + $0x8] sm:$0xff] }
  0x10   : > { %307 = vst.msk [vmem:[#allocation2 + $0x90] sm:$0xff] %vm288_vm0, %v2443_v0  ;;  %308 = vst.msk [vmem:[#allocation2 + $0x98] sm:$0xff] %vm288_vm0, %v2443_v0  ;;  %s2622_s19 = scalar_lea.vmem %s3349_s1, %s2152_s16  ;;  %s2633_s23 = scalar_lea.vmem %s3348_s0, %s2151_s20 }
  0x11   : > { %309 = vst.msk [vmem:[#allocation2 + $0xa0] sm:$0xff] %vm288_vm0, %v2443_v0  ;;  %310 = vst.msk [vmem:[#allocation2 + $0xa8] sm:$0xff] %vm288_vm0, %v2443_v0  ;;  %v2379_v1 = vld [vmem:[%s2622_s19] sm:$0xff]   ;;  %v2380_v2 = vld [vmem:[%s2622_s19 + $0x8] sm:$0xff]   ;;  %s2685_s26 = scalar_lea.vmem %s3350_s2, %s2151_s20  ;;  %s2044_s27 = sshll.u32 %s3357_s12, 3 }
  0x12   : > { %311 = vst.msk [vmem:[#allocation2 + $0xb0] sm:$0xff] %vm288_vm0, %v2443_v0  ;;  %312 = vst.msk [vmem:[#allocation2 + $0xb8] sm:$0xff] %vm288_vm0, %v2443_v0  ;;  %2258 = vmatprep.subr.bf16.mxu0 %v2379_v1  ;;  %2338 = vmatprep.subr.bf16.mxu1 %v2379_v1  ;;  %v2381_v3 = vld [vmem:[%s2622_s19 + $0x10] sm:$0xff]   ;;  %v2382_v4 = vld [vmem:[%s2622_s19 + $0x18] sm:$0xff]   ;;  %s282_s30 = scalar_lea.vmem %s3351_s3, %s2044_s27 }
  0x13   : > { %313 = vst.msk [vmem:[#allocation2 + $0xc0] sm:$0xff] %vm288_vm0, %v2443_v0  ;;  %314 = vst.msk [vmem:[#allocation2 + $0xc8] sm:$0xff] %vm288_vm0, %v2443_v0  ;;  %2259 = vmatpush3.bf16.msra.mxu0 %v2379_v1  ;;  %2346 = vmatpush3.bf16.msra.mxu1 %v2379_v1  ;;  %v2387_v5 = vld [vmem:[%s2633_s23] sm:$0xff]   ;;  %v2384_v7 = vld [vmem:[%s2622_s19 + $0x28] sm:$0xff]  }
  0x14   : > { %315 = vst.msk [vmem:[#allocation2 + $0xd0] sm:$0xff] %vm288_vm0, %v2443_v0  ;;  %316 = vst.msk [vmem:[#allocation2 + $0xd8] sm:$0xff] %vm288_vm0, %v2443_v0  ;;  %2260 = vmatprep.subr.bf16.mxu0 %v2380_v2  ;;  %2339 = vmatprep.subr.bf16.mxu1 %v2380_v2  ;;  %v2383_v6 = vld [vmem:[%s2622_s19 + $0x20] sm:$0xff]   ;;  %v2385_v8 = vld [vmem:[%s2622_s19 + $0x30] sm:$0xff]  }
  0x15   : > { %317 = vst.msk [vmem:[#allocation2 + $0xe0] sm:$0xff] %vm288_vm0, %v2443_v0  ;;  %318 = vst.msk [vmem:[#allocation2 + $0xe8] sm:$0xff] %vm288_vm0, %v2443_v0  ;;  %2274 = vmatprep.mubr.bf16.mxu0 %v2387_v5  ;;  %v2386_v9 = vld [vmem:[%s2622_s19 + $0x38] sm:$0xff]   ;;  %v2403_v10 = vld [vmem:[%s2633_s23 + $0x80] sm:$0xff]  }
  0x16   : > { %319 = vst.msk [vmem:[#allocation2 + $0xf0] sm:$0xff] %vm288_vm0, %v2443_v0  ;;  %320 = vst.msk [vmem:[#allocation2 + $0xf8] sm:$0xff] %vm288_vm0, %v2443_v0  ;;  %2306 = vmatprep.mubr.bf16.mxu1 %v2403_v10  ;;  %v2388_v11 = vld [vmem:[%s2633_s23 + $0x8] sm:$0xff]   ;;  %v2389_v12 = vld [vmem:[%s2633_s23 + $0x10] sm:$0xff]  }
  0x17   : > { %321 = vst.msk [vmem:[#allocation2 + $0x100] sm:$0xff] %vm288_vm0, %v2443_v0  ;;  %322 = vst.msk [vmem:[#allocation2 + $0x108] sm:$0xff] %vm288_vm0, %v2443_v0  ;;  %2261 = vmatpush3.bf16.msra.mxu0 %v2380_v2  ;;  %2347 = vmatpush3.bf16.msra.mxu1 %v2380_v2  ;;  %v2404_v13 = vld [vmem:[%s2633_s23 + $0x88] sm:$0xff]   ;;  %v2405_v14 = vld [vmem:[%s2633_s23 + $0x90] sm:$0xff]  }
  0x18   : > { %323 = vst.msk [vmem:[#allocation2 + $0x110] sm:$0xff] %vm288_vm0, %v2443_v0  ;;  %324 = vst.msk [vmem:[#allocation2 + $0x118] sm:$0xff] %vm288_vm0, %v2443_v0  ;;  %2262 = vmatprep.subr.bf16.mxu0 %v2381_v3  ;;  %2340 = vmatprep.subr.bf16.mxu1 %v2381_v3  ;;  %v2390_v15 = vld [vmem:[%s2633_s23 + $0x18] sm:$0xff]   ;;  %v2391_v16 = vld [vmem:[%s2633_s23 + $0x20] sm:$0xff]  }
  0x19   : > { %325 = vst.msk [vmem:[#allocation2 + $0x120] sm:$0xff] %vm288_vm0, %v2443_v0  ;;  %326 = vst.msk [vmem:[#allocation2 + $0x128] sm:$0xff] %vm288_vm0, %v2443_v0  ;;  %v2406_v17 = vld [vmem:[%s2633_s23 + $0x98] sm:$0xff]   ;;  %v2407_v18 = vld [vmem:[%s2633_s23 + $0xa0] sm:$0xff]  }
  0x1a   : > { %327 = vst.msk [vmem:[#allocation2 + $0x130] sm:$0xff] %vm288_vm0, %v2443_v0  ;;  %328 = vst.msk [vmem:[#allocation2 + $0x138] sm:$0xff] %vm288_vm0, %v2443_v0  ;;  %v2392_v19 = vld [vmem:[%s2633_s23 + $0x28] sm:$0xff]   ;;  %v2393_v21 = vld [vmem:[%s2633_s23 + $0x30] sm:$0xff]  }
  0x1b   : > { %329 = vst.msk [vmem:[#allocation2 + $0x140] sm:$0xff] %vm288_vm0, %v2443_v0  ;;  %330 = vst.msk [vmem:[#allocation2 + $0x148] sm:$0xff] %vm288_vm0, %v2443_v0  ;;  %2263 = vmatpush3.bf16.msra.mxu0 %v2381_v3  ;;  %2348 = vmatpush3.bf16.msra.mxu1 %v2381_v3  ;;  %v2408_v20 = vld [vmem:[%s2633_s23 + $0xa8] sm:$0xff]   ;;  %v2409_v22 = vld [vmem:[%s2633_s23 + $0xb0] sm:$0xff]  }
  0x1c   : > { %331 = vst.msk [vmem:[#allocation2 + $0x150] sm:$0xff] %vm288_vm0, %v2443_v0  ;;  %332 = vst.msk [vmem:[#allocation2 + $0x158] sm:$0xff] %vm288_vm0, %v2443_v0  ;;  %2264 = vmatprep.subr.bf16.mxu0 %v2382_v4  ;;  %2341 = vmatprep.subr.bf16.mxu1 %v2382_v4  ;;  %v2394_v23 = vld [vmem:[%s2633_s23 + $0x38] sm:$0xff]   ;;  %v2395_v25 = vld [vmem:[%s2633_s23 + $0x40] sm:$0xff]  }
  0x1d   : > { %333 = vst.msk [vmem:[#allocation2 + $0x160] sm:$0xff] %vm288_vm0, %v2443_v0  ;;  %334 = vst.msk [vmem:[#allocation2 + $0x168] sm:$0xff] %vm288_vm0, %v2443_v0  ;;  %v2410_v24 = vld [vmem:[%s2633_s23 + $0xb8] sm:$0xff]   ;;  %v2411_v26 = vld [vmem:[%s2633_s23 + $0xc0] sm:$0xff]  }
  0x1e   : > { %335 = vst.msk [vmem:[#allocation2 + $0x170] sm:$0xff] %vm288_vm0, %v2443_v0  ;;  %336 = vst.msk [vmem:[#allocation2 + $0x178] sm:$0xff] %vm288_vm0, %v2443_v0  ;;  %v2396_v27 = vld [vmem:[%s2633_s23 + $0x48] sm:$0xff]   ;;  %v2397_v29 = vld [vmem:[%s2633_s23 + $0x50] sm:$0xff]  }
  0x1f   : > { %337 = vst.msk [vmem:[#allocation2 + $0x180] sm:$0xff] %vm288_vm0, %v2443_v0  ;;  %338 = vst.msk [vmem:[#allocation2 + $0x188] sm:$0xff] %vm288_vm0, %v2443_v0  ;;  %2265 = vmatpush3.bf16.msra.mxu0 %v2382_v4  ;;  %2349 = vmatpush3.bf16.msra.mxu1 %v2382_v4  ;;  %v2412_v28 = vld [vmem:[%s2633_s23 + $0xc8] sm:$0xff]   ;;  %v2413_v30 = vld [vmem:[%s2633_s23 + $0xd0] sm:$0xff]  }
  0x20   : > { %339 = vst.msk [vmem:[#allocation2 + $0x190] sm:$0xff] %vm288_vm0, %v2443_v0  ;;  %340 = vst.msk [vmem:[#allocation2 + $0x198] sm:$0xff] %vm288_vm0, %v2443_v0  ;;  %2266 = vmatprep.subr.bf16.mxu0 %v2383_v6  ;;  %2342 = vmatprep.subr.bf16.mxu1 %v2383_v6  ;;  %v2398_v31 = vld [vmem:[%s2633_s23 + $0x58] sm:$0xff]   ;;  %v2399_v33 = vld [vmem:[%s2633_s23 + $0x60] sm:$0xff]  }
  0x21   : > { %341 = vst.msk [vmem:[#allocation2 + $0x1a0] sm:$0xff] %vm288_vm0, %v2443_v0  ;;  %342 = vst.msk [vmem:[#allocation2 + $0x1a8] sm:$0xff] %vm288_vm0, %v2443_v0  ;;  %v2414_v32 = vld [vmem:[%s2633_s23 + $0xd8] sm:$0xff]   ;;  %v2415_v34 = vld [vmem:[%s2633_s23 + $0xe0] sm:$0xff]  }
  0x22   : > { %343 = vst.msk [vmem:[#allocation2 + $0x1b0] sm:$0xff] %vm288_vm0, %v2443_v0  ;;  %344 = vst.msk [vmem:[#allocation2 + $0x1b8] sm:$0xff] %vm288_vm0, %v2443_v0  ;;  %v2400_v35 = vld [vmem:[%s2633_s23 + $0x68] sm:$0xff]   ;;  %v2401_v37 = vld [vmem:[%s2633_s23 + $0x70] sm:$0xff]  }
  0x23   : > { %345 = vst.msk [vmem:[#allocation2 + $0x1c0] sm:$0xff] %vm288_vm0, %v2443_v0  ;;  %346 = vst.msk [vmem:[#allocation2 + $0x1c8] sm:$0xff] %vm288_vm0, %v2443_v0  ;;  %2267 = vmatpush3.bf16.msra.mxu0 %v2383_v6  ;;  %2350 = vmatpush3.bf16.msra.mxu1 %v2383_v6  ;;  %v2416_v36 = vld [vmem:[%s2633_s23 + $0xe8] sm:$0xff]   ;;  %v2417_v38 = vld [vmem:[%s2633_s23 + $0xf0] sm:$0xff]  }
  0x24   : > { %347 = vst.msk [vmem:[#allocation2 + $0x1d0] sm:$0xff] %vm288_vm0, %v2443_v0  ;;  %348 = vst.msk [vmem:[#allocation2 + $0x1d8] sm:$0xff] %vm288_vm0, %v2443_v0  ;;  %2268 = vmatprep.subr.bf16.mxu0 %v2384_v7  ;;  %2343 = vmatprep.subr.bf16.mxu1 %v2384_v7  ;;  %v2402_v39 = vld [vmem:[%s2633_s23 + $0x78] sm:$0xff]   ;;  %v387_v42 = vld [vmem:[#allocation2 + $0x110] sm:$0xff] }
  0x25   : > { %349 = vst.msk [vmem:[#allocation2 + $0x1e0] sm:$0xff] %vm288_vm0, %v2443_v0  ;;  %350 = vst.msk [vmem:[#allocation2 + $0x1e8] sm:$0xff] %vm288_vm0, %v2443_v0  ;;  %v2418_v40 = vld [vmem:[%s2633_s23 + $0xf8] sm:$0xff]   ;;  %v385_v44 = vld [vmem:[#allocation2 + $0x100] sm:$0xff] }
  0x26   : > { %351 = vst.msk [vmem:[#allocation2 + $0x1f0] sm:$0xff] %vm288_vm0, %v2443_v0  ;;  %352 = vst.msk [vmem:[#allocation2 + $0x1f8] sm:$0xff] %vm288_vm0, %v2443_v0  ;;  %v388_v48 = vld [vmem:[#allocation2 + $0x118] sm:$0xff]  ;;  %v386_v54 = vld [vmem:[#allocation2 + $0x108] sm:$0xff] }
  0x27   : > { %2269 = vmatpush3.bf16.msra.mxu0 %v2384_v7  ;;  %2351 = vmatpush3.bf16.msra.mxu1 %v2384_v7  ;;  %v359_v1 = vld [vmem:[#allocation2 + $0x30] sm:$0xff]  ;;  %v357_v3 = vld [vmem:[#allocation2 + $0x20] sm:$0xff]  ;;  %v360_v6 = vld [vmem:[#allocation2 + $0x38] sm:$0xff] }
  0x28   : > { %2270 = vmatprep.subr.bf16.mxu0 %v2385_v8  ;;  %2344 = vmatprep.subr.bf16.mxu1 %v2385_v8  ;;  %v391_v2 = vld [vmem:[#allocation2 + $0x130] sm:$0xff]  ;;  %v389_v4 = vld [vmem:[#allocation2 + $0x120] sm:$0xff]  ;;  %v358_v10 = vld [vmem:[#allocation2 + $0x28] sm:$0xff] }
  0x2b   : > { %2271 = vmatpush3.bf16.msra.mxu0 %v2385_v8  ;;  %2352 = vmatpush3.bf16.msra.mxu1 %v2385_v8 }
  0x2c   : > { %2272 = vmatprep.subr.bf16.mxu0 %v2386_v9  ;;  %2345 = vmatprep.subr.bf16.mxu1 %v2386_v9 }
  0x2f   : > { %2273 = vmatpush3.bf16.msra.mxu0 %v2386_v9  ;;  %2353 = vmatpush3.bf16.msra.mxu1 %v2386_v9 }
  0x32   : > { %2275 = vmatmul.mubr.bf16.vlgmr.msra.gmra.mrb[0].mxu0 %v2388_v11  ;;  %2307 = vmatmul.mubr.bf16.vlgmr.msra.gmra.mrb[0].mxu1 %v2404_v13 }
  0x33   : > { %2278 = vmatprep.mubr.bf16.mxu0 %v2389_v12  ;;  %2310 = vmatprep.mubr.bf16.mxu1 %v2405_v14 }
  0x3a   : > { %2279 = vmatmul.mubr.bf16.gmra.mrb[4].mxu0 %v2390_v15  ;;  %2311 = vmatmul.mubr.bf16.gmra.mrb[4].mxu1 %v2406_v17 }
  0x3b   : > { %2282 = vmatprep.mubr.bf16.mxu0 %v2391_v16  ;;  %2314 = vmatprep.mubr.bf16.mxu1 %v2407_v18 }
  0x42   : > { %2283 = vmatmul.mubr.bf16.gmra.mrb[8].mxu0 %v2392_v19  ;;  %2315 = vmatmul.mubr.bf16.gmra.mrb[8].mxu1 %v2408_v20 }
  0x43   : > { %2286 = vmatprep.mubr.bf16.mxu0 %v2393_v21  ;;  %2318 = vmatprep.mubr.bf16.mxu1 %v2409_v22 }
  0x4a   : > { %2287 = vmatmul.mubr.bf16.gmra.mrb[12].mxu0 %v2394_v23  ;;  %2319 = vmatmul.mubr.bf16.gmra.mrb[12].mxu1 %v2410_v24 }
  0x4b   : > { %2290 = vmatprep.mubr.bf16.mxu0 %v2395_v25  ;;  %2322 = vmatprep.mubr.bf16.mxu1 %v2411_v26 }
  0x52   : > { %2291 = vmatmul.mubr.bf16.gmra.mrb[16].mxu0 %v2396_v27  ;;  %2323 = vmatmul.mubr.bf16.gmra.mrb[16].mxu1 %v2412_v28 }
  0x53   : > { %2294 = vmatprep.mubr.bf16.mxu0 %v2397_v29  ;;  %2326 = vmatprep.mubr.bf16.mxu1 %v2413_v30 }
  0x5a   : > { %2295 = vmatmul.mubr.bf16.gmra.mrb[20].mxu0 %v2398_v31  ;;  %2327 = vmatmul.mubr.bf16.gmra.mrb[20].mxu1 %v2414_v32 }
  0x5b   : > { %2298 = vmatprep.mubr.bf16.mxu0 %v2399_v33  ;;  %2330 = vmatprep.mubr.bf16.mxu1 %v2415_v34 }
  0x62   : > { %2299 = vmatmul.mubr.bf16.gmra.mrb[24].mxu0 %v2400_v35  ;;  %2331 = vmatmul.mubr.bf16.gmra.mrb[24].mxu1 %v2416_v36  ;;  %v363_v36 = vld [vmem:[#allocation2 + $0x50] sm:$0xff] }
  0x63   : > { %2302 = vmatprep.mubr.bf16.mxu0 %v2401_v37  ;;  %2334 = vmatprep.mubr.bf16.mxu1 %v2417_v38 }
  0x6a   : > { %2303 = vmatmul.mubr.bf16.gmra.mrb[28].mxu0 %v2402_v39  ;;  %2335 = vmatmul.mubr.bf16.gmra.mrb[28].mxu1 %v2418_v40  ;;  %v361_v39 = vld [vmem:[#allocation2 + $0x40] sm:$0xff] }
 0x105   : > { %v2276_v45 = vpop.f32.mrb[0].mxu0  ;;  %v2308_v47 = vpop.f32.mrb[0].mxu1 }
 0x106   : > { %v1028_v49 = vadd.f32 %v2276_v45, %v355_v41  ;;  %v771_v50 = vpop.f32.mrb[1].mxu0  ;;  %v1060_v52 = vadd.f32 %v2308_v47, %v387_v42  ;;  %v899_v53 = vpop.f32.mrb[1].mxu1 }
 0x107   : > { %v1026_v55 = vadd.f32 %v771_v50, %v353_v43  ;;  %v2277_v56 = vpop.f32.mrb[2].mxu0  ;;  %v1058_v57 = vadd.f32 %v899_v53, %v385_v44  ;;  %v2309_v58 = vpop.f32.mrb[2].mxu1 }
 0x108   : > { %1093 = vst.msk [vmem:[#allocation2 + $0x10] sm:$0xff] %vm288_vm0, %v1028_v49  ;;  %v1029_v59 = vadd.f32 %v2277_v56, %v356_v46  ;;  %v774_v60 = vpop.f32.mrb[3].mxu0  ;;  %1125 = vst.msk [vmem:[#allocation2 + $0x110] sm:$0xff] %vm288_vm0, %v1060_v52  ;;  %v1061_v61 = vadd.f32 %v2309_v58, %v388_v48  ;;  %v902_v62 = vpop.f32.mrb[3].mxu1 }
 0x109   : > { %1091 = vst.msk [vmem:[#allocation2] sm:$0xff] %vm288_vm0, %v1026_v55  ;;  %v1027_v63 = vadd.f32 %v774_v60, %v354_v51  ;;  %1123 = vst.msk [vmem:[#allocation2 + $0x100] sm:$0xff] %vm288_vm0, %v1058_v57  ;;  %v1059_v0 = vadd.f32 %v902_v62, %v386_v54 }
 0x10a   : > { %1094 = vst.msk [vmem:[#allocation2 + $0x18] sm:$0xff] %vm288_vm0, %v1029_v59  ;;  %1126 = vst.msk [vmem:[#allocation2 + $0x118] sm:$0xff] %vm288_vm0, %v1061_v61 }
 0x10b   : > { %1092 = vst.msk [vmem:[#allocation2 + $0x8] sm:$0xff] %vm288_vm0, %v1027_v63  ;;  %1124 = vst.msk [vmem:[#allocation2 + $0x108] sm:$0xff] %vm288_vm0, %v1059_v0 }
 0x10d   : > { %v2280_v5 = vpop.f32.mrb[4].mxu0  ;;  %v2312_v7 = vpop.f32.mrb[4].mxu1 }
 0x10e   : > { %v1032_v8 = vadd.f32 %v2280_v5, %v359_v1  ;;  %v787_v9 = vpop.f32.mrb[5].mxu0  ;;  %v1064_v11 = vadd.f32 %v2312_v7, %v391_v2  ;;  %v915_v12 = vpop.f32.mrb[5].mxu1  ;;  %v364_v7 = vld [vmem:[#allocation2 + $0x58] sm:$0xff] }
 0x10f   : > { %v1160_v13 = vld [vmem:[#allocation2 + $0x10] sm:$0xff]  ;;  %v1030_v14 = vadd.f32 %v787_v9, %v357_v3  ;;  %v2281_v15 = vpop.f32.mrb[6].mxu0  ;;  %v1062_v16 = vadd.f32 %v915_v12, %v389_v4  ;;  %v2687_v17 = vpop.f32.mrb[6].mxu1  ;;  %v362_v12 = vld [vmem:[#allocation2 + $0x48] sm:$0xff] }
 0x110   : > { %v2156_v18 = vpack.c.bf16 %v1160_v13, %v1160_v13  ;;  %v1158_v19 = vld [vmem:[#allocation2] sm:$0xff]  ;;  %1097 = vst.msk [vmem:[#allocation2 + $0x30] sm:$0xff] %vm288_vm0, %v1032_v8  ;;  %v1033_v20 = vadd.f32 %v2281_v15, %v360_v6  ;;  %v790_v21 = vpop.f32.mrb[7].mxu0  ;;  %1129 = vst.msk [vmem:[#allocation2 + $0x130] sm:$0xff] %vm288_vm0, %v1064_v11  ;;  %v2691_v22 = vpop.f32.mrb[7].mxu1  ;;  %v2694_v27 = vld [vmem:[#allocation2 + $0x110] sm:$0xff]  ;;  %v1678_v28 = vmul.f32 %v1160_v13, %v1160_v13 }
 0x111   : > { %v2154_v23 = vpack.c.bf16 %v1158_v19, %v1158_v19  ;;  %v1676_v24 = vmul.f32 %v1158_v19, %v1158_v19  ;;  %v1161_v25 = vld [vmem:[#allocation2 + $0x18] sm:$0xff]  ;;  %1095 = vst.msk [vmem:[#allocation2 + $0x20] sm:$0xff] %vm288_vm0, %v1030_v14  ;;  %v1031_v26 = vadd.f32 %v790_v21, %v358_v10  ;;  %1127 = vst.msk [vmem:[#allocation2 + $0x120] sm:$0xff] %vm288_vm0, %v1062_v16  ;;  %v2700_v31 = vld [vmem:[#allocation2 + $0x100] sm:$0xff]  ;;  %v1543_v32 = vsel %vm288_vm0, %v1158_v19, 0.0 }
 0x112   : > { %1481 = vst.msk [vmem:[%s2685_s26 + $0x8] sm:$0xf] %vm1478_vm1, %v2156_v18  ;;  %v2157_v29 = vpack.c.bf16 %v1161_v25, %v1161_v25  ;;  %v1159_v30 = vld [vmem:[#allocation2 + $0x8] sm:$0xff]  ;;  %v1546_v37 = vsel %vm288_vm0, %v1160_v13, 0.0  ;;  %v2188_v40 = vpack.c.bf16 %v2694_v27, %v2694_v27  ;;  %v2712_v41 = vld [vmem:[#allocation2 + $0x118] sm:$0xff]  ;;  %v1679_v43 = vmul.f32 %v1161_v25, %v1161_v25  ;;  %v367_v16 = vld [vmem:[#allocation2 + $0x70] sm:$0xff] }
 0x113   : > { %1098 = vst.msk [vmem:[#allocation2 + $0x38] sm:$0xff] %vm288_vm0, %v1033_v20  ;;  %v2155_v33 = vpack.c.bf16 %v1159_v30, %v1159_v30  ;;  %v1544_v34 = vsel %vm288_vm0, %v1159_v30, 0.0  ;;  %v1677_v35 = vmul.f32 %v1159_v30, %v1159_v30  ;;  %1096 = vst.msk [vmem:[#allocation2 + $0x28] sm:$0xff] %vm288_vm0, %v1031_v26  ;;  %v1740_v42 = vsel %vm288_vm0, %v1676_v24, 0.0  ;;  %v2747_v18 = vld [vmem:[#allocation2 + $0x108] sm:$0xff]  ;;  %v365_v24 = vld [vmem:[#allocation2 + $0x60] sm:$0xff] }
 0x114   : > { %1479 = vst.msk [vmem:[%s2685_s26] sm:$0xf] %vm1478_vm1, %v2154_v23  ;;  %1482 = vst.msk [vmem:[%s2685_s26 + $0xc] sm:$0xf] %vm1478_vm1, %v2157_v29  ;;  %v1545_v38 = vadd.f32 %v1544_v34, %v1543_v32  ;;  %v2186_v46 = vpack.c.bf16 %v2700_v31, %v2700_v31  ;;  %v1743_v53 = vsel %vm288_vm0, %v1678_v28, 0.0  ;;  %v1548_v54 = vsel %vm288_vm0, %v1161_v25, 0.0 }
 0x115   : > { %1480 = vst.msk [vmem:[%s2685_s26 + $0x4] sm:$0xf] %vm1478_vm1, %v2155_v33  ;;  %v1741_v44 = vsel %vm288_vm0, %v1677_v35, 0.0  ;;  %v2284_v45 = vpop.f32.mrb[8].mxu0  ;;  %v2720_v47 = vpop.f32.mrb[8].mxu1  ;;  %v2189_v58 = vpack.c.bf16 %v2712_v41, %v2712_v41  ;;  %v1745_v2 = vsel %vm288_vm0, %v1679_v43, 0.0 }
 0x116   : > { %v1547_v48 = vadd.f32 %v1546_v37, %v1545_v38  ;;  %v1742_v49 = vadd.f32 %v1741_v44, %v1740_v42  ;;  %v1036_v50 = vadd.f32 %v2284_v45, %v363_v36  ;;  %v803_v51 = vpop.f32.mrb[9].mxu0  ;;  %1513 = vst.msk [vmem:[%s2685_s26 + $0x88] sm:$0xf] %vm1478_vm1, %v2188_v40  ;;  %v2724_v52 = vpop.f32.mrb[9].mxu1  ;;  %1511 = vst.msk [vmem:[%s2685_s26 + $0x80] sm:$0xf] %vm1478_vm1, %v2186_v46 }
 0x117   : > { %v1164_v55 = vld [vmem:[#allocation2 + $0x30] sm:$0xff]  ;;  %v1034_v56 = vadd.f32 %v803_v51, %v361_v39  ;;  %v2285_v57 = vpop.f32.mrb[10].mxu0  ;;  %v2732_v59 = vpop.f32.mrb[10].mxu1  ;;  %1514 = vst.msk [vmem:[%s2685_s26 + $0x8c] sm:$0xf] %vm1478_vm1, %v2189_v58  ;;  %v368_v30 = vld [vmem:[#allocation2 + $0x78] sm:$0xff]  ;;  %v2187_v37 = vpack.c.bf16 %v2747_v18, %v2747_v18 }
 0x118   : > { %v1549_v60 = vadd.f32 %v1548_v54, %v1547_v48  ;;  %v1744_v61 = vadd.f32 %v1743_v53, %v1742_v49  ;;  %v2160_v62 = vpack.c.bf16 %v1164_v55, %v1164_v55  ;;  %v1162_v63 = vld [vmem:[#allocation2 + $0x20] sm:$0xff]  ;;  %1101 = vst.msk [vmem:[#allocation2 + $0x50] sm:$0xff] %vm288_vm0, %v1036_v50  ;;  %v806_v0 = vpop.f32.mrb[11].mxu0  ;;  %v2735_v1 = vpop.f32.mrb[11].mxu1  ;;  %v1682_v13 = vmul.f32 %v1164_v55, %v1164_v55  ;;  %v366_v45 = vld [vmem:[#allocation2 + $0x68] sm:$0xff] }
 0x119   : > { %v2158_v3 = vpack.c.bf16 %v1162_v63, %v1162_v63  ;;  %v1550_v4 = vsel %vm288_vm0, %v1162_v63, 0.0  ;;  %v1680_v5 = vmul.f32 %v1162_v63, %v1162_v63  ;;  %1099 = vst.msk [vmem:[#allocation2 + $0x40] sm:$0xff] %vm288_vm0, %v1034_v56  ;;  %v1037_v23 = vadd.f32 %v2285_v57, %v364_v7 }
 0x11a   : > { %v1165_v6 = vld [vmem:[#allocation2 + $0x38] sm:$0xff]  ;;  %v1746_v8 = vadd.f32 %v1745_v2, %v1744_v61  ;;  %1485 = vst.msk [vmem:[%s2685_s26 + $0x18] sm:$0xf] %vm1478_vm1, %v2160_v62  ;;  %v1551_v9 = vadd.f32 %v1550_v4, %v1549_v60  ;;  %v1163_v11 = vld [vmem:[#allocation2 + $0x28] sm:$0xff]  ;;  %v1554_v25 = vsel %vm288_vm0, %v1164_v55, 0.0  ;;  %v1035_v28 = vadd.f32 %v806_v0, %v362_v12  ;;  %v2775_v55 = vld [vmem:[#allocation2 + $0x130] sm:$0xff] }
 0x11b   : > { %v2161_v10 = vpack.c.bf16 %v1165_v6, %v1165_v6  ;;  %1483 = vst.msk [vmem:[%s2685_s26 + $0x10] sm:$0xf] %vm1478_vm1, %v2158_v3  ;;  %v1747_v14 = vsel %vm288_vm0, %v1680_v5, 0.0  ;;  %v2159_v15 = vpack.c.bf16 %v1163_v11, %v1163_v11  ;;  %v1552_v20 = vsel %vm288_vm0, %v1163_v11, 0.0  ;;  %1512 = vst.msk [vmem:[%s2685_s26 + $0x84] sm:$0xf] %vm1478_vm1, %v2187_v37 }
 0x11c   : > { %v1748_v19 = vadd.f32 %v1747_v14, %v1746_v8  ;;  %v1681_v21 = vmul.f32 %v1163_v11, %v1163_v11  ;;  %v1553_v26 = vadd.f32 %v1552_v20, %v1551_v9  ;;  %v1683_v33 = vmul.f32 %v1165_v6, %v1165_v6  ;;  %1102 = vst.msk [vmem:[#allocation2 + $0x58] sm:$0xff] %vm288_vm0, %v1037_v23  ;;  %v2781_v62 = vld [vmem:[#allocation2 + $0x120] sm:$0xff]  ;;  %v371_v4 = vld [vmem:[#allocation2 + $0x90] sm:$0xff]  ;;  %v372_v37 = vld [vmem:[#allocation2 + $0x98] sm:$0xff] }
 0x11d   : > { %1486 = vst.msk [vmem:[%s2685_s26 + $0x1c] sm:$0xf] %vm1478_vm1, %v2161_v10  ;;  %1484 = vst.msk [vmem:[%s2685_s26 + $0x14] sm:$0xf] %vm1478_vm1, %v2159_v15  ;;  %v2288_v29 = vpop.f32.mrb[12].mxu0  ;;  %v2755_v32 = vpop.f32.mrb[12].mxu1  ;;  %v2192_v5 = vpack.c.bf16 %v2775_v55, %v2775_v55  ;;  %v2190_v9 = vpack.c.bf16 %v2781_v62, %v2781_v62 }
 0x11e   : > { %v1749_v34 = vsel %vm288_vm0, %v1681_v21, 0.0  ;;  %v1040_v35 = vadd.f32 %v2288_v29, %v367_v16  ;;  %v819_v36 = vpop.f32.mrb[13].mxu0  ;;  %v2761_v38 = vpop.f32.mrb[13].mxu1  ;;  %v1555_v39 = vadd.f32 %v1554_v25, %v1553_v26  ;;  %1100 = vst.msk [vmem:[#allocation2 + $0x48] sm:$0xff] %vm288_vm0, %v1035_v28  ;;  %v1751_v48 = vsel %vm288_vm0, %v1682_v13, 0.0  ;;  %v369_v8 = vld [vmem:[#allocation2 + $0x80] sm:$0xff] }
 0x11f   : > { %v1750_v40 = vadd.f32 %v1749_v34, %v1748_v19  ;;  %v2763_v42 = vld [vmem:[#allocation2 + $0x50] sm:$0xff]  ;;  %v1038_v43 = vadd.f32 %v819_v36, %v365_v24  ;;  %v2289_v44 = vpop.f32.mrb[14].mxu0  ;;  %v2766_v46 = vpop.f32.mrb[14].mxu1  ;;  %v1556_v49 = vsel %vm288_vm0, %v1165_v6, 0.0  ;;  %v1753_v63 = vsel %vm288_vm0, %v1683_v33, 0.0 }
 0x120   : > { %v2164_v50 = vpack.c.bf16 %v2763_v42, %v2763_v42  ;;  %v1166_v51 = vld [vmem:[#allocation2 + $0x40] sm:$0xff]  ;;  %1105 = vst.msk [vmem:[#allocation2 + $0x70] sm:$0xff] %vm288_vm0, %v1040_v35  ;;  %v1041_v53 = vadd.f32 %v2289_v44, %v368_v30  ;;  %v822_v54 = vpop.f32.mrb[15].mxu0  ;;  %v2777_v56 = vpop.f32.mrb[15].mxu1  ;;  %v1557_v60 = vadd.f32 %v1556_v49, %v1555_v39  ;;  %v1686_v10 = vmul.f32 %v2763_v42, %v2763_v42 }
 0x121   : > { %v1752_v57 = vadd.f32 %v1751_v48, %v1750_v40  ;;  %v2162_v58 = vpack.c.bf16 %v1166_v51, %v1166_v51  ;;  %v1558_v61 = vsel %vm288_vm0, %v1166_v51, 0.0  ;;  %1103 = vst.msk [vmem:[#allocation2 + $0x60] sm:$0xff] %vm288_vm0, %v1038_v43  ;;  %v1684_v0 = vmul.f32 %v1166_v51, %v1166_v51 }
 0x122   : > { %1489 = vst.msk [vmem:[%s2685_s26 + $0x28] sm:$0xf] %vm1478_vm1, %v2164_v50  ;;  %v1039_v2 = vadd.f32 %v822_v54, %v366_v45  ;;  %v1559_v6 = vadd.f32 %v1558_v61, %v1557_v60  ;;  %1517 = vst.msk [vmem:[%s2685_s26 + $0x98] sm:$0xf] %vm1478_vm1, %v2192_v5  ;;  %v1562_v43 = vsel %vm288_vm0, %v2763_v42, 0.0  ;;  %v1759_v44 = vsel %vm288_vm0, %v1686_v10, 0.0 }
 0x123   : > { %1106 = vst.msk [vmem:[#allocation2 + $0x78] sm:$0xff] %vm288_vm0, %v1041_v53  ;;  %v1754_v3 = vadd.f32 %v1753_v63, %v1752_v57  ;;  %v1755_v7 = vsel %vm288_vm0, %v1684_v0, 0.0  ;;  %v1169_v11 = vld [vmem:[#allocation2 + $0x58] sm:$0xff]  ;;  %v370_v57 = vld [vmem:[#allocation2 + $0x88] sm:$0xff]  ;;  %v375_v0 = vld [vmem:[#allocation2 + $0xb0] sm:$0xff] }
 0x124   : > { %1487 = vst.msk [vmem:[%s2685_s26 + $0x20] sm:$0xf] %vm1478_vm1, %v2162_v58  ;;  %v2165_v15 = vpack.c.bf16 %v1169_v11, %v1169_v11  ;;  %v1687_v16 = vmul.f32 %v1169_v11, %v1169_v11  ;;  %1515 = vst.msk [vmem:[%s2685_s26 + $0x90] sm:$0xf] %vm1478_vm1, %v2190_v9  ;;  %v1564_v42 = vsel %vm288_vm0, %v1169_v11, 0.0 }
 0x125   : > { %1104 = vst.msk [vmem:[#allocation2 + $0x68] sm:$0xff] %vm288_vm0, %v1039_v2  ;;  %v2292_v12 = vpop.f32.mrb[16].mxu0  ;;  %v2799_v13 = vpop.f32.mrb[16].mxu1  ;;  %v1756_v14 = vadd.f32 %v1755_v7, %v1754_v3  ;;  %v1167_v19 = vld [vmem:[#allocation2 + $0x48] sm:$0xff]  ;;  %v392_v7 = vld [vmem:[#allocation2 + $0x138] sm:$0xff] }
 0x126   : > { %v1044_v20 = vadd.f32 %v2292_v12, %v371_v4  ;;  %v835_v21 = vpop.f32.mrb[17].mxu0  ;;  %v2803_v23 = vpop.f32.mrb[17].mxu1  ;;  %v2163_v24 = vpack.c.bf16 %v1167_v19, %v1167_v19  ;;  %v1560_v25 = vsel %vm288_vm0, %v1167_v19, 0.0  ;;  %v1685_v26 = vmul.f32 %v1167_v19, %v1167_v19  ;;  %1490 = vst.msk [vmem:[%s2685_s26 + $0x2c] sm:$0xf] %vm1478_vm1, %v2165_v15 }
 0x127   : > { %v1172_v28 = vld [vmem:[#allocation2 + $0x70] sm:$0xff]  ;;  %v1042_v29 = vadd.f32 %v835_v21, %v369_v8  ;;  %v2293_v30 = vpop.f32.mrb[18].mxu0  ;;  %v2806_v33 = vpop.f32.mrb[18].mxu1  ;;  %v1561_v34 = vadd.f32 %v1560_v25, %v1559_v6  ;;  %v1761_v58 = vsel %vm288_vm0, %v1687_v16, 0.0  ;;  %v373_v6 = vld [vmem:[#allocation2 + $0xa0] sm:$0xff]  ;;  %v376_v21 = vld [vmem:[#allocation2 + $0xb8] sm:$0xff] }
 0x128   : > { %v2168_v35 = vpack.c.bf16 %v1172_v28, %v1172_v28  ;;  %v1170_v36 = vld [vmem:[#allocation2 + $0x60] sm:$0xff]  ;;  %1109 = vst.msk [vmem:[#allocation2 + $0x90] sm:$0xff] %vm288_vm0, %v1044_v20  ;;  %v838_v39 = vpop.f32.mrb[19].mxu0  ;;  %v2811_v40 = vpop.f32.mrb[19].mxu1  ;;  %v1757_v45 = vsel %vm288_vm0, %v1685_v26, 0.0  ;;  %v1045_v63 = vadd.f32 %v2293_v30, %v372_v37  ;;  %v1690_v3 = vmul.f32 %v1172_v28, %v1172_v28 }
 0x129   : > { %1488 = vst.msk [vmem:[%s2685_s26 + $0x24] sm:$0xf] %vm1478_vm1, %v2163_v24  ;;  %v2166_v48 = vpack.c.bf16 %v1170_v36, %v1170_v36  ;;  %v1563_v50 = vadd.f32 %v1562_v43, %v1561_v34  ;;  %v1758_v51 = vadd.f32 %v1757_v45, %v1756_v14  ;;  %v1688_v53 = vmul.f32 %v1170_v36, %v1170_v36 }
 0x12a   : > { %v1173_v49 = vld [vmem:[#allocation2 + $0x78] sm:$0xff]  ;;  %1107 = vst.msk [vmem:[#allocation2 + $0x80] sm:$0xff] %vm288_vm0, %v1042_v29  ;;  %v1566_v60 = vsel %vm288_vm0, %v1170_v36, 0.0  ;;  %1110 = vst.msk [vmem:[#allocation2 + $0x98] sm:$0xff] %vm288_vm0, %v1045_v63  ;;  %v1043_v11 = vadd.f32 %v838_v39, %v370_v57  ;;  %v1570_v25 = vsel %vm288_vm0, %v1172_v28, 0.0  ;;  %v1065_v36 = vadd.f32 %v2687_v17, %v392_v7 }
 0x12b   : > { %1493 = vst.msk [vmem:[%s2685_s26 + $0x38] sm:$0xf] %vm1478_vm1, %v2168_v35  ;;  %v2169_v54 = vpack.c.bf16 %v1173_v49, %v1173_v49  ;;  %1491 = vst.msk [vmem:[%s2685_s26 + $0x30] sm:$0xf] %vm1478_vm1, %v2166_v48  ;;  %v1760_v2 = vadd.f32 %v1759_v44, %v1758_v51  ;;  %v1565_v4 = vadd.f32 %v1564_v42, %v1563_v50  ;;  %v1763_v8 = vsel %vm288_vm0, %v1688_v53, 0.0  ;;  %v374_v35 = vld [vmem:[#allocation2 + $0xa8] sm:$0xff] }
 0x12c   : > { %v1171_v61 = vld [vmem:[#allocation2 + $0x68] sm:$0xff]  ;;  %1108 = vst.msk [vmem:[#allocation2 + $0x88] sm:$0xff] %vm288_vm0, %v1043_v11  ;;  %v1767_v39 = vsel %vm288_vm0, %v1690_v3, 0.0  ;;  %v395_v51 = vld [vmem:[#allocation2 + $0x150] sm:$0xff]  ;;  %v1572_v17 = vsel %vm288_vm0, %v1173_v49, 0.0  ;;  %1130 = vst.msk [vmem:[#allocation2 + $0x138] sm:$0xff] %vm288_vm0, %v1065_v36 }
 0x12d   : > { %1494 = vst.msk [vmem:[%s2685_s26 + $0x3c] sm:$0xf] %vm1478_vm1, %v2169_v54  ;;  %v2167_v5 = vpack.c.bf16 %v1171_v61, %v1171_v61  ;;  %v1568_v9 = vsel %vm288_vm0, %v1171_v61, 0.0  ;;  %v1689_v10 = vmul.f32 %v1171_v61, %v1171_v61  ;;  %v2296_v12 = vpop.f32.mrb[20].mxu0  ;;  %v2832_v14 = vpop.f32.mrb[20].mxu1  ;;  %v1567_v15 = vadd.f32 %v1566_v60, %v1565_v4  ;;  %v390_v50 = vld [vmem:[#allocation2 + $0x128] sm:$0xff] }
 0x12e   : > { %v1762_v16 = vadd.f32 %v1761_v58, %v1760_v2  ;;  %v1048_v19 = vadd.f32 %v2296_v12, %v375_v0  ;;  %v851_v20 = vpop.f32.mrb[21].mxu0  ;;  %v2836_v24 = vpop.f32.mrb[21].mxu1  ;;  %v1691_v54 = vmul.f32 %v1173_v49, %v1173_v49  ;;  %v393_v58 = vld [vmem:[#allocation2 + $0x140] sm:$0xff]  ;;  %v396_v60 = vld [vmem:[#allocation2 + $0x158] sm:$0xff]  ;;  %v394_v3 = vld [vmem:[#allocation2 + $0x148] sm:$0xff]  ;;  %v1068_v7 = vadd.f32 %v2720_v47, %v395_v51 }
 0x12f   : > { %1492 = vst.msk [vmem:[%s2685_s26 + $0x34] sm:$0xf] %vm1478_vm1, %v2167_v5  ;;  %v1765_v26 = vsel %vm288_vm0, %v1689_v10, 0.0  ;;  %v2840_v29 = vld [vmem:[#allocation2 + $0x90] sm:$0xff]  ;;  %v1046_v30 = vadd.f32 %v851_v20, %v373_v6  ;;  %v2297_v34 = vpop.f32.mrb[22].mxu0  ;;  %v2844_v37 = vpop.f32.mrb[22].mxu1  ;;  %v1569_v44 = vadd.f32 %v1568_v9, %v1567_v15  ;;  %v1063_v6 = vadd.f32 %v2691_v22, %v390_v50 }
 0x130   : > { %v1764_v43 = vadd.f32 %v1763_v8, %v1762_v16  ;;  %v2172_v28 = vpack.c.bf16 %v2840_v29, %v2840_v29  ;;  %1113 = vst.msk [vmem:[#allocation2 + $0xb0] sm:$0xff] %vm288_vm0, %v1048_v19  ;;  %v854_v48 = vpop.f32.mrb[23].mxu0  ;;  %v2850_v53 = vpop.f32.mrb[23].mxu1  ;;  %v1049_v0 = vadd.f32 %v2297_v34, %v376_v21  ;;  %v1694_v4 = vmul.f32 %v2840_v29, %v2840_v29  ;;  %v379_v5 = vld [vmem:[#allocation2 + $0xd0] sm:$0xff] }
 0x131   : > { %v1174_v45 = vld [vmem:[#allocation2 + $0x80] sm:$0xff]  ;;  %1111 = vst.msk [vmem:[#allocation2 + $0xa0] sm:$0xff] %vm288_vm0, %v1046_v30  ;;  %v1571_v61 = vadd.f32 %v1570_v25, %v1569_v44  ;;  %v1047_v2 = vadd.f32 %v854_v48, %v374_v35  ;;  %v399_v8 = vld [vmem:[#allocation2 + $0x170] sm:$0xff]  ;;  %v1177_v11 = vld [vmem:[#allocation2 + $0x98] sm:$0xff]  ;;  %v1066_v12 = vadd.f32 %v2724_v52, %v393_v58  ;;  %v1069_v15 = vadd.f32 %v2732_v59, %v396_v60 }
 0x132   : > { %v2170_v57 = vpack.c.bf16 %v1174_v45, %v1174_v45  ;;  %v1692_v42 = vmul.f32 %v1174_v45, %v1174_v45  ;;  %v1766_v63 = vadd.f32 %v1765_v26, %v1764_v43  ;;  %1497 = vst.msk [vmem:[%s2685_s26 + $0x48] sm:$0xf] %vm1478_vm1, %v2172_v28  ;;  %v1574_v49 = vsel %vm288_vm0, %v1174_v45, 0.0  ;;  %v377_v59 = vld [vmem:[#allocation2 + $0xc0] sm:$0xff]  ;;  %v380_v45 = vld [vmem:[#allocation2 + $0xd8] sm:$0xff] }
 0x133   : > { %v1573_v10 = vadd.f32 %v1572_v17, %v1571_v61  ;;  %1114 = vst.msk [vmem:[#allocation2 + $0xb8] sm:$0xff] %vm288_vm0, %v1049_v0  ;;  %1112 = vst.msk [vmem:[#allocation2 + $0xa8] sm:$0xff] %vm288_vm0, %v1047_v2  ;;  %v1769_v16 = vsel %vm288_vm0, %v1691_v54, 0.0  ;;  %v2173_v20 = vpack.c.bf16 %v1177_v11, %v1177_v11  ;;  %v1067_v47 = vadd.f32 %v2735_v1, %v394_v3  ;;  %v1175_v52 = vld [vmem:[#allocation2 + $0x88] sm:$0xff]  ;;  %v2894_v58 = vld [vmem:[#allocation2 + $0x138] sm:$0xff] }
 0x134   : > { %1495 = vst.msk [vmem:[%s2685_s26 + $0x40] sm:$0xf] %vm1478_vm1, %v2170_v57  ;;  %v1768_v9 = vadd.f32 %v1767_v39, %v1766_v63  ;;  %v1771_v19 = vsel %vm288_vm0, %v1692_v42, 0.0  ;;  %v1072_v35 = vadd.f32 %v2755_v32, %v399_v8  ;;  %v1578_v39 = vsel %vm288_vm0, %v2840_v29, 0.0  ;;  %v378_v57 = vld [vmem:[#allocation2 + $0xc8] sm:$0xff] }
 0x135   : > { %v2300_v22 = vpop.f32.mrb[24].mxu0  ;;  %1128 = vst.msk [vmem:[#allocation2 + $0x128] sm:$0xff] %vm288_vm0, %v1063_v6  ;;  %1133 = vst.msk [vmem:[#allocation2 + $0x150] sm:$0xff] %vm288_vm0, %v1068_v7  ;;  %v2873_v21 = vpop.f32.mrb[24].mxu1  ;;  %v1575_v25 = vadd.f32 %v1574_v49, %v1573_v10  ;;  %v2171_v1 = vpack.c.bf16 %v1175_v52, %v1175_v52  ;;  %v1576_v43 = vsel %vm288_vm0, %v1175_v52, 0.0  ;;  %v1693_v44 = vmul.f32 %v1175_v52, %v1175_v52 }
 0x136   : > { %v1770_v26 = vadd.f32 %v1769_v16, %v1768_v9  ;;  %v1052_v30 = vadd.f32 %v2300_v22, %v379_v5  ;;  %v867_v34 = vpop.f32.mrb[25].mxu0  ;;  %1131 = vst.msk [vmem:[#allocation2 + $0x140] sm:$0xff] %vm288_vm0, %v1066_v12  ;;  %1134 = vst.msk [vmem:[#allocation2 + $0x158] sm:$0xff] %vm288_vm0, %v1069_v15  ;;  %v2878_v36 = vpop.f32.mrb[25].mxu1  ;;  %v1775_v32 = vsel %vm288_vm0, %v1694_v4, 0.0  ;;  %v1580_v61 = vsel %vm288_vm0, %v1177_v11, 0.0 }
 0x137   : > { %1498 = vst.msk [vmem:[%s2685_s26 + $0x4c] sm:$0xf] %vm1478_vm1, %v2173_v20  ;;  %v2885_v28 = vld [vmem:[#allocation2 + $0xb0] sm:$0xff]  ;;  %v2301_v48 = vpop.f32.mrb[26].mxu0  ;;  %v2888_v50 = vpop.f32.mrb[26].mxu1  ;;  %v1577_v17 = vadd.f32 %v1576_v43, %v1575_v25  ;;  %v1695_v63 = vmul.f32 %v1177_v11, %v1177_v11  ;;  %v1773_v0 = vsel %vm288_vm0, %v1693_v44, 0.0  ;;  %v1050_v5 = vadd.f32 %v867_v34, %v377_v59 }
 0x138   : > { %1132 = vst.msk [vmem:[#allocation2 + $0x148] sm:$0xff] %vm288_vm0, %v1067_v47  ;;  %v1772_v51 = vadd.f32 %v1771_v19, %v1770_v26  ;;  %v2176_v29 = vpack.c.bf16 %v2885_v28, %v2885_v28  ;;  %v1178_v54 = vld [vmem:[#allocation2 + $0xa0] sm:$0xff]  ;;  %1117 = vst.msk [vmem:[#allocation2 + $0xd0] sm:$0xff] %vm288_vm0, %v1052_v30  ;;  %v870_v42 = vpop.f32.mrb[27].mxu0  ;;  %v2897_v60 = vpop.f32.mrb[27].mxu1  ;;  %v1053_v9 = vadd.f32 %v2301_v48, %v380_v45  ;;  %v383_v11 = vld [vmem:[#allocation2 + $0xf0] sm:$0xff] }
 0x139   : > { %1137 = vst.msk [vmem:[#allocation2 + $0x170] sm:$0xff] %vm288_vm0, %v1072_v35  ;;  %v2174_v2 = vpack.c.bf16 %v1178_v54, %v1178_v54  ;;  %v1579_v3 = vadd.f32 %v1578_v39, %v1577_v17  ;;  %v1696_v49 = vmul.f32 %v1178_v54, %v1178_v54  ;;  %v1582_v6 = vsel %vm288_vm0, %v1178_v54, 0.0  ;;  %1115 = vst.msk [vmem:[#allocation2 + $0xc0] sm:$0xff] %vm288_vm0, %v1050_v5  ;;  %v381_v20 = vld [vmem:[#allocation2 + $0xe0] sm:$0xff]  ;;  %v384_v43 = vld [vmem:[#allocation2 + $0xf8] sm:$0xff] }
 0x13a   : > { %1496 = vst.msk [vmem:[%s2685_s26 + $0x44] sm:$0xf] %vm1478_vm1, %v2171_v1  ;;  %v1774_v4 = vadd.f32 %v1773_v0, %v1772_v51  ;;  %1501 = vst.msk [vmem:[%s2685_s26 + $0x58] sm:$0xf] %vm1478_vm1, %v2176_v29  ;;  %v1181_v7 = vld [vmem:[#allocation2 + $0xb8] sm:$0xff]  ;;  %v1179_v8 = vld [vmem:[#allocation2 + $0xa8] sm:$0xff]  ;;  %v1051_v10 = vadd.f32 %v870_v42, %v378_v57  ;;  %v2193_v12 = vpack.c.bf16 %v2894_v58, %v2894_v58 }
 0x13b   : > { %1499 = vst.msk [vmem:[%s2685_s26 + $0x50] sm:$0xf] %vm1478_vm1, %v2174_v2  ;;  %v1581_v16 = vadd.f32 %v1580_v61, %v1579_v3  ;;  %v2177_v19 = vpack.c.bf16 %v1181_v7, %v1181_v7  ;;  %v1777_v22 = vsel %vm288_vm0, %v1695_v63, 0.0  ;;  %v1779_v47 = vsel %vm288_vm0, %v1696_v49, 0.0  ;;  %v382_v44 = vld [vmem:[#allocation2 + $0xe8] sm:$0xff] }
 0x13c   : > { %v1776_v15 = vadd.f32 %v1775_v32, %v1774_v4  ;;  %v2175_v25 = vpack.c.bf16 %v1179_v8, %v1179_v8  ;;  %v1584_v26 = vsel %vm288_vm0, %v1179_v8, 0.0  ;;  %1118 = vst.msk [vmem:[#allocation2 + $0xd8] sm:$0xff] %vm288_vm0, %v1053_v9  ;;  %1116 = vst.msk [vmem:[#allocation2 + $0xc8] sm:$0xff] %vm288_vm0, %v1051_v10  ;;  %v1697_v35 = vmul.f32 %v1179_v8, %v1179_v8  ;;  %v2928_v29 = vld [vmem:[#allocation2 + $0x128] sm:$0xff]  ;;  %v2934_v2 = vld [vmem:[#allocation2 + $0x150] sm:$0xff] }
 0x13d   : > { %v2304_v52 = vpop.f32.mrb[28].mxu0  ;;  %1518 = vst.msk [vmem:[%s2685_s26 + $0x9c] sm:$0xf] %vm1478_vm1, %v2193_v12  ;;  %v2918_v30 = vpop.f32.mrb[28].mxu1  ;;  %v1583_v59 = vadd.f32 %v1582_v6, %v1581_v16  ;;  %1502 = vst.msk [vmem:[%s2685_s26 + $0x5c] sm:$0xf] %vm1478_vm1, %v2177_v19  ;;  %v1698_v48 = vmul.f32 %v2885_v28, %v2885_v28  ;;  %v1699_v49 = vmul.f32 %v1181_v7, %v1181_v7 }
 0x13e   : > { %v1778_v34 = vadd.f32 %v1777_v22, %v1776_v15  ;;  %v1056_v39 = vadd.f32 %v2304_v52, %v383_v11  ;;  %v883_v1 = vpop.f32.mrb[29].mxu0  ;;  %v2922_v45 = vpop.f32.mrb[29].mxu1  ;;  %1500 = vst.msk [vmem:[%s2685_s26 + $0x54] sm:$0xf] %vm1478_vm1, %v2175_v25  ;;  %v1781_v61 = vsel %vm288_vm0, %v1697_v35, 0.0  ;;  %v1586_v4 = vsel %vm288_vm0, %v2885_v28, 0.0 }
 0x13f   : > { %v1184_v32 = vld [vmem:[#allocation2 + $0xd0] sm:$0xff]  ;;  %v1054_v51 = vadd.f32 %v883_v1, %v381_v20  ;;  %v2305_v17 = vpop.f32.mrb[30].mxu0  ;;  %v2930_v54 = vpop.f32.mrb[30].mxu1  ;;  %v1585_v42 = vadd.f32 %v1584_v26, %v1583_v59  ;;  %v2191_v10 = vpack.c.bf16 %v2928_v29, %v2928_v29  ;;  %v1783_v11 = vsel %vm288_vm0, %v1698_v48, 0.0 }
 0x140   : > { %v1780_v57 = vadd.f32 %v1779_v47, %v1778_v34  ;;  %v2180_v63 = vpack.c.bf16 %v1184_v32, %v1184_v32  ;;  %1121 = vst.msk [vmem:[#allocation2 + $0xf0] sm:$0xff] %vm288_vm0, %v1056_v39  ;;  %v886_v0 = vpop.f32.mrb[31].mxu0  ;;  %v2936_v3 = vpop.f32.mrb[31].mxu1  ;;  %v1057_v5 = vadd.f32 %v2305_v17, %v384_v43  ;;  %v1588_v12 = vsel %vm288_vm0, %v1181_v7, 0.0  ;;  %v1182_v28 = vld [vmem:[#allocation2 + $0xc0] sm:$0xff] }
 0x141   : > { %1119 = vst.msk [vmem:[#allocation2 + $0xe0] sm:$0xff] %vm288_vm0, %v1054_v51  ;;  %v1055_v6 = vadd.f32 %v886_v0, %v382_v44  ;;  %v1587_v8 = vadd.f32 %v1586_v4, %v1585_v42  ;;  %v2196_v15 = vpack.c.bf16 %v2934_v2, %v2934_v2  ;;  %v2178_v19 = vpack.c.bf16 %v1182_v28, %v1182_v28 }
 0x142   : > { %v1782_v9 = vadd.f32 %v1781_v61, %v1780_v57  ;;  %1505 = vst.msk [vmem:[%s2685_s26 + $0x68] sm:$0xf] %vm1478_vm1, %v2180_v63  ;;  %v1590_v22 = vsel %vm288_vm0, %v1182_v28, 0.0  ;;  %1516 = vst.msk [vmem:[%s2685_s26 + $0x94] sm:$0xf] %vm1478_vm1, %v2191_v10  ;;  %v1785_v7 = vsel %vm288_vm0, %v1699_v49, 0.0  ;;  %v1700_v26 = vmul.f32 %v1182_v28, %v1182_v28 }
 0x143   : > { %1122 = vst.msk [vmem:[#allocation2 + $0xf8] sm:$0xff] %vm288_vm0, %v1057_v5  ;;  %1120 = vst.msk [vmem:[#allocation2 + $0xe8] sm:$0xff] %vm288_vm0, %v1055_v6  ;;  %v1589_v20 = vadd.f32 %v1588_v12, %v1587_v8  ;;  %v1185_v47 = vld [vmem:[#allocation2 + $0xd8] sm:$0xff]  ;;  %v1183_v25 = vld [vmem:[#allocation2 + $0xc8] sm:$0xff]  ;;  %v1702_v1 = vmul.f32 %v1184_v32, %v1184_v32  ;;  %v2967_v61 = vsel %vm288_vm0, %v2694_v27, 0.0  ;;  %v1594_v63 = vsel %vm288_vm0, %v1184_v32, 0.0 }
 0x144   : > { %v1784_v16 = vadd.f32 %v1783_v11, %v1782_v9  ;;  %v2181_v52 = vpack.c.bf16 %v1185_v47, %v1185_v47  ;;  %1521 = vst.msk [vmem:[%s2685_s26 + $0xa8] sm:$0xf] %vm1478_vm1, %v2196_v15  ;;  %1503 = vst.msk [vmem:[%s2685_s26 + $0x60] sm:$0xf] %vm1478_vm1, %v2178_v19  ;;  %v2179_v35 = vpack.c.bf16 %v1183_v25, %v1183_v25  ;;  %v1592_v39 = vsel %vm288_vm0, %v1183_v25, 0.0 }
 0x145   : > { %v1591_v59 = vadd.f32 %v1590_v22, %v1589_v20  ;;  %v1787_v43 = vsel %vm288_vm0, %v1700_v26, 0.0  ;;  %v1701_v44 = vmul.f32 %v1183_v25, %v1183_v25  ;;  %v1703_v0 = vmul.f32 %v1185_v47, %v1185_v47 }
 0x146   : > { %v1786_v34 = vadd.f32 %v1785_v7, %v1784_v16  ;;  %1506 = vst.msk [vmem:[%s2685_s26 + $0x6c] sm:$0xf] %vm1478_vm1, %v2181_v52  ;;  %1504 = vst.msk [vmem:[%s2685_s26 + $0x64] sm:$0xf] %vm1478_vm1, %v2179_v35  ;;  %v2975_v11 = vmul.f32 %v2694_v27, %v2694_v27  ;;  %v1791_v12 = vsel %vm288_vm0, %v1702_v1, 0.0  ;;  %v1596_v32 = vsel %vm288_vm0, %v1185_v47, 0.0 }
 0x147   : > { %v1188_v48 = vld [vmem:[#allocation2 + $0xf0] sm:$0xff]  ;;  %v1593_v17 = vadd.f32 %v1592_v39, %v1591_v59  ;;  %v1789_v4 = vsel %vm288_vm0, %v1701_v44, 0.0  ;;  %v2982_v16 = vld [vmem:[#allocation2 + $0x140] sm:$0xff]  ;;  %v1708_v25 = vmul.f32 %v2700_v31, %v2700_v31  ;;  %v2986_v27 = vld [vmem:[#allocation2 + $0x158] sm:$0xff]  ;;  %v1793_v7 = vsel %vm288_vm0, %v1703_v0, 0.0 }
 0x148   : > { %v1788_v51 = vadd.f32 %v1787_v43, %v1786_v34  ;;  %v2184_v57 = vpack.c.bf16 %v1188_v48, %v1188_v48  ;;  %v1186_v42 = vld [vmem:[#allocation2 + $0xe0] sm:$0xff]  ;;  %v1709_v35 = vmul.f32 %v2747_v18, %v2747_v18  ;;  %v2194_v39 = vpack.c.bf16 %v2982_v16, %v2982_v16  ;;  %v2999_v1 = vld [vmem:[#allocation2 + $0x148] sm:$0xff] }
 0x149   : > { %v2182_v49 = vpack.c.bf16 %v1186_v42, %v1186_v42  ;;  %v1595_v5 = vadd.f32 %v1594_v63, %v1593_v17  ;;  %v1704_v8 = vmul.f32 %v1186_v42, %v1186_v42  ;;  %v1598_v28 = vsel %vm288_vm0, %v1186_v42, 0.0 }
 0x14a   : > { %v1790_v6 = vadd.f32 %v1789_v4, %v1788_v51  ;;  %1509 = vst.msk [vmem:[%s2685_s26 + $0x78] sm:$0xf] %vm1478_vm1, %v2184_v57  ;;  %v1189_v9 = vld [vmem:[#allocation2 + $0xf8] sm:$0xff]  ;;  %v1187_v10 = vld [vmem:[#allocation2 + $0xe8] sm:$0xff]  ;;  %v1706_v43 = vmul.f32 %v1188_v48, %v1188_v48  ;;  %v1606_v51 = vsel %vm288_vm0, %v2700_v31, 0.0  ;;  %v2197_v17 = vpack.c.bf16 %v2986_v27, %v2986_v27  ;;  %v3006_v57 = vld [vmem:[#allocation2 + $0x170] sm:$0xff] }
 0x14b   : > { %1507 = vst.msk [vmem:[%s2685_s26 + $0x70] sm:$0xf] %vm1478_vm1, %v2182_v49  ;;  %v2185_v15 = vpack.c.bf16 %v1189_v9, %v1189_v9  ;;  %v1597_v20 = vadd.f32 %v1596_v32, %v1595_v5  ;;  %v2183_v22 = vpack.c.bf16 %v1187_v10, %v1187_v10  ;;  %v1795_v47 = vsel %vm288_vm0, %v1704_v8, 0.0  ;;  %1519 = vst.msk [vmem:[%s2685_s26 + $0xa0] sm:$0xf] %vm1478_vm1, %v2194_v39  ;;  %v397_v49 = vld [vmem:[#allocation2 + $0x160] sm:$0xff] }
 0x14c   : > { %v1792_v19 = vadd.f32 %v1791_v12, %v1790_v6  ;;  %v1600_v26 = vsel %vm288_vm0, %v1187_v10, 0.0  ;;  %v1705_v52 = vmul.f32 %v1187_v10, %v1187_v10  ;;  %v1803_v0 = vsel %vm288_vm0, %v1708_v25, 0.0  ;;  %1522 = vst.msk [vmem:[%s2685_s26 + $0xac] sm:$0xf] %vm1478_vm1, %v2197_v17  ;;  %v400_v10 = vld [vmem:[#allocation2 + $0x178] sm:$0xff]  ;;  %v398_v12 = vld [vmem:[#allocation2 + $0x168] sm:$0xff] }
 0x14d   : > { %1510 = vst.msk [vmem:[%s2685_s26 + $0x7c] sm:$0xf] %vm1478_vm1, %v2185_v15  ;;  %v1599_v59 = vadd.f32 %v1598_v28, %v1597_v20  ;;  %1508 = vst.msk [vmem:[%s2685_s26 + $0x74] sm:$0xf] %vm1478_vm1, %v2183_v22  ;;  %v3011_v4 = vmul.f32 %v2712_v41, %v2712_v41  ;;  %v1602_v5 = vsel %vm288_vm0, %v1188_v48, 0.0  ;;  %v1707_v6 = vmul.f32 %v1189_v9, %v1189_v9  ;;  %v401_v20 = vld [vmem:[#allocation2 + $0x180] sm:$0xff] }
 0x14e   : > { %v1794_v34 = vadd.f32 %v1793_v7, %v1792_v19  ;;  %v1797_v44 = vsel %vm288_vm0, %v1705_v52, 0.0  ;;  %v1608_v31 = vsel %vm288_vm0, %v2747_v18, 0.0  ;;  %v2195_v8 = vpack.c.bf16 %v2999_v1, %v2999_v1  ;;  %v403_v19 = vld [vmem:[#allocation2 + $0x190] sm:$0xff]  ;;  %v404_v22 = vld [vmem:[#allocation2 + $0x198] sm:$0xff] }
 0x14f   : > { %v1601_v63 = vadd.f32 %v1600_v26, %v1599_v59  ;;  %v1805_v15 = vsel %vm288_vm0, %v1709_v35, 0.0  ;;  %v2200_v48 = vpack.c.bf16 %v3006_v57, %v3006_v57  ;;  %v1799_v18 = vsel %vm288_vm0, %v1706_v43, 0.0  ;;  %v402_v26 = vld [vmem:[#allocation2 + $0x188] sm:$0xff]  ;;  %v407_v52 = vld [vmem:[#allocation2 + $0x1b0] sm:$0xff]  ;;  %v405_v59 = vld [vmem:[#allocation2 + $0x1a0] sm:$0xff] }
 0x150   : > { %v1796_v42 = vadd.f32 %v1795_v47, %v1794_v34  ;;  %v1604_v25 = vsel %vm288_vm0, %v1189_v9, 0.0  ;;  %v3029_v7 = vmul.f32 %v2781_v62, %v2781_v62  ;;  %1520 = vst.msk [vmem:[%s2685_s26 + $0xa4] sm:$0xf] %vm1478_vm1, %v2195_v8  ;;  %v1070_v47 = vadd.f32 %v2761_v38, %v397_v49  ;;  %v408_v9 = vld [vmem:[#allocation2 + $0x1b8] sm:$0xff]  ;;  %v411_v17 = vld [vmem:[#allocation2 + $0x1d0] sm:$0xff] }
 0x151   : > { %v1603_v32 = vadd.f32 %v1602_v5, %v1601_v63  ;;  %1525 = vst.msk [vmem:[%s2685_s26 + $0xb8] sm:$0xf] %vm1478_vm1, %v2200_v48  ;;  %v1073_v39 = vadd.f32 %v2766_v46, %v400_v10  ;;  %v1071_v43 = vadd.f32 %v2777_v56, %v398_v12  ;;  %v1076_v38 = vadd.f32 %v2799_v13, %v403_v19  ;;  %v409_v5 = vld [vmem:[#allocation2 + $0x1c0] sm:$0xff]  ;;  %v412_v8 = vld [vmem:[#allocation2 + $0x1d8] sm:$0xff]  ;;  %v415_v10 = vld [vmem:[#allocation2 + $0x1f0] sm:$0xff] }
 0x152   : > { %v1798_v28 = vadd.f32 %v1797_v44, %v1796_v42  ;;  %v406_v44 = vld [vmem:[#allocation2 + $0x1a8] sm:$0xff]  ;;  %v1801_v42 = vsel %vm288_vm0, %v1707_v6, 0.0  ;;  %1135 = vst.msk [vmem:[#allocation2 + $0x160] sm:$0xff] %vm288_vm0, %v1070_v47  ;;  %v1074_v63 = vadd.f32 %v2803_v23, %v401_v20  ;;  %v1077_v49 = vadd.f32 %v2806_v33, %v404_v22  ;;  %v413_v12 = vld [vmem:[#allocation2 + $0x1e0] sm:$0xff]  ;;  %v416_v13 = vld [vmem:[#allocation2 + $0x1f8] sm:$0xff] }
 0x153   : > { %v1605_v35 = vadd.f32 %v1604_v25, %v1603_v32  ;;  %v410_v32 = vld [vmem:[#allocation2 + $0x1c8] sm:$0xff]  ;;  %1138 = vst.msk [vmem:[#allocation2 + $0x178] sm:$0xff] %vm288_vm0, %v1073_v39  ;;  %1136 = vst.msk [vmem:[#allocation2 + $0x168] sm:$0xff] %vm288_vm0, %v1071_v43  ;;  %v1075_v56 = vadd.f32 %v2811_v40, %v402_v26  ;;  %v1080_v6 = vadd.f32 %v2832_v14, %v407_v52 }
 0x154   : > { %v1800_v34 = vadd.f32 %v1799_v18, %v1798_v28  ;;  %1141 = vst.msk [vmem:[#allocation2 + $0x190] sm:$0xff] %vm288_vm0, %v1076_v38  ;;  %1139 = vst.msk [vmem:[#allocation2 + $0x180] sm:$0xff] %vm288_vm0, %v1074_v63  ;;  %v1078_v23 = vadd.f32 %v2836_v24, %v405_v59  ;;  %v1081_v33 = vadd.f32 %v2844_v37, %v408_v9  ;;  %v414_v40 = vld [vmem:[#allocation2 + $0x1e8] sm:$0xff]  ;;  %v1616_v59 = vsel %vm288_vm0, %v2928_v29, 0.0 }
 0x155   : > { %v1607_v28 = vadd.f32 %v1606_v51, %v1605_v35  ;;  %1142 = vst.msk [vmem:[#allocation2 + $0x198] sm:$0xff] %vm288_vm0, %v1077_v49  ;;  %v1079_v51 = vadd.f32 %v2850_v53, %v406_v44  ;;  %v1084_v48 = vadd.f32 %v2873_v21, %v411_v17  ;;  %1140 = vst.msk [vmem:[#allocation2 + $0x188] sm:$0xff] %vm288_vm0, %v1075_v56  ;;  %v1618_v35 = vsel %vm288_vm0, %v2775_v55, 0.0 }
 0x156   : > { %v1802_v46 = vadd.f32 %v1801_v42, %v1800_v34  ;;  %1145 = vst.msk [vmem:[#allocation2 + $0x1b0] sm:$0xff] %vm288_vm0, %v1080_v6  ;;  %v1082_v20 = vadd.f32 %v2878_v36, %v409_v5  ;;  %v1085_v22 = vadd.f32 %v2888_v50, %v412_v8  ;;  %1143 = vst.msk [vmem:[#allocation2 + $0x1a0] sm:$0xff] %vm288_vm0, %v1078_v23 }
 0x157   : > { %v1609_v14 = vadd.f32 %v1608_v31, %v1607_v28  ;;  %1146 = vst.msk [vmem:[#allocation2 + $0x1b8] sm:$0xff] %vm288_vm0, %v1081_v33  ;;  %1144 = vst.msk [vmem:[#allocation2 + $0x1a8] sm:$0xff] %vm288_vm0, %v1079_v51  ;;  %v1083_v24 = vadd.f32 %v2897_v60, %v410_v32  ;;  %v1088_v37 = vadd.f32 %v2918_v30, %v415_v10  ;;  %v1807_v31 = vsel %vm288_vm0, %v2975_v11, 0.0 }
 0x158   : > { %v1804_v19 = vadd.f32 %v1803_v0, %v1802_v46  ;;  %1149 = vst.msk [vmem:[#allocation2 + $0x1d0] sm:$0xff] %vm288_vm0, %v1084_v48  ;;  %v1086_v53 = vadd.f32 %v2922_v45, %v413_v12  ;;  %v1089_v21 = vadd.f32 %v2930_v54, %v416_v13  ;;  %1147 = vst.msk [vmem:[#allocation2 + $0x1c0] sm:$0xff] %vm288_vm0, %v1082_v20  ;;  %v1612_v60 = vsel %vm288_vm0, %v2712_v41, 0.0 }
 0x159   : > { %v1611_v36 = vadd.f32 %v2967_v61, %v1609_v14  ;;  %1150 = vst.msk [vmem:[#allocation2 + $0x1d8] sm:$0xff] %vm288_vm0, %v1085_v22  ;;  %v1087_v50 = vadd.f32 %v2936_v3, %v414_v40  ;;  %v1614_v30 = vsel %vm288_vm0, %v2781_v62, 0.0  ;;  %1148 = vst.msk [vmem:[#allocation2 + $0x1c8] sm:$0xff] %vm288_vm0, %v1083_v24  ;;  %v3080_v3 = vld [vmem:[#allocation2 + $0x160] sm:$0xff]  ;;  %v1809_v41 = vsel %vm288_vm0, %v3011_v4, 0.0 }
 0x15a   : > { %v1806_v0 = vadd.f32 %v1805_v15, %v1804_v19  ;;  %1153 = vst.msk [vmem:[#allocation2 + $0x1f0] sm:$0xff] %vm288_vm0, %v1088_v37  ;;  %1151 = vst.msk [vmem:[#allocation2 + $0x1e0] sm:$0xff] %vm288_vm0, %v1086_v53  ;;  %v1811_v62 = vsel %vm288_vm0, %v3029_v7, 0.0  ;;  %v1713_v61 = vmul.f32 %v2928_v29, %v2928_v29  ;;  %v2198_v11 = vpack.c.bf16 %v3080_v3, %v3080_v3  ;;  %v3091_v15 = vld [vmem:[#allocation2 + $0x178] sm:$0xff]  ;;  %v3093_v18 = vld [vmem:[#allocation2 + $0x168] sm:$0xff] }
 0x15b   : > { %1154 = vst.msk [vmem:[#allocation2 + $0x1f8] sm:$0xff] %vm288_vm0, %v1089_v21  ;;  %v1613_v54 = vadd.f32 %v1612_v60, %v1611_v36  ;;  %1152 = vst.msk [vmem:[#allocation2 + $0x1e8] sm:$0xff] %vm288_vm0, %v1087_v50  ;;  %v2201_v26 = vpack.c.bf16 %v3091_v15, %v3091_v15  ;;  %v3097_v4 = vld [vmem:[#allocation2 + $0x190] sm:$0xff]  ;;  %v3099_v7 = vld [vmem:[#allocation2 + $0x180] sm:$0xff]  ;;  %v1714_v52 = vmul.f32 %v2775_v55, %v2775_v55  ;;  %v1620_v32 = vsel %vm288_vm0, %v2894_v58, 0.0 }
 0x15c   : > { %v1808_v45 = vadd.f32 %v1807_v31, %v1806_v0  ;;  %1523 = vst.msk [vmem:[%s2685_s26 + $0xb0] sm:$0xf] %vm1478_vm1, %v2198_v11  ;;  %v2199_v34 = vpack.c.bf16 %v3093_v18, %v3093_v18  ;;  %v2204_v9 = vpack.c.bf16 %v3097_v4, %v3097_v4  ;;  %v3115_v44 = vld [vmem:[#allocation2 + $0x198] sm:$0xff]  ;;  %v1715_v29 = vmul.f32 %v2894_v58, %v2894_v58  ;;  %v3126_v38 = vld [vmem:[#allocation2 + $0x188] sm:$0xff] }
 0x15d   : > { %v1615_v25 = vadd.f32 %v1614_v30, %v1613_v54  ;;  %1526 = vst.msk [vmem:[%s2685_s26 + $0xbc] sm:$0xf] %vm1478_vm1, %v2201_v26  ;;  %v1813_v17 = vsel %vm288_vm0, %v1713_v61, 0.0  ;;  %v1716_v42 = vmul.f32 %v2982_v16, %v2982_v16  ;;  %v2202_v55 = vpack.c.bf16 %v3099_v7, %v3099_v7  ;;  %v3130_v5 = vld [vmem:[#allocation2 + $0x1b0] sm:$0xff]  ;;  %v3143_v12 = vld [vmem:[#allocation2 + $0x1a0] sm:$0xff] }
 0x15e   : > { %v1810_v47 = vadd.f32 %v1809_v41, %v1808_v45  ;;  %1524 = vst.msk [vmem:[%s2685_s26 + $0xb4] sm:$0xf] %vm1478_vm1, %v2199_v34  ;;  %1529 = vst.msk [vmem:[%s2685_s26 + $0xc8] sm:$0xf] %vm1478_vm1, %v2204_v9  ;;  %v1815_v8 = vsel %vm288_vm0, %v1714_v52, 0.0  ;;  %v1622_v28 = vsel %vm288_vm0, %v2982_v16, 0.0  ;;  %v2205_v46 = vpack.c.bf16 %v3115_v44, %v3115_v44 }
 0x15f   : > { %v1617_v43 = vadd.f32 %v1616_v59, %v1615_v25  ;;  %1527 = vst.msk [vmem:[%s2685_s26 + $0xc0] sm:$0xf] %vm1478_vm1, %v2202_v55  ;;  %v2203_v10 = vpack.c.bf16 %v3126_v38, %v3126_v38  ;;  %v1817_v13 = vsel %vm288_vm0, %v1715_v29, 0.0  ;;  %v1819_v58 = vsel %vm288_vm0, %v1716_v42, 0.0  ;;  %v3153_v33 = vld [vmem:[#allocation2 + $0x1b8] sm:$0xff]  ;;  %v3157_v40 = vld [vmem:[#allocation2 + $0x1a8] sm:$0xff] }
 0x160   : > { %v1812_v39 = vadd.f32 %v1811_v62, %v1810_v47  ;;  %v1717_v16 = vmul.f32 %v2999_v1, %v2999_v1  ;;  %1530 = vst.msk [vmem:[%s2685_s26 + $0xcc] sm:$0xf] %vm1478_vm1, %v2205_v46  ;;  %v2208_v23 = vpack.c.bf16 %v3130_v5, %v3130_v5  ;;  %v1718_v19 = vmul.f32 %v2934_v2, %v2934_v2  ;;  %v3171_v21 = vld [vmem:[#allocation2 + $0x1d0] sm:$0xff]  ;;  %v3182_v50 = vld [vmem:[#allocation2 + $0x1c0] sm:$0xff]  ;;  %v3186_v30 = vld [vmem:[#allocation2 + $0x1d8] sm:$0xff] }
 0x161   : > { %v1619_v63 = vadd.f32 %v1618_v35, %v1617_v43  ;;  %1528 = vst.msk [vmem:[%s2685_s26 + $0xc4] sm:$0xf] %vm1478_vm1, %v2203_v10  ;;  %v1624_v14 = vsel %vm288_vm0, %v2999_v1, 0.0  ;;  %v2206_v20 = vpack.c.bf16 %v3143_v12, %v3143_v12  ;;  %v1626_v22 = vsel %vm288_vm0, %v2934_v2, 0.0  ;;  %v3199_v47 = vld [vmem:[#allocation2 + $0x1c8] sm:$0xff]  ;;  %v3209_v59 = vld [vmem:[#allocation2 + $0x1f0] sm:$0xff] }
 0x162   : > { %v1814_v49 = vadd.f32 %v1813_v17, %v1812_v39  ;;  %1533 = vst.msk [vmem:[%s2685_s26 + $0xd8] sm:$0xf] %vm1478_vm1, %v2208_v23  ;;  %v2209_v53 = vpack.c.bf16 %v3153_v33, %v3153_v33  ;;  %v1719_v1 = vmul.f32 %v2986_v27, %v2986_v27  ;;  %v1821_v36 = vsel %vm288_vm0, %v1717_v16, 0.0  ;;  %v3213_v39 = vld [vmem:[#allocation2 + $0x1e0] sm:$0xff] }
 0x163   : > { %v1621_v6 = vadd.f32 %v1620_v32, %v1619_v63  ;;  %v1720_v0 = vmul.f32 %v3080_v3, %v3080_v3  ;;  %1531 = vst.msk [vmem:[%s2685_s26 + $0xd0] sm:$0xf] %vm1478_vm1, %v2206_v20  ;;  %v2207_v2 = vpack.c.bf16 %v3157_v40, %v3157_v40  ;;  %v1823_v45 = vsel %vm288_vm0, %v1718_v19, 0.0 }
 0x164   : > { %v1816_v56 = vadd.f32 %v1815_v8, %v1814_v49  ;;  %1534 = vst.msk [vmem:[%s2685_s26 + $0xdc] sm:$0xf] %vm1478_vm1, %v2209_v53  ;;  %v1628_v54 = vsel %vm288_vm0, %v2986_v27, 0.0  ;;  %v1630_v41 = vsel %vm288_vm0, %v3080_v3, 0.0  ;;  %v2212_v62 = vpack.c.bf16 %v3171_v21, %v3171_v21  ;;  %v3227_v49 = vld [vmem:[#allocation2 + $0x1f8] sm:$0xff] }
 0x165   : > { %v1623_v51 = vadd.f32 %v1622_v28, %v1621_v6  ;;  %1532 = vst.msk [vmem:[%s2685_s26 + $0xd4] sm:$0xf] %vm1478_vm1, %v2207_v2  ;;  %v2210_v25 = vpack.c.bf16 %v3182_v50, %v3182_v50  ;;  %v1825_v26 = vsel %vm288_vm0, %v1719_v1, 0.0  ;;  %v1827_v27 = vsel %vm288_vm0, %v1720_v0, 0.0  ;;  %v3238_v28 = vld [vmem:[#allocation2 + $0x1e8] sm:$0xff] }
 0x166   : > { %v1818_v48 = vadd.f32 %v1817_v13, %v1816_v56  ;;  %v1721_v3 = vmul.f32 %v3093_v18, %v3093_v18  ;;  %1537 = vst.msk [vmem:[%s2685_s26 + $0xe8] sm:$0xf] %vm1478_vm1, %v2212_v62  ;;  %v2213_v52 = vpack.c.bf16 %v3186_v30, %v3186_v30  ;;  %v1722_v43 = vmul.f32 %v3006_v57, %v3006_v57 }
 0x167   : > { %v1625_v37 = vadd.f32 %v1624_v14, %v1623_v51  ;;  %1535 = vst.msk [vmem:[%s2685_s26 + $0xe0] sm:$0xf] %vm1478_vm1, %v2210_v25  ;;  %v1632_v9 = vsel %vm288_vm0, %v3093_v18, 0.0  ;;  %v2211_v29 = vpack.c.bf16 %v3199_v47, %v3199_v47  ;;  %v1634_v17 = vsel %vm288_vm0, %v3006_v57, 0.0 }
 0x168   : > { %v1820_v24 = vadd.f32 %v1819_v58, %v1818_v48  ;;  %1538 = vst.msk [vmem:[%s2685_s26 + $0xec] sm:$0xf] %vm1478_vm1, %v2213_v52  ;;  %v2216_v63 = vpack.c.bf16 %v3209_v59, %v3209_v59  ;;  %v1723_v18 = vmul.f32 %v3091_v15, %v3091_v15  ;;  %v1829_v8 = vsel %vm288_vm0, %v1721_v3, 0.0 }
 0x169   : > { %v1627_v31 = vadd.f32 %v1626_v22, %v1625_v37  ;;  %v1724_v32 = vmul.f32 %v3099_v7, %v3099_v7  ;;  %1536 = vst.msk [vmem:[%s2685_s26 + $0xe4] sm:$0xf] %vm1478_vm1, %v2211_v29  ;;  %v2214_v57 = vpack.c.bf16 %v3213_v39, %v3213_v39  ;;  %v1831_v6 = vsel %vm288_vm0, %v1722_v43, 0.0 }
 0x16a   : > { %v1822_v60 = vadd.f32 %v1821_v36, %v1820_v24  ;;  %1541 = vst.msk [vmem:[%s2685_s26 + $0xf8] sm:$0xf] %vm1478_vm1, %v2216_v63  ;;  %v1636_v10 = vsel %vm288_vm0, %v3091_v15, 0.0  ;;  %v1638_v13 = vsel %vm288_vm0, %v3099_v7, 0.0  ;;  %v2217_v58 = vpack.c.bf16 %v3227_v49, %v3227_v49 }
 0x16b   : > { %v1629_v11 = vadd.f32 %v1628_v54, %v1627_v31  ;;  %1539 = vst.msk [vmem:[%s2685_s26 + $0xf0] sm:$0xf] %vm1478_vm1, %v2214_v57  ;;  %v2215_v51 = vpack.c.bf16 %v3238_v28, %v3238_v28  ;;  %v1833_v48 = vsel %vm288_vm0, %v1723_v18, 0.0  ;;  %v1835_v19 = vsel %vm288_vm0, %v1724_v32, 0.0 }
 0x16c   : > { %v1824_v61 = vadd.f32 %v1823_v45, %v1822_v60  ;;  %v1725_v15 = vmul.f32 %v3126_v38, %v3126_v38  ;;  %1542 = vst.msk [vmem:[%s2685_s26 + $0xfc] sm:$0xf] %vm1478_vm1, %v2217_v58  ;;  %v1726_v20 = vmul.f32 %v3097_v4, %v3097_v4  ;;  %v1640_v22 = vsel %vm288_vm0, %v3126_v38, 0.0 }
 0x16d   : > { %v1631_v34 = vadd.f32 %v1630_v41, %v1629_v11  ;;  %1540 = vst.msk [vmem:[%s2685_s26 + $0xf4] sm:$0xf] %vm1478_vm1, %v2215_v51  ;;  %v1642_v53 = vsel %vm288_vm0, %v3097_v4, 0.0  ;;  %v1727_v1 = vmul.f32 %v3115_v44, %v3115_v44  ;;  %v1728_v0 = vmul.f32 %v3143_v12, %v3143_v12 }
 0x16e   : > { %v1826_v35 = vadd.f32 %v1825_v26, %v1824_v61  ;;  %v1837_v36 = vsel %vm288_vm0, %v1725_v15, 0.0  ;;  %v1839_v60 = vsel %vm288_vm0, %v1726_v20, 0.0  ;;  %v1644_v38 = vsel %vm288_vm0, %v3115_v44, 0.0 }
 0x16f   : > { %v1633_v55 = vadd.f32 %v1632_v9, %v1631_v34  ;;  %v1646_v45 = vsel %vm288_vm0, %v3143_v12, 0.0  ;;  %v1841_v41 = vsel %vm288_vm0, %v1727_v1, 0.0  ;;  %v1843_v62 = vsel %vm288_vm0, %v1728_v0, 0.0 }
 0x170   : > { %v1828_v42 = vadd.f32 %v1827_v27, %v1826_v35  ;;  %v1729_v61 = vmul.f32 %v3157_v40, %v3157_v40  ;;  %v1730_v26 = vmul.f32 %v3130_v5, %v3130_v5  ;;  %v1648_v44 = vsel %vm288_vm0, %v3157_v40, 0.0 }
 0x171   : > { %v1635_v46 = vadd.f32 %v1634_v17, %v1633_v55  ;;  %v1650_v12 = vsel %vm288_vm0, %v3130_v5, 0.0  ;;  %v1731_v52 = vmul.f32 %v3153_v33, %v3153_v33  ;;  %v1732_v35 = vmul.f32 %v3182_v50, %v3182_v50 }
 0x172   : > { %v1830_v56 = vadd.f32 %v1829_v8, %v1828_v42  ;;  %v1845_v34 = vsel %vm288_vm0, %v1729_v61, 0.0  ;;  %v1847_v29 = vsel %vm288_vm0, %v1730_v26, 0.0  ;;  %v1652_v40 = vsel %vm288_vm0, %v3153_v33, 0.0 }
 0x173   : > { %v1637_v23 = vadd.f32 %v1636_v10, %v1635_v46  ;;  %v1654_v17 = vsel %vm288_vm0, %v3182_v50, 0.0  ;;  %v1849_v55 = vsel %vm288_vm0, %v1731_v52, 0.0  ;;  %v1851_v63 = vsel %vm288_vm0, %v1732_v35, 0.0 }
 0x174   : > { %v1832_v16 = vadd.f32 %v1831_v6, %v1830_v56  ;;  %v1733_v18 = vmul.f32 %v3199_v47, %v3199_v47  ;;  %v1734_v57 = vmul.f32 %v3171_v21, %v3171_v21  ;;  %v1656_v33 = vsel %vm288_vm0, %v3199_v47, 0.0 }
 0x175   : > { %v1639_v7 = vadd.f32 %v1638_v13, %v1637_v23  ;;  %v1658_v50 = vsel %vm288_vm0, %v3171_v21, 0.0  ;;  %v1735_v6 = vmul.f32 %v3186_v30, %v3186_v30  ;;  %v1736_v13 = vmul.f32 %v3213_v39, %v3213_v39 }
 0x176   : > { %v1834_v14 = vadd.f32 %v1833_v48, %v1832_v16  ;;  %v1853_v10 = vsel %vm288_vm0, %v1733_v18, 0.0  ;;  %v1855_v23 = vsel %vm288_vm0, %v1734_v57, 0.0  ;;  %v1660_v47 = vsel %vm288_vm0, %v3186_v30, 0.0 }
 0x177   : > { %v1641_v37 = vadd.f32 %v1640_v22, %v1639_v7  ;;  %v1662_v51 = vsel %vm288_vm0, %v3213_v39, 0.0  ;;  %v1859_v15 = vsel %vm288_vm0, %v1736_v13, 0.0  ;;  %v1737_v7 = vmul.f32 %v3238_v28, %v3238_v28 }
 0x178   : > { %v1836_v24 = vadd.f32 %v1835_v19, %v1834_v14  ;;  %v1857_v19 = vsel %vm288_vm0, %v1735_v6, 0.0  ;;  %v1738_v22 = vmul.f32 %v3209_v59, %v3209_v59  ;;  %v1664_v30 = vsel %vm288_vm0, %v3238_v28, 0.0 }
 0x179   : > { %v1643_v2 = vadd.f32 %v1642_v53, %v1641_v37  ;;  %v1666_v39 = vsel %vm288_vm0, %v3209_v59, 0.0  ;;  %v1739_v53 = vmul.f32 %v3227_v49, %v3227_v49  ;;  %v1861_v1 = vsel %vm288_vm0, %v1737_v7, 0.0 }
 0x17a   : > { %v1838_v31 = vadd.f32 %v1837_v36, %v1836_v24 }
 0x17b   : > { %v1645_v4 = vadd.f32 %v1644_v38, %v1643_v2  ;;  %v1863_v2 = vsel %vm288_vm0, %v1738_v22, 0.0  ;;  %v1865_v28 = vsel %vm288_vm0, %v1739_v53, 0.0 }
 0x17c   : > { %v1840_v54 = vadd.f32 %v1839_v60, %v1838_v31  ;;  %v1668_v31 = vsel %vm288_vm0, %v3227_v49, 0.0 }
 0x17d   : > { %v1647_v11 = vadd.f32 %v1646_v45, %v1645_v4 }
 0x17e   : > { %v1842_v25 = vadd.f32 %v1841_v41, %v1840_v54  ;;  %v1873_v41 = vlaneseq }
 0x17f   : > { %v1649_v3 = vadd.f32 %v1648_v44, %v1647_v11 }
 0x180   : > { %v1844_v27 = vadd.f32 %v1843_v62, %v1842_v25  ;;  %v1874_v26 = vshrl.u32 %v1873_v41, 7 }
 0x181   : > { %v1651_v43 = vadd.f32 %v1650_v12, %v1649_v3 }
 0x182   : > { %v1846_v9 = vadd.f32 %v1845_v34, %v1844_v27  ;;  %vm1875_vm2 = vcmp.eq.s32.totalorder %v1874_v26, 0  ;;  %vm1877_vm3 = vcmp.eq.s32.totalorder %v1874_v26, 1 }
 0x183   : > { %v1653_v5 = vadd.f32 %v1652_v40, %v1651_v43 }
 0x184   : > { %v1848_v42 = vadd.f32 %v1847_v29, %v1846_v9 }
 0x185   : > { %v1655_v8 = vadd.f32 %v1654_v17, %v1653_v5 }
 0x186   : > { %v1850_v32 = vadd.f32 %v1849_v55, %v1848_v42 }
 0x187   : > { %v1657_v56 = vadd.f32 %v1656_v33, %v1655_v8 }
 0x188   : > { %v1852_v46 = vadd.f32 %v1851_v63, %v1850_v32 }
 0x189   : > { %v1659_v58 = vadd.f32 %v1658_v50, %v1657_v56 }
 0x18a   : > { %v1854_v16 = vadd.f32 %v1853_v10, %v1852_v46 }
 0x18b   : > { %v1661_v21 = vadd.f32 %v1660_v47, %v1659_v58 }
 0x18c   : > { %v1856_v48 = vadd.f32 %v1855_v23, %v1854_v16 }
 0x18d   : > { %v1663_v14 = vadd.f32 %v1662_v51, %v1661_v21 }
 0x18e   : > { %v1858_v20 = vadd.f32 %v1857_v19, %v1856_v48 }
 0x18f   : > { %v1665_v37 = vadd.f32 %v1664_v30, %v1663_v14 }
 0x190   : > { %v1860_v24 = vadd.f32 %v1859_v15, %v1858_v20 }
 0x191   : > { %v1667_v36 = vadd.f32 %v1666_v39, %v1665_v37 }
 0x192   : > { %v1862_v0 = vadd.f32 %v1861_v1, %v1860_v24 }
 0x193   : > { %v1669_v60 = vadd.f32 %v1668_v31, %v1667_v36 }
 0x194   : > { %v1864_v38 = vadd.f32 %v1863_v2, %v1862_v0 }
 0x195   : > { %v1670_v45 = vrot.slane %v1669_v60, 4 }
 0x196   : > { %v1866_v54 = vadd.f32 %v1865_v28, %v1864_v38 }
 0x197   : > { %v1671_v59 = vadd.f32 %v1670_v45, %v1669_v60 }
 0x198   : > { %v1867_v4 = vrot.slane %v1866_v54, 4 }
 0x199   : > { %v1672_v62 = vrot.slane %v1671_v59, 2 }
 0x19a   : > { %v1868_v61 = vadd.f32 %v1867_v4, %v1866_v54 }
 0x19b   : > { %v1673_v11 = vadd.f32 %v1672_v62, %v1671_v59 }
 0x19c   : > { %v1869_v25 = vrot.slane %v1868_v61, 2 }
 0x19d   : > { %v1674_v44 = vrot.slane %v1673_v11, 1 }
 0x19e   : > { %v1870_v27 = vadd.f32 %v1869_v25, %v1868_v61 }
 0x19f   : > { %v1675_v3 = vadd.f32 %v1674_v44, %v1673_v11 }
 0x1a0   : > { %v1871_v12 = vrot.slane %v1870_v27, 1 }
 0x1a1   : > { %v1876_v52 = vsel %vm1875_vm2, %v1675_v3, 0.0 }
 0x1a2   : > { %v1872_v49 = vadd.f32 %v1871_v12, %v1870_v27 }
 0x1a4   : > { %v1878_v34 = vsel %vm1877_vm3, %v1872_v49, 0.0 }
 0x1a5   : > { %v1879_v35 = vadd.f32 %v1878_v34, %v1876_v52 }
 0x1a7   : > { %1880 = vst.msk [vmem:[%s282_s30] sm:$0xff] %vm288_vm0, %v1879_v35 }
 0x1a8 PF: > { %s14_s14 = sadd.s32 1, %s2441_s14   ;;  %s3352_s12 = smov %s2437_s13 }
 0x1a9   : > { %p11_p5 = scmp.ge.s32.totalorder %s14_s14, 6   ;;  %s3353_s13 = smov %s3355_s15 }
 0x1ab   :  { %13 = sbr.rel (!%p11_p5) target bundleno = 2 (0x2), region = 81 }

// kernel: generator_forward.16
= control target key start
LH: loop header
LB: loop body
LE: loop exit
PB: predicated region body
PF: predicated region fallthrough
CT: control target
= control target key end

     0   :  { %s422_s0 = inlined_call_operand.vmem [shape: bf16[128,128], index: 0, kind: input, shape index: {}]   ;;  %s423_s1 = inlined_call_operand.vmem [shape: f32[1,128], index: 1, kind: input, shape index: {}]   ;;  %s424_s2 = inlined_call_operand.vmem [shape: f32[1,128], index: 2, kind: input, shape index: {}]   ;;  %s425_s3 = inlined_call_operand.vmem [shape: bf16[128,128], index: 3, kind: output, shape index: {}]  }
   0x1   :  { %v227_v0 = vld [vmem:[%s422_s0] sm:$0xff]   ;;  %v298_v4 = vld [vmem:[%s422_s0 + $0x8] sm:$0xff]   ;;  %v299_v5 = vld [vmem:[%s422_s0 + $0x10] sm:$0xff]  }
   0x2   :  { %v338_v1 = vld [vmem:[%s423_s1] ss:$0 sm:$0xff]  ;;  %v228_v2 = vunpack.c.l.bf16 %v227_v0  ;;  %v229_v3 = vunpack.c.h.bf16 %v227_v0  ;;  %v300_v6 = vld [vmem:[%s422_s0 + $0x18] sm:$0xff]   ;;  %v232_v8 = vunpack.c.l.bf16 %v298_v4  ;;  %v233_v9 = vunpack.c.h.bf16 %v298_v4  ;;  %v302_v33 = vld [vmem:[%s422_s0 + $0x28] sm:$0xff]  }
   0x3   :  { %v352_v7 = vld [vmem:[%s424_s2] ss:$0 sm:$0xff]  ;;  %v236_v10 = vunpack.c.l.bf16 %v299_v5  ;;  %v237_v11 = vunpack.c.h.bf16 %v299_v5  ;;  %v240_v14 = vunpack.c.l.bf16 %v300_v6  ;;  %v241_v15 = vunpack.c.h.bf16 %v300_v6  ;;  %v303_v38 = vld [vmem:[%s422_s0 + $0x30] sm:$0xff]   ;;  %v304_v43 = vld [vmem:[%s422_s0 + $0x38] sm:$0xff]  }
   0x4   :  { %v53_v12 = vmul.f32 %v228_v2, %v338_v1  ;;  %v54_v13 = vmul.f32 %v229_v3, %v338_v1  ;;  %v55_v16 = vmul.f32 %v232_v8, %v338_v1  ;;  %v56_v17 = vmul.f32 %v233_v9, %v338_v1  ;;  %v301_v28 = vld [vmem:[%s422_s0 + $0x20] sm:$0xff]  }
   0x5   :  { %v57_v18 = vmul.f32 %v236_v10, %v338_v1  ;;  %v58_v19 = vmul.f32 %v237_v11, %v338_v1  ;;  %v59_v22 = vmul.f32 %v240_v14, %v338_v1  ;;  %v60_v23 = vmul.f32 %v241_v15, %v338_v1 }
   0x6   :  { %v76_v20 = vadd.f32 %v352_v7, %v53_v12  ;;  %v77_v21 = vadd.f32 %v352_v7, %v54_v13  ;;  %v78_v24 = vadd.f32 %v352_v7, %v55_v16  ;;  %v79_v25 = vadd.f32 %v352_v7, %v56_v17 }
   0x7   :  { %v80_v26 = vadd.f32 %v352_v7, %v57_v18  ;;  %v81_v27 = vadd.f32 %v352_v7, %v58_v19  ;;  %v82_v31 = vadd.f32 %v352_v7, %v59_v22  ;;  %v83_v32 = vadd.f32 %v352_v7, %v60_v23 }
   0x8   :  { %v92_v29 = vmax.f32 %v76_v20, 0.0  ;;  %v93_v30 = vmax.f32 %v77_v21, 0.0  ;;  %v94_v34 = vmax.f32 %v78_v24, 0.0  ;;  %v95_v35 = vmax.f32 %v79_v25, 0.0 }
   0x9   :  { %v96_v36 = vmax.f32 %v80_v26, 0.0  ;;  %v97_v37 = vmax.f32 %v81_v27, 0.0  ;;  %v98_v40 = vmax.f32 %v82_v31, 0.0  ;;  %v99_v41 = vmax.f32 %v83_v32, 0.0 }
   0xa   :  { %v261_v39 = vpack.c.bf16 %v93_v30, %v92_v29  ;;  %v244_v42 = vunpack.c.l.bf16 %v301_v28  ;;  %v266_v44 = vpack.c.bf16 %v95_v35, %v94_v34  ;;  %v245_v46 = vunpack.c.h.bf16 %v301_v28 }
   0xb   :  { %v271_v45 = vpack.c.bf16 %v97_v37, %v96_v36  ;;  %v248_v47 = vunpack.c.l.bf16 %v302_v33  ;;  %v276_v48 = vpack.c.bf16 %v99_v41, %v98_v40  ;;  %v249_v50 = vunpack.c.h.bf16 %v302_v33 }
   0xc   :  { %262 = vst [vmem:[%s425_s3] sm:$0xff] %v261_v39   ;;  %v61_v49 = vmul.f32 %v244_v42, %v338_v1  ;;  %v252_v51 = vunpack.c.l.bf16 %v303_v38  ;;  %305 = vst [vmem:[%s425_s3 + $0x8] sm:$0xff] %v266_v44   ;;  %v62_v52 = vmul.f32 %v245_v46, %v338_v1  ;;  %v253_v54 = vunpack.c.h.bf16 %v303_v38 }
   0xd   :  { %306 = vst [vmem:[%s425_s3 + $0x10] sm:$0xff] %v271_v45   ;;  %v63_v53 = vmul.f32 %v248_v47, %v338_v1  ;;  %v256_v55 = vunpack.c.l.bf16 %v304_v43  ;;  %307 = vst [vmem:[%s425_s3 + $0x18] sm:$0xff] %v276_v48   ;;  %v64_v57 = vmul.f32 %v249_v50, %v338_v1  ;;  %v257_v59 = vunpack.c.h.bf16 %v304_v43 }
   0xe   :  { %v84_v56 = vadd.f32 %v352_v7, %v61_v49  ;;  %v65_v58 = vmul.f32 %v252_v51, %v338_v1  ;;  %v85_v60 = vadd.f32 %v352_v7, %v62_v52  ;;  %v66_v62 = vmul.f32 %v253_v54, %v338_v1 }
   0xf   :  { %v86_v61 = vadd.f32 %v352_v7, %v63_v53  ;;  %v67_v63 = vmul.f32 %v256_v55, %v338_v1  ;;  %v87_v2 = vadd.f32 %v352_v7, %v64_v57  ;;  %v68_v4 = vmul.f32 %v257_v59, %v338_v1 }
  0x10   :  { %v100_v0 = vmax.f32 %v84_v56, 0.0  ;;  %v88_v3 = vadd.f32 %v352_v7, %v65_v58  ;;  %v101_v5 = vmax.f32 %v85_v60, 0.0  ;;  %v89_v8 = vadd.f32 %v352_v7, %v66_v62 }
  0x11   :  { %v102_v6 = vmax.f32 %v86_v61, 0.0  ;;  %v90_v9 = vadd.f32 %v352_v7, %v67_v63  ;;  %v103_v10 = vmax.f32 %v87_v2, 0.0  ;;  %v91_v12 = vadd.f32 %v352_v7, %v68_v4 }
  0x12   :  { %v104_v11 = vmax.f32 %v88_v3, 0.0  ;;  %v281_v13 = vpack.c.bf16 %v101_v5, %v100_v0  ;;  %v105_v14 = vmax.f32 %v89_v8, 0.0 }
  0x13   :  { %v106_v15 = vmax.f32 %v90_v9, 0.0  ;;  %v286_v16 = vpack.c.bf16 %v103_v10, %v102_v6  ;;  %v107_v17 = vmax.f32 %v91_v12, 0.0 }
  0x14   :  { %308 = vst [vmem:[%s425_s3 + $0x20] sm:$0xff] %v281_v13   ;;  %v291_v1 = vpack.c.bf16 %v105_v14, %v104_v11 }
  0x15   :  { %309 = vst [vmem:[%s425_s3 + $0x28] sm:$0xff] %v286_v16   ;;  %v296_v18 = vpack.c.bf16 %v107_v17, %v106_v15 }
  0x16   :  { %310 = vst [vmem:[%s425_s3 + $0x30] sm:$0xff] %v291_v1  }
  0x17   :  { %311 = vst [vmem:[%s425_s3 + $0x38] sm:$0xff] %v296_v18  }

// kernel: generator_forward.17
= control target key start
LH: loop header
LB: loop body
LE: loop exit
PB: predicated region body
PF: predicated region fallthrough
CT: control target
= control target key end

     0   :  { %s1204_s0 = inlined_call_operand.vmem [shape: bf16[4,8,128], index: 0, kind: input, shape index: {}]   ;;  %s1205_s1 = inlined_call_operand.vmem [shape: bf16[4,128,2048], index: 1, kind: input, shape index: {}]   ;;  %s1206_s2 = inlined_call_operand.<no memory space> [shape: f32[1,1], index: 2, kind: input, shape index: {}]   ;;  %s1207_s3 = inlined_call_operand.vmem [shape: f32[4,8,2048], index: 3, kind: output, shape index: {}]  }
   0x1   :  { %v8_v0 = vstv %s1206_s2 }
   0x2   :  { %9 = vst [vmem:[#allocation3] sm:$0x1] %v8_v0 }
   0x3   :  { %s1005_s14 = smov 0   ;;  %s1007_s15 = smov 0  }
   0x4   :  { %s1009_s16 = smov 0   ;;  %s1011_s17 = smov 0  }
   0x5   :  { %s1013_s18 = smov 0   ;;  %s1015_s19 = smov 0  }
   0x6   :  { %s1017_s20 = smov 0  }
   0x7 LB: > { %s30_s2 = sadd.s32 1, %s971_s18  ;;  %s34_s21 = sadd.s32 1, %s975_s19  ;;  %s979_s20 = sphi %s1017_s20, %s15_s20   ;;  %s975_s19 = sphi %s1015_s19, %s1213_s19   ;;  %s971_s18 = sphi %s1013_s18, %s1212_s18   ;;  %s967_s17 = sphi %s1011_s17, %s1211_s17   ;;  %s963_s16 = sphi %s1009_s16, %s1210_s16   ;;  %s959_s15 = sphi %s1007_s15, %s1209_s15   ;;  %s955_s14 = sphi %s1005_s14, %s1208_s14  }
   0x8   : > { %p32_p0 = scmp.ge.s32.totalorder %s30_s2, 4  ;;  %p80_p1 = scmp.ne.s32.totalorder %s959_s15, %s955_s14 }
   0x9   : > { %p81_p2 = scmp.eq.s32.totalorder %s979_s20, 0  ;;  %s73_s25 = sadd.s32 1, %s959_s15 }
   0xa   : > { %s1215_s2 = smov (%p32_p0, %s30_s2), 0  ;;  %s1217_s21 = smov (!%p32_p0, %s34_s21), %s975_s19 }
   0xb   : > { %p82_p3 = por %p81_p2, %p80_p1  ;;  %p36_p4 = scmp.ge.s32.totalorder %s1217_s21, 4 }
   0xc   : > { %s69_s22 = ssub.s32 %s971_s18, %s1215_s2  ;;  %p765_p6 = scmp.ge.s32.totalorder %s979_s20, 16 }
   0xd   : > { %s1219_s21 = smov (%p36_p4, %s1217_s21), 0 }
   0xe   : > { %s66_s23 = ssub.s32 %s975_s19, %s1219_s21  ;;  %158 = sbr.rel (%p765_p6) target bundleno = 44 (0x2c), region = 20 }
   0xf   : > { %s70_s24 = sor.u32 %s69_s22, %s66_s23 }
  0x10   : > { %p71_p5 = scmp.eq.s32.totalorder %s70_s24, 0 }
  0x12   : > { %s1056_s26 = scalar_select %p71_p5, %s959_s15, %s73_s25  }
  0x15   : > { %171 = sbr.rel (!%p82_p3) target bundleno = 44 (0x2c), region = 28  ;;  %s173_s27 = sand.u32 (%p82_p3), 1, %s959_s15  }
  0x16   : > { %s767_s28 = sshll.u32 (%p82_p3), %s971_s18, 2  ;;  %s766_s29 = sshll.u32 (%p82_p3), %s173_s27, 8 }
  0x17   : > { %s768_s30 = sshll.u32 (%p82_p3), %s975_s19, 8  ;;  %s1070_s9 = scalar_lea.vmem (%p82_p3), [#allocation4], %s766_s29 }
  0x18   : > { %s181_s4 = sadd.s32 (%p82_p3), %s768_s30, %s767_s28 }
  0x19   : > { %s769_s5 = sshll.u32 (%p82_p3), %s181_s4, 2 }
  0x1a   : > { %s1065_s8 = scalar_lea.vmem (%p82_p3), %s1205_s1, %s769_s5 }
  0x1b   : > { %v196_v1 = vld [vmem:[%s1065_s8] sm:$0xff] (%p82_p3)  ;;  %v198_v2 = vld [vmem:[%s1065_s8 + $0x8] sm:$0xff] (%p82_p3) }
  0x1c   : > { %v200_v3 = vld [vmem:[%s1065_s8 + $0x40] sm:$0xff]  ;;  %197 = vst [vmem:[%s1070_s9] sm:$0xff] %v196_v1  ;;  %199 = vst [vmem:[%s1070_s9 + $0x8] sm:$0xff] %v198_v2  ;;  %v202_v4 = vld [vmem:[%s1065_s8 + $0x48] sm:$0xff] }
  0x1d   : > { %201 = vst [vmem:[%s1070_s9 + $0x10] sm:$0xff] %v200_v3  ;;  %v204_v5 = vld [vmem:[%s1065_s8 + $0x80] sm:$0xff]  ;;  %v206_v6 = vld [vmem:[%s1065_s8 + $0x88] sm:$0xff]  ;;  %203 = vst [vmem:[%s1070_s9 + $0x18] sm:$0xff] %v202_v4 }
  0x1e   : > { %205 = vst [vmem:[%s1070_s9 + $0x20] sm:$0xff] %v204_v5  ;;  %207 = vst [vmem:[%s1070_s9 + $0x28] sm:$0xff] %v206_v6  ;;  %v208_v7 = vld [vmem:[%s1065_s8 + $0xc0] sm:$0xff]  ;;  %v210_v8 = vld [vmem:[%s1065_s8 + $0xc8] sm:$0xff] }
  0x1f   : > { %v212_v9 = vld [vmem:[%s1065_s8 + $0x100] sm:$0xff]  ;;  %209 = vst [vmem:[%s1070_s9 + $0x30] sm:$0xff] %v208_v7  ;;  %211 = vst [vmem:[%s1070_s9 + $0x38] sm:$0xff] %v210_v8  ;;  %v214_v10 = vld [vmem:[%s1065_s8 + $0x108] sm:$0xff] }
  0x20   : > { %213 = vst [vmem:[%s1070_s9 + $0x40] sm:$0xff] %v212_v9  ;;  %v216_v11 = vld [vmem:[%s1065_s8 + $0x140] sm:$0xff]  ;;  %v218_v12 = vld [vmem:[%s1065_s8 + $0x148] sm:$0xff]  ;;  %215 = vst [vmem:[%s1070_s9 + $0x48] sm:$0xff] %v214_v10 }
  0x21   : > { %217 = vst [vmem:[%s1070_s9 + $0x50] sm:$0xff] %v216_v11  ;;  %219 = vst [vmem:[%s1070_s9 + $0x58] sm:$0xff] %v218_v12  ;;  %v220_v13 = vld [vmem:[%s1065_s8 + $0x180] sm:$0xff]  ;;  %v222_v14 = vld [vmem:[%s1065_s8 + $0x188] sm:$0xff] }
  0x22   : > { %v224_v15 = vld [vmem:[%s1065_s8 + $0x1c0] sm:$0xff]  ;;  %221 = vst [vmem:[%s1070_s9 + $0x60] sm:$0xff] %v220_v13  ;;  %223 = vst [vmem:[%s1070_s9 + $0x68] sm:$0xff] %v222_v14  ;;  %v226_v16 = vld [vmem:[%s1065_s8 + $0x1c8] sm:$0xff] }
  0x23   : > { %225 = vst [vmem:[%s1070_s9 + $0x70] sm:$0xff] %v224_v15  ;;  %v228_v17 = vld [vmem:[%s1065_s8 + $0x200] sm:$0xff]  ;;  %v230_v18 = vld [vmem:[%s1065_s8 + $0x208] sm:$0xff]  ;;  %227 = vst [vmem:[%s1070_s9 + $0x78] sm:$0xff] %v226_v16 }
  0x24   : > { %229 = vst [vmem:[%s1070_s9 + $0x80] sm:$0xff] %v228_v17  ;;  %231 = vst [vmem:[%s1070_s9 + $0x88] sm:$0xff] %v230_v18  ;;  %v232_v19 = vld [vmem:[%s1065_s8 + $0x240] sm:$0xff]  ;;  %v234_v20 = vld [vmem:[%s1065_s8 + $0x248] sm:$0xff] }
  0x25   : > { %v236_v21 = vld [vmem:[%s1065_s8 + $0x280] sm:$0xff]  ;;  %233 = vst [vmem:[%s1070_s9 + $0x90] sm:$0xff] %v232_v19  ;;  %235 = vst [vmem:[%s1070_s9 + $0x98] sm:$0xff] %v234_v20  ;;  %v238_v22 = vld [vmem:[%s1065_s8 + $0x288] sm:$0xff] }
  0x26   : > { %237 = vst [vmem:[%s1070_s9 + $0xa0] sm:$0xff] %v236_v21  ;;  %v240_v23 = vld [vmem:[%s1065_s8 + $0x2c0] sm:$0xff]  ;;  %v242_v24 = vld [vmem:[%s1065_s8 + $0x2c8] sm:$0xff]  ;;  %239 = vst [vmem:[%s1070_s9 + $0xa8] sm:$0xff] %v238_v22 }
  0x27   : > { %241 = vst [vmem:[%s1070_s9 + $0xb0] sm:$0xff] %v240_v23  ;;  %243 = vst [vmem:[%s1070_s9 + $0xb8] sm:$0xff] %v242_v24  ;;  %v244_v25 = vld [vmem:[%s1065_s8 + $0x300] sm:$0xff]  ;;  %v246_v26 = vld [vmem:[%s1065_s8 + $0x308] sm:$0xff] }
  0x28   : > { %v248_v27 = vld [vmem:[%s1065_s8 + $0x340] sm:$0xff]  ;;  %245 = vst [vmem:[%s1070_s9 + $0xc0] sm:$0xff] %v244_v25  ;;  %247 = vst [vmem:[%s1070_s9 + $0xc8] sm:$0xff] %v246_v26  ;;  %v250_v28 = vld [vmem:[%s1065_s8 + $0x348] sm:$0xff] }
  0x29   : > { %249 = vst [vmem:[%s1070_s9 + $0xd0] sm:$0xff] %v248_v27  ;;  %v252_v29 = vld [vmem:[%s1065_s8 + $0x380] sm:$0xff]  ;;  %v254_v30 = vld [vmem:[%s1065_s8 + $0x388] sm:$0xff]  ;;  %251 = vst [vmem:[%s1070_s9 + $0xd8] sm:$0xff] %v250_v28 }
  0x2a   : > { %253 = vst [vmem:[%s1070_s9 + $0xe0] sm:$0xff] %v252_v29  ;;  %255 = vst [vmem:[%s1070_s9 + $0xe8] sm:$0xff] %v254_v30  ;;  %v256_v31 = vld [vmem:[%s1065_s8 + $0x3c0] sm:$0xff]  ;;  %v258_v32 = vld [vmem:[%s1065_s8 + $0x3c8] sm:$0xff] }
  0x2b   : > { %257 = vst [vmem:[%s1070_s9 + $0xf0] sm:$0xff] %v256_v31  ;;  %259 = vst [vmem:[%s1070_s9 + $0xf8] sm:$0xff] %v258_v32 }
  0x2c PF: > { %p770_p7 = scmp.ge.s32.totalorder %s979_s20, 1  ;;  %p264_p8 = scmp.lt.s32.totalorder %s979_s20, 17 }
  0x2e   : > { %p265_p9 = pnand %p770_p7, %p264_p8 }
  0x2f   : > { %s271_s10 = sand.u32 (!%p265_p9), 1, %s955_s14   ;;  %v808_v33 = vld [vmem:[#allocation3] ss:$0 sm:$0xff] (!%p265_p9)  ;;  %v981_v34 = vmov (!%p265_p9), 0   ;;  %p305_p10 = scmp.lt.s32.totalorder (!%p265_p9), %s967_s17, 3 }
  0x30   : > { %268 = sbr.rel (%p265_p9) target bundleno = 312 (0x138), region = 51  ;;  %s771_s11 = sshll.u32 (!%p265_p9), %s271_s10, 8  ;;  %562 = vmatprep.mubr.bf16.mxu0 (!%p265_p9), %v981_v34  ;;  %603 = vmatprep.mubr.bf16.mxu1 (!%p265_p9), %v981_v34 }
  0x31   : > { %868 = vset.pattern.permute.xlu0 (!%p265_p9), %v981_v34  ;;  %s1136_s12 = scalar_lea.vmem (!%p265_p9), [#allocation4], %s771_s11  ;;  %s773_s24 = sshll.u32 (!%p265_p9), %s963_s16, 2 }
  0x32   : > { %v869_v35 = vld [vmem:[%s1136_s12 + $0x4] ss:$16 sps:$4 sm:$0xff] (!%p265_p9)   ;;  %634 = vperm.xlu0 (!%p265_p9), %868, %v808_v33   ;;  %v871_v36 = vld [vmem:[%s1136_s12 + $0xc] ss:$16 sps:$4 sm:$0xff] (!%p265_p9)   ;;  %v873_v37 = vld [vmem:[%s1136_s12] ss:$16 sps:$4 sm:$0xff] (!%p265_p9)  }
  0x33   : > { %530 = vmatprep.subr.bf16.mxu0 (!%p265_p9), %v869_v35  ;;  %v874_v38 = vld [vmem:[%s1136_s12 + $0x8] ss:$16 sps:$4 sm:$0xff] (!%p265_p9)   ;;  %571 = vmatprep.subr.bf16.mxu1 (!%p265_p9), %v871_v36  ;;  %v875_v39 = vld [vmem:[%s1136_s12 + $0x24] ss:$16 sps:$4 sm:$0xff] (!%p265_p9)   ;;  %v877_v40 = vld [vmem:[%s1136_s12 + $0x2c] ss:$16 sps:$4 sm:$0xff] (!%p265_p9)  }
  0x34   : > { %531 = vmatpush1.bf16.msra.mxu0 (!%p265_p9), %v873_v37  ;;  %572 = vmatpush1.bf16.msra.mxu1 (!%p265_p9), %v874_v38  ;;  %v879_v41 = vld [vmem:[%s1136_s12 + $0x20] ss:$16 sps:$4 sm:$0xff] (!%p265_p9)   ;;  %v880_v42 = vld [vmem:[%s1136_s12 + $0x28] ss:$16 sps:$4 sm:$0xff] (!%p265_p9)   ;;  %v881_v43 = vld [vmem:[%s1136_s12 + $0x44] ss:$16 sps:$4 sm:$0xff] (!%p265_p9)  }
  0x35   : > { %532 = vmatprep.subr.bf16.mxu0 (!%p265_p9), %v875_v39  ;;  %573 = vmatprep.subr.bf16.mxu1 (!%p265_p9), %v877_v40  ;;  %v883_v44 = vld [vmem:[%s1136_s12 + $0x4c] ss:$16 sps:$4 sm:$0xff] (!%p265_p9)   ;;  %v885_v45 = vld [vmem:[%s1136_s12 + $0x40] ss:$16 sps:$4 sm:$0xff] (!%p265_p9)   ;;  %v886_v46 = vld [vmem:[%s1136_s12 + $0x48] ss:$16 sps:$4 sm:$0xff] (!%p265_p9)  }
  0x36   : > { %v887_v47 = vld [vmem:[%s1136_s12 + $0x64] ss:$16 sps:$4 sm:$0xff] (!%p265_p9)   ;;  %v889_v48 = vld [vmem:[%s1136_s12 + $0x6c] ss:$16 sps:$4 sm:$0xff] (!%p265_p9)   ;;  %v891_v49 = vld [vmem:[%s1136_s12 + $0x60] ss:$16 sps:$4 sm:$0xff] (!%p265_p9)  }
  0x37   : > { %v892_v50 = vld [vmem:[%s1136_s12 + $0x68] ss:$16 sps:$4 sm:$0xff]   ;;  %v893_v51 = vld [vmem:[%s1136_s12 + $0x84] ss:$16 sps:$4 sm:$0xff]   ;;  %v895_v52 = vld [vmem:[%s1136_s12 + $0x8c] ss:$16 sps:$4 sm:$0xff]  }
  0x38   : > { %533 = vmatpush1.bf16.msra.mxu0 %v879_v41  ;;  %574 = vmatpush1.bf16.msra.mxu1 %v880_v42  ;;  %v897_v53 = vld [vmem:[%s1136_s12 + $0x80] ss:$16 sps:$4 sm:$0xff]   ;;  %v898_v54 = vld [vmem:[%s1136_s12 + $0x88] ss:$16 sps:$4 sm:$0xff]   ;;  %v899_v55 = vld [vmem:[%s1136_s12 + $0xa4] ss:$16 sps:$4 sm:$0xff]  }
  0x39   : > { %534 = vmatprep.subr.bf16.mxu0 %v881_v43  ;;  %575 = vmatprep.subr.bf16.mxu1 %v883_v44  ;;  %v901_v56 = vld [vmem:[%s1136_s12 + $0xac] ss:$16 sps:$4 sm:$0xff]   ;;  %v903_v57 = vld [vmem:[%s1136_s12 + $0xa0] ss:$16 sps:$4 sm:$0xff]   ;;  %v904_v58 = vld [vmem:[%s1136_s12 + $0xa8] ss:$16 sps:$4 sm:$0xff]  }
  0x3a   : > { %v905_v59 = vld [vmem:[%s1136_s12 + $0xc4] ss:$16 sps:$4 sm:$0xff]   ;;  %v907_v60 = vld [vmem:[%s1136_s12 + $0xcc] ss:$16 sps:$4 sm:$0xff]   ;;  %s1221_s17 = smov (!%p305_p10, %s967_s17), 3  ;;  %p317_p11 = scmp.lt.s32.totalorder %s773_s24, 15 }
  0x3b   : > { %v909_v61 = vld [vmem:[%s1136_s12 + $0xc0] ss:$16 sps:$4 sm:$0xff]   ;;  %v910_v62 = vld [vmem:[%s1136_s12 + $0xc8] ss:$16 sps:$4 sm:$0xff]   ;;  %v911_v63 = vld [vmem:[%s1136_s12 + $0xe4] ss:$16 sps:$4 sm:$0xff]  }
  0x3c   : > { %535 = vmatpush1.bf16.msra.mxu0 %v885_v45  ;;  %576 = vmatpush1.bf16.msra.mxu1 %v886_v46  ;;  %v913_v0 = vld [vmem:[%s1136_s12 + $0xec] ss:$16 sps:$4 sm:$0xff]   ;;  %s772_s13 = sshll.u32 %s1221_s17, 2  ;;  %v915_v1 = vld [vmem:[%s1136_s12 + $0xe0] ss:$16 sps:$4 sm:$0xff]   ;;  %s1223_s24 = smov (!%p317_p11, %s773_s24), 15 }
  0x3d   : > { %536 = vmatprep.subr.bf16.mxu0 %v887_v47  ;;  %577 = vmatprep.subr.bf16.mxu1 %v889_v48  ;;  %v916_v2 = vld [vmem:[%s1136_s12 + $0xe8] ss:$16 sps:$4 sm:$0xff]   ;;  %s311_s23 = scalar_lea.vmem %s1204_s0, %s772_s13  ;;  %s774_s25 = sshll.u32 %s1221_s17, 4 }
  0x3e   : > { %v337_v3 = vld [vmem:[%s311_s23] sm:$0xf]  ;;  %s320_s27 = sadd.s32 %s774_s25, %s1223_s24 }
  0x3f   : > { %s775_s16 = sshll.u32 %s320_s27, 3 }
  0x40   : > { %537 = vmatpush1.bf16.msra.mxu0 %v891_v49  ;;  %578 = vmatpush1.bf16.msra.mxu1 %v892_v50  ;;  %s322_s30 = scalar_lea.vmem %s1207_s3, %s775_s16 }
  0x41   : > { %538 = vmatprep.subr.bf16.mxu0 %v893_v51  ;;  %579 = vmatprep.subr.bf16.mxu1 %v895_v52 }
  0x44   : > { %539 = vmatpush1.bf16.msra.mxu0 %v897_v53  ;;  %580 = vmatpush1.bf16.msra.mxu1 %v898_v54 }
  0x45   : > { %540 = vmatprep.subr.bf16.mxu0 %v899_v55  ;;  %581 = vmatprep.subr.bf16.mxu1 %v901_v56 }
  0x48   : > { %541 = vmatpush1.bf16.msra.mxu0 %v903_v57  ;;  %582 = vmatpush1.bf16.msra.mxu1 %v904_v58 }
  0x49   : > { %542 = vmatprep.subr.bf16.mxu0 %v905_v59  ;;  %583 = vmatprep.subr.bf16.mxu1 %v907_v60 }
  0x4c   : > { %543 = vmatpush1.bf16.msra.mxu0 %v909_v61  ;;  %584 = vmatpush1.bf16.msra.mxu1 %v910_v62 }
  0x4d   : > { %544 = vmatprep.subr.bf16.mxu0 %v911_v63  ;;  %585 = vmatprep.subr.bf16.mxu1 %v913_v0 }
  0x50   : > { %545 = vmatpush1.bf16.msra.mxu0 %v915_v1  ;;  %586 = vmatpush1.bf16.msra.mxu1 %v916_v2 }
  0x53   : > { %563 = vmatmul.mubr.bf16.vlgmr.msra.gmra.mrb[0].mxu0 %v337_v3  ;;  %604 = vmatmul.mubr.bf16.vlgmr.msra.gmra.mrb[0].mxu1 %v337_v3 }
  0xb1   : > { %v635_v4 = vpop.permute.xlu0 %634 }
 0x126   : > { %v564_v5 = vpop.f32.mrb[0].mxu0  ;;  %v605_v6 = vpop.f32.mrb[0].mxu1 }
 0x127   : > { %v637_v7 = vadd.f32 %v635_v4, %v564_v5  ;;  %v639_v8 = vadd.f32 %v635_v4, %v605_v6  ;;  %v566_v9 = vpop.f32.mrb[1].mxu0  ;;  %v607_v10 = vpop.f32.mrb[1].mxu1 }
 0x128   : > { %v638_v11 = vadd.f32 %v635_v4, %v566_v9  ;;  %v640_v12 = vadd.f32 %v635_v4, %v607_v10  ;;  %v568_v13 = vpop.f32.mrb[2].mxu0  ;;  %v609_v14 = vpop.f32.mrb[2].mxu1 }
 0x129   : > { %917 = vtanh.f32 %v637_v7  ;;  %v569_v15 = vpop.f32.mrb[3].mxu0  ;;  %v610_v16 = vpop.f32.mrb[3].mxu1 }
 0x12a   : > { %919 = vtanh.f32 %v639_v8 }
 0x12b   : > { %921 = vtanh.f32 %v638_v11 }
 0x12c   : > { %923 = vtanh.f32 %v640_v12 }
 0x133   : > { %v918_v17 = vpop.eup %917 }
 0x134   : > { %v920_v18 = vpop.eup %919  ;;  %645 = vst [vmem:[%s322_s30] sm:$0xff] %v918_v17 }
 0x135   : > { %v922_v19 = vpop.eup %921  ;;  %647 = vst [vmem:[%s322_s30 + $0x10] sm:$0xff] %v920_v18 }
 0x136   : > { %v924_v20 = vpop.eup %923  ;;  %646 = vst [vmem:[%s322_s30 + $0x8] sm:$0xff] %v922_v19 }
 0x137   : > { %648 = vst [vmem:[%s322_s30 + $0x18] sm:$0xff] %v924_v20 }
 0x138 PF: > { %s15_s20 = sadd.s32 1, %s979_s20   ;;  %s1208_s14 = smov %s959_s15 }
 0x139   : > { %p12_p12 = scmp.ge.s32.totalorder %s15_s20, 18   ;;  %s1209_s15 = smov %s1056_s26 }
 0x13a   : > { %s1210_s16 = smov %s971_s18  ;;  %s1211_s17 = smov %s975_s19 }
 0x13b   : > { %s1212_s18 = smov %s1215_s2  ;;  %s1213_s19 = smov %s1219_s21 }
 0x13c   :  { %14 = sbr.rel (!%p12_p12) target bundleno = 7 (0x7), region = 101 }

// kernel: squeeze.17
= control target key start
LH: loop header
LB: loop body
LE: loop exit
PB: predicated region body
PF: predicated region fallthrough
CT: control target
= control target key end

     0   :  { %vm256_vm0 = vcmask 1047556   ;;  %s632_s9 = smov 64   ;;  %vm81_vm1 = vcmask 261120   ;;  %s633_s5 = smov 32   ;;  %s1088_s0 = inlined_call_operand.vmem [shape: f32[4,2048], index: 0, kind: input, shape index: {}]   ;;  %s1089_s1 = inlined_call_operand.vmem [shape: f32[2,2,2,32,32,1], index: 1, kind: output, shape index: {}]  }
   0x1   :  { %v534_v0 = vld [vmem:[%s1088_s0 + $0x1c] sm:$0xf]  ;;  %v535_v1 = vld [vmem:[%s1088_s0 + $0x18] sm:$0xf]  ;;  %v536_v2 = vld [vmem:[%s1088_s0 + $0x14] sm:$0xf] }
   0x2   :  { %48 = vst [vmem:[#allocation0 + $0x38] sm:$0xf] %v534_v0  ;;  %53 = vst [vmem:[#allocation0 + $0x30] sm:$0xf] %v535_v1  ;;  %v537_v3 = vld [vmem:[%s1088_s0 + $0x10] sm:$0xf] }
   0x3   :  { %58 = vst [vmem:[#allocation0 + $0x28] sm:$0xf] %v536_v2  ;;  %v538_v4 = vld [vmem:[%s1088_s0 + $0xc] sm:$0xf]  ;;  %v539_v5 = vld [vmem:[%s1088_s0 + $0x8] sm:$0xf] }
   0x4   :  { %63 = vst [vmem:[#allocation0 + $0x20] sm:$0xf] %v537_v3  ;;  %68 = vst [vmem:[#allocation0 + $0x18] sm:$0xf] %v538_v4  ;;  %v540_v6 = vld [vmem:[%s1088_s0 + $0x4] sm:$0xf] }
   0x5   :  { %73 = vst [vmem:[#allocation0 + $0x10] sm:$0xf] %v539_v5  ;;  %v78_v7 = vld [vmem:[%s1088_s0] sm:$0xf]  ;;  %77 = vst [vmem:[#allocation0 + $0x8] sm:$0xf] %v540_v6 }
   0x6   :  { %79 = vst [vmem:[#allocation0] sm:$0xf] %v78_v7  ;;  %v526_v8 = vld [vmem:[%s1088_s0 + $0x3c] sm:$0xf]  ;;  %v527_v9 = vld [vmem:[%s1088_s0 + $0x38] sm:$0xf] }
   0x7   :  { %v528_v10 = vld [vmem:[%s1088_s0 + $0x34] sm:$0xf]  ;;  %8 = vst [vmem:[#allocation0 + $0x78] sm:$0xf] %v526_v8  ;;  %13 = vst [vmem:[#allocation0 + $0x70] sm:$0xf] %v527_v9 }
   0x8   :  { %18 = vst [vmem:[#allocation0 + $0x68] sm:$0xf] %v528_v10  ;;  %v529_v11 = vld [vmem:[%s1088_s0 + $0x30] sm:$0xf]  ;;  %v530_v12 = vld [vmem:[%s1088_s0 + $0x2c] sm:$0xf] }
   0x9   :  { %v531_v13 = vld [vmem:[%s1088_s0 + $0x28] sm:$0xf]  ;;  %23 = vst [vmem:[#allocation0 + $0x60] sm:$0xf] %v529_v11  ;;  %28 = vst [vmem:[#allocation0 + $0x58] sm:$0xf] %v530_v12 }
   0xa   :  { %33 = vst [vmem:[#allocation0 + $0x50] sm:$0xf] %v531_v13  ;;  %v532_v14 = vld [vmem:[%s1088_s0 + $0x24] sm:$0xf]  ;;  %v533_v15 = vld [vmem:[%s1088_s0 + $0x20] sm:$0xf] }
   0xb   :  { %38 = vst [vmem:[#allocation0 + $0x48] sm:$0xf] %v532_v14  ;;  %43 = vst [vmem:[#allocation0 + $0x40] sm:$0xf] %v533_v15  ;;  %s631_s0 = smov 96  }
   0xc   :  { %v277_v16 = vld [vmem:[#allocation0 + $0x2] ss:$8 sm:$0xf0]   ;;  %v255_v17 = vld [vmem:[#allocation0] ss:$8 sm:$0xf0]  }
   0xd   :  { %v275_v18 = vld [vmem:[#allocation0 + $0x2] ss:$8 sm:$0xf]   ;;  %v254_v19 = vld [vmem:[#allocation0] ss:$8 sm:$0xf]  }
   0xe   :  { %v279_v20 = vsel %vm256_vm0, %v277_v16, %v275_v18  ;;  %v257_v21 = vsel %vm256_vm0, %v255_v17, %v254_v19  ;;  %v286_v22 = vld [vmem:[#allocation0 + $0x3] ss:$8 sm:$0xf]   ;;  %v264_v24 = vld [vmem:[#allocation0 + $0x1] ss:$8 sm:$0xf]  }
   0xf   :  { %v288_v23 = vld [vmem:[#allocation0 + $0x3] ss:$8 sm:$0xf0]   ;;  %280 = vrot.lane.b32.xlu1 %v279_v20, %s631_s0  ;;  %258 = vrot.lane.b32.xlu0 %v257_v21, %s631_s0  ;;  %v266_v25 = vld [vmem:[#allocation0 + $0x1] ss:$8 sm:$0xf0]  }
  0x10   :  { %v290_v26 = vsel %vm256_vm0, %v288_v23, %v286_v22  ;;  %v268_v27 = vsel %vm256_vm0, %v266_v25, %v264_v24  ;;  %v310_v29 = vld [vmem:[#allocation0 + $0x41] ss:$8 sm:$0xf0]   ;;  %v299_v31 = vld [vmem:[#allocation0 + $0x40] ss:$8 sm:$0xf0]  }
  0x11   :  { %v332_v35 = vld [vmem:[#allocation0 + $0x43] ss:$8 sm:$0xf0]   ;;  %v321_v37 = vld [vmem:[#allocation0 + $0x42] ss:$8 sm:$0xf0]  }
  0x12   :  { %v308_v28 = vld [vmem:[#allocation0 + $0x41] ss:$8 sm:$0xf]   ;;  %v297_v30 = vld [vmem:[#allocation0 + $0x40] ss:$8 sm:$0xf]  }
  0x13   :  { %291 = vrot.lane.b32.xlu1 %v290_v26, %s631_s0  ;;  %269 = vrot.lane.b32.xlu0 %v268_v27, %s631_s0  ;;  %v312_v32 = vsel %vm256_vm0, %v310_v29, %v308_v28  ;;  %v301_v33 = vsel %vm256_vm0, %v299_v31, %v297_v30  ;;  %v330_v34 = vld [vmem:[#allocation0 + $0x43] ss:$8 sm:$0xf]   ;;  %v319_v36 = vld [vmem:[#allocation0 + $0x42] ss:$8 sm:$0xf]  }
  0x14   :  { %v334_v38 = vsel %vm256_vm0, %v332_v35, %v330_v34  ;;  %v323_v39 = vsel %vm256_vm0, %v321_v37, %v319_v36  ;;  %v350_v40 = vld [vmem:[#allocation0 + $0x1] ss:$8 sm:$0xf]   ;;  %v340_v42 = vld [vmem:[#allocation0] ss:$8 sm:$0xf]  }
  0x15   :  { %v352_v41 = vld [vmem:[#allocation0 + $0x1] ss:$8 sm:$0xf0]   ;;  %v341_v43 = vld [vmem:[#allocation0] ss:$8 sm:$0xf0]  }
  0x16   :  { %v354_v44 = vsel %vm256_vm0, %v352_v41, %v350_v40  ;;  %v343_v45 = vsel %vm256_vm0, %v341_v43, %v340_v42  ;;  %v372_v46 = vld [vmem:[#allocation0 + $0x3] ss:$8 sm:$0xf]   ;;  %v361_v48 = vld [vmem:[#allocation0 + $0x2] ss:$8 sm:$0xf]  }
  0x17   :  { %313 = vrot.lane.b32.xlu1 %v312_v32, %s631_s0  ;;  %302 = vrot.lane.b32.xlu0 %v301_v33, %s631_s0  ;;  %v374_v47 = vld [vmem:[#allocation0 + $0x3] ss:$8 sm:$0xf0]   ;;  %v363_v49 = vld [vmem:[#allocation0 + $0x2] ss:$8 sm:$0xf0]  }
  0x18   :  { %v376_v50 = vsel %vm256_vm0, %v374_v47, %v372_v46  ;;  %v365_v51 = vsel %vm256_vm0, %v363_v49, %v361_v48  ;;  %v394_v52 = vld [vmem:[#allocation0 + $0x41] ss:$8 sm:$0xf]   ;;  %v383_v54 = vld [vmem:[#allocation0 + $0x40] ss:$8 sm:$0xf]  }
  0x19   :  { %v396_v53 = vld [vmem:[#allocation0 + $0x41] ss:$8 sm:$0xf0]   ;;  %v385_v55 = vld [vmem:[#allocation0 + $0x40] ss:$8 sm:$0xf0]  }
  0x1a   :  { %v398_v56 = vsel %vm256_vm0, %v396_v53, %v394_v52  ;;  %v387_v57 = vsel %vm256_vm0, %v385_v55, %v383_v54  ;;  %v416_v58 = vld [vmem:[#allocation0 + $0x43] ss:$8 sm:$0xf]   ;;  %v405_v60 = vld [vmem:[#allocation0 + $0x42] ss:$8 sm:$0xf]  }
  0x1b   :  { %335 = vrot.lane.b32.xlu1 %v334_v38, %s631_s0  ;;  %324 = vrot.lane.b32.xlu0 %v323_v39, %s631_s0  ;;  %v418_v59 = vld [vmem:[#allocation0 + $0x43] ss:$8 sm:$0xf0]   ;;  %v407_v61 = vld [vmem:[#allocation0 + $0x42] ss:$8 sm:$0xf0]  }
  0x1c   :  { %v420_v62 = vsel %vm256_vm0, %v418_v59, %v416_v58  ;;  %v409_v63 = vsel %vm256_vm0, %v407_v61, %v405_v60  ;;  %v436_v0 = vld [vmem:[#allocation0 + $0x1] ss:$8 sm:$0xf]   ;;  %v426_v2 = vld [vmem:[#allocation0] ss:$8 sm:$0xf]  }
  0x1d   :  { %v438_v1 = vld [vmem:[#allocation0 + $0x1] ss:$8 sm:$0xf0]   ;;  %v427_v3 = vld [vmem:[#allocation0] ss:$8 sm:$0xf0]  }
  0x1e   :  { %v458_v4 = vld [vmem:[#allocation0 + $0x3] ss:$8 sm:$0xf]   ;;  %v440_v6 = vsel %vm256_vm0, %v438_v1, %v436_v0  ;;  %v429_v7 = vsel %vm256_vm0, %v427_v3, %v426_v2  ;;  %v447_v8 = vld [vmem:[#allocation0 + $0x2] ss:$8 sm:$0xf]  }
  0x1f   :  { %355 = vrot.lane.b32.xlu1 %v354_v44, %s632_s9  ;;  %344 = vrot.lane.b32.xlu0 %v343_v45, %s632_s9  ;;  %v460_v5 = vld [vmem:[#allocation0 + $0x3] ss:$8 sm:$0xf0]   ;;  %v449_v9 = vld [vmem:[#allocation0 + $0x2] ss:$8 sm:$0xf0]  }
  0x20   :  { %v80_v10 = vld [vmem:[#allocation0] sm:$0xf]   ;;  %v90_v11 = vld [vmem:[#allocation0 + $0x8] sm:$0xf]   ;;  %v101_v12 = vld [vmem:[#allocation0 + $0x10] sm:$0xf]   ;;  %v462_v23 = vsel %vm256_vm0, %v460_v5, %v458_v4  ;;  %v451_v24 = vsel %vm256_vm0, %v449_v9, %v447_v8 }
  0x21   :  { %82 = vst.msk [vmem:[%s1089_s1] sm:$0x1] %vm81_vm1, %v80_v10   ;;  %541 = vst.msk [vmem:[%s1089_s1 + $0x3f] sm:$0x2] %vm81_vm1, %v80_v10   ;;  %v112_v13 = vld [vmem:[#allocation0 + $0x18] sm:$0xf]  }
  0x22   :  { %542 = vst.msk [vmem:[%s1089_s1 + $0x7e] sm:$0x4] %vm81_vm1, %v80_v10   ;;  %543 = vst.msk [vmem:[%s1089_s1 + $0xbd] sm:$0x8] %vm81_vm1, %v80_v10   ;;  %v123_v14 = vld [vmem:[#allocation0 + $0x20] sm:$0xf]  }
  0x23   :  { %377 = vrot.lane.b32.xlu1 %v376_v50, %s632_s9  ;;  %366 = vrot.lane.b32.xlu0 %v365_v51, %s632_s9  ;;  %544 = vst.msk [vmem:[%s1089_s1 + $0x4] sm:$0x1] %vm81_vm1, %v90_v11   ;;  %545 = vst.msk [vmem:[%s1089_s1 + $0x43] sm:$0x2] %vm81_vm1, %v90_v11   ;;  %v134_v15 = vld [vmem:[#allocation0 + $0x28] sm:$0xf]  }
  0x24   :  { %546 = vst.msk [vmem:[%s1089_s1 + $0x82] sm:$0x4] %vm81_vm1, %v90_v11   ;;  %547 = vst.msk [vmem:[%s1089_s1 + $0xc1] sm:$0x8] %vm81_vm1, %v90_v11   ;;  %v145_v20 = vld [vmem:[#allocation0 + $0x30] sm:$0xf]  }
  0x25   :  { %548 = vst.msk [vmem:[%s1089_s1 + $0x8] sm:$0x1] %vm81_vm1, %v101_v12   ;;  %549 = vst.msk [vmem:[%s1089_s1 + $0x47] sm:$0x2] %vm81_vm1, %v101_v12   ;;  %v156_v21 = vld [vmem:[#allocation0 + $0x38] sm:$0xf]  }
  0x26   :  { %550 = vst.msk [vmem:[%s1089_s1 + $0x86] sm:$0x4] %vm81_vm1, %v101_v12   ;;  %551 = vst.msk [vmem:[%s1089_s1 + $0xc5] sm:$0x8] %vm81_vm1, %v101_v12   ;;  %v167_v22 = vld [vmem:[#allocation0 + $0x40] sm:$0xf]  }
  0x27   :  { %399 = vrot.lane.b32.xlu1 %v398_v56, %s632_s9  ;;  %388 = vrot.lane.b32.xlu0 %v387_v57, %s632_s9  ;;  %v760_v16 = vld [vmem:[#allocation0 + $0x41] ss:$8 sm:$0xf]   ;;  %v764_v18 = vld [vmem:[#allocation0 + $0x40] ss:$8 sm:$0xf]  }
  0x28   :  { %v762_v17 = vld [vmem:[#allocation0 + $0x41] ss:$8 sm:$0xf0]   ;;  %v766_v19 = vld [vmem:[#allocation0 + $0x40] ss:$8 sm:$0xf0]  }
  0x29   :  { %552 = vst.msk [vmem:[%s1089_s1 + $0xc] sm:$0x1] %vm81_vm1, %v112_v13   ;;  %553 = vst.msk [vmem:[%s1089_s1 + $0x4b] sm:$0x2] %vm81_vm1, %v112_v13   ;;  %v178_v25 = vld [vmem:[#allocation0 + $0x48] sm:$0xf]   ;;  %v484_v32 = vsel %vm256_vm0, %v762_v17, %v760_v16  ;;  %v473_v33 = vsel %vm256_vm0, %v766_v19, %v764_v18 }
  0x2a   :  { %554 = vst.msk [vmem:[%s1089_s1 + $0x8a] sm:$0x4] %vm81_vm1, %v112_v13   ;;  %555 = vst.msk [vmem:[%s1089_s1 + $0xc9] sm:$0x8] %vm81_vm1, %v112_v13   ;;  %v189_v26 = vld [vmem:[#allocation0 + $0x50] sm:$0xf]  }
  0x2b   :  { %421 = vrot.lane.b32.xlu1 %v420_v62, %s632_s9  ;;  %410 = vrot.lane.b32.xlu0 %v409_v63, %s632_s9  ;;  %556 = vst.msk [vmem:[%s1089_s1 + $0x10] sm:$0x1] %vm81_vm1, %v123_v14   ;;  %557 = vst.msk [vmem:[%s1089_s1 + $0x4f] sm:$0x2] %vm81_vm1, %v123_v14   ;;  %v200_v27 = vld [vmem:[#allocation0 + $0x58] sm:$0xf]  }
  0x2c   :  { %558 = vst.msk [vmem:[%s1089_s1 + $0x8e] sm:$0x4] %vm81_vm1, %v123_v14   ;;  %559 = vst.msk [vmem:[%s1089_s1 + $0xcd] sm:$0x8] %vm81_vm1, %v123_v14   ;;  %v211_v28 = vld [vmem:[#allocation0 + $0x60] sm:$0xf]  }
  0x2d   :  { %560 = vst.msk [vmem:[%s1089_s1 + $0x14] sm:$0x1] %vm81_vm1, %v134_v15   ;;  %561 = vst.msk [vmem:[%s1089_s1 + $0x53] sm:$0x2] %vm81_vm1, %v134_v15   ;;  %v222_v29 = vld [vmem:[#allocation0 + $0x68] sm:$0xf]  }
  0x2e   :  { %562 = vst.msk [vmem:[%s1089_s1 + $0x92] sm:$0x4] %vm81_vm1, %v134_v15   ;;  %563 = vst.msk [vmem:[%s1089_s1 + $0xd1] sm:$0x8] %vm81_vm1, %v134_v15   ;;  %v233_v30 = vld [vmem:[#allocation0 + $0x70] sm:$0xf]  }
  0x2f   :  { %441 = vrot.lane.b32.xlu1 %v440_v6, %s633_s5  ;;  %430 = vrot.lane.b32.xlu0 %v429_v7, %s633_s5  ;;  %564 = vst.msk [vmem:[%s1089_s1 + $0x18] sm:$0x1] %vm81_vm1, %v145_v20   ;;  %565 = vst.msk [vmem:[%s1089_s1 + $0x57] sm:$0x2] %vm81_vm1, %v145_v20   ;;  %v244_v31 = vld [vmem:[#allocation0 + $0x78] sm:$0xf]  }
  0x30   :  { %566 = vst.msk [vmem:[%s1089_s1 + $0x96] sm:$0x4] %vm81_vm1, %v145_v20   ;;  %567 = vst.msk [vmem:[%s1089_s1 + $0xd5] sm:$0x8] %vm81_vm1, %v145_v20  }
  0x31   :  { %568 = vst.msk [vmem:[%s1089_s1 + $0x1c] sm:$0x1] %vm81_vm1, %v156_v21   ;;  %569 = vst.msk [vmem:[%s1089_s1 + $0x5b] sm:$0x2] %vm81_vm1, %v156_v21  }
  0x32   :  { %570 = vst.msk [vmem:[%s1089_s1 + $0x9a] sm:$0x4] %vm81_vm1, %v156_v21   ;;  %571 = vst.msk [vmem:[%s1089_s1 + $0xd9] sm:$0x8] %vm81_vm1, %v156_v21  }
  0x33   :  { %572 = vst.msk [vmem:[%s1089_s1 + $0x20] sm:$0x1] %vm81_vm1, %v167_v22   ;;  %573 = vst.msk [vmem:[%s1089_s1 + $0x5f] sm:$0x2] %vm81_vm1, %v167_v22   ;;  %463 = vrot.lane.b32.xlu1 %v462_v23, %s633_s5  ;;  %452 = vrot.lane.b32.xlu0 %v451_v24, %s633_s5 }
  0x34   :  { %574 = vst.msk [vmem:[%s1089_s1 + $0x9e] sm:$0x4] %vm81_vm1, %v167_v22   ;;  %575 = vst.msk [vmem:[%s1089_s1 + $0xdd] sm:$0x8] %vm81_vm1, %v167_v22  }
  0x35   :  { %576 = vst.msk [vmem:[%s1089_s1 + $0x24] sm:$0x1] %vm81_vm1, %v178_v25   ;;  %577 = vst.msk [vmem:[%s1089_s1 + $0x63] sm:$0x2] %vm81_vm1, %v178_v25  }
  0x36   :  { %578 = vst.msk [vmem:[%s1089_s1 + $0xa2] sm:$0x4] %vm81_vm1, %v178_v25   ;;  %579 = vst.msk [vmem:[%s1089_s1 + $0xe1] sm:$0x8] %vm81_vm1, %v178_v25  }
  0x37   :  { %580 = vst.msk [vmem:[%s1089_s1 + $0x28] sm:$0x1] %vm81_vm1, %v189_v26   ;;  %581 = vst.msk [vmem:[%s1089_s1 + $0x67] sm:$0x2] %vm81_vm1, %v189_v26   ;;  %485 = vrot.lane.b32.xlu1 %v484_v32, %s633_s5  ;;  %474 = vrot.lane.b32.xlu0 %v473_v33, %s633_s5 }
  0x38   :  { %582 = vst.msk [vmem:[%s1089_s1 + $0xa6] sm:$0x4] %vm81_vm1, %v189_v26   ;;  %583 = vst.msk [vmem:[%s1089_s1 + $0xe5] sm:$0x8] %vm81_vm1, %v189_v26  }
  0x39   :  { %584 = vst.msk [vmem:[%s1089_s1 + $0x2c] sm:$0x1] %vm81_vm1, %v200_v27   ;;  %585 = vst.msk [vmem:[%s1089_s1 + $0x6b] sm:$0x2] %vm81_vm1, %v200_v27  }
  0x3a   :  { %586 = vst.msk [vmem:[%s1089_s1 + $0xaa] sm:$0x4] %vm81_vm1, %v200_v27   ;;  %587 = vst.msk [vmem:[%s1089_s1 + $0xe9] sm:$0x8] %vm81_vm1, %v200_v27  }
  0x3b   :  { %588 = vst.msk [vmem:[%s1089_s1 + $0x30] sm:$0x1] %vm81_vm1, %v211_v28   ;;  %589 = vst.msk [vmem:[%s1089_s1 + $0x6f] sm:$0x2] %vm81_vm1, %v211_v28  }
  0x3c   :  { %590 = vst.msk [vmem:[%s1089_s1 + $0xae] sm:$0x4] %vm81_vm1, %v211_v28   ;;  %591 = vst.msk [vmem:[%s1089_s1 + $0xed] sm:$0x8] %vm81_vm1, %v211_v28  }
  0x3d   :  { %592 = vst.msk [vmem:[%s1089_s1 + $0x34] sm:$0x1] %vm81_vm1, %v222_v29   ;;  %593 = vst.msk [vmem:[%s1089_s1 + $0x73] sm:$0x2] %vm81_vm1, %v222_v29  }
  0x3e   :  { %594 = vst.msk [vmem:[%s1089_s1 + $0xb2] sm:$0x4] %vm81_vm1, %v222_v29   ;;  %595 = vst.msk [vmem:[%s1089_s1 + $0xf1] sm:$0x8] %vm81_vm1, %v222_v29  }
  0x3f   :  { %596 = vst.msk [vmem:[%s1089_s1 + $0x38] sm:$0x1] %vm81_vm1, %v233_v30   ;;  %597 = vst.msk [vmem:[%s1089_s1 + $0x77] sm:$0x2] %vm81_vm1, %v233_v30  }
  0x40   :  { %598 = vst.msk [vmem:[%s1089_s1 + $0xb6] sm:$0x4] %vm81_vm1, %v233_v30   ;;  %599 = vst.msk [vmem:[%s1089_s1 + $0xf5] sm:$0x8] %vm81_vm1, %v233_v30  }
  0x41   :  { %600 = vst.msk [vmem:[%s1089_s1 + $0x3c] sm:$0x1] %vm81_vm1, %v244_v31   ;;  %601 = vst.msk [vmem:[%s1089_s1 + $0x7b] sm:$0x2] %vm81_vm1, %v244_v31  }
  0x42   :  { %602 = vst.msk [vmem:[%s1089_s1 + $0xba] sm:$0x4] %vm81_vm1, %v244_v31   ;;  %603 = vst.msk [vmem:[%s1089_s1 + $0xf9] sm:$0x8] %vm81_vm1, %v244_v31  }
  0x43   :  { %v502_v34 = vld [vmem:[#allocation0 + $0x43] ss:$8 sm:$0xf]   ;;  %v491_v36 = vld [vmem:[#allocation0 + $0x42] ss:$8 sm:$0xf]  }
  0x44   :  { %v504_v35 = vld [vmem:[#allocation0 + $0x43] ss:$8 sm:$0xf0]   ;;  %v493_v37 = vld [vmem:[#allocation0 + $0x42] ss:$8 sm:$0xf0]  }
  0x45   :  { %v506_v38 = vsel %vm256_vm0, %v504_v35, %v502_v34  ;;  %v495_v39 = vsel %vm256_vm0, %v493_v37, %v491_v36 }
  0x46   :  { %507 = vrot.lane.b32.xlu1 %v506_v38, %s633_s5  ;;  %496 = vrot.lane.b32.xlu0 %v495_v39, %s633_s5 }
  0x81   :  { %v281_v40 = vpop.permute.xlu1 %280   ;;  %v259_v41 = vpop.permute.xlu0 %258  }
  0x82   :  { %606 = vst.msk [vmem:[%s1089_s1 + $0x81] ss:$4 sm:$0xff] %vm81_vm1, %v281_v40   ;;  %604 = vst.msk [vmem:[%s1089_s1 + $0x1] ss:$4 sm:$0xff] %vm81_vm1, %v259_v41  }
  0x85   :  { %v292_v42 = vpop.permute.xlu1 %291   ;;  %v270_v43 = vpop.permute.xlu0 %269  }
  0x86   :  { %607 = vst.msk [vmem:[%s1089_s1 + $0xc1] ss:$4 sm:$0xff] %vm81_vm1, %v292_v42   ;;  %605 = vst.msk [vmem:[%s1089_s1 + $0x41] ss:$4 sm:$0xff] %vm81_vm1, %v270_v43  }
  0x89   :  { %v314_v44 = vpop.permute.xlu1 %313   ;;  %v303_v45 = vpop.permute.xlu0 %302  }
  0x8a   :  { %609 = vst.msk [vmem:[%s1089_s1 + $0x61] ss:$4 sm:$0xff] %vm81_vm1, %v314_v44   ;;  %608 = vst.msk [vmem:[%s1089_s1 + $0x21] ss:$4 sm:$0xff] %vm81_vm1, %v303_v45  }
  0x8d   :  { %v336_v46 = vpop.permute.xlu1 %335   ;;  %v325_v47 = vpop.permute.xlu0 %324  }
  0x8e   :  { %611 = vst.msk [vmem:[%s1089_s1 + $0xe1] ss:$4 sm:$0xff] %vm81_vm1, %v336_v46   ;;  %610 = vst.msk [vmem:[%s1089_s1 + $0xa1] ss:$4 sm:$0xff] %vm81_vm1, %v325_v47  }
  0x91   :  { %v356_v48 = vpop.permute.xlu1 %355   ;;  %v345_v49 = vpop.permute.xlu0 %344  }
  0x92   :  { %613 = vst.msk [vmem:[%s1089_s1 + $0x42] ss:$4 sm:$0xff] %vm81_vm1, %v356_v48   ;;  %612 = vst.msk [vmem:[%s1089_s1 + $0x2] ss:$4 sm:$0xff] %vm81_vm1, %v345_v49  }
  0x95   :  { %v378_v50 = vpop.permute.xlu1 %377   ;;  %v367_v51 = vpop.permute.xlu0 %366  }
  0x96   :  { %615 = vst.msk [vmem:[%s1089_s1 + $0xc2] ss:$4 sm:$0xff] %vm81_vm1, %v378_v50   ;;  %614 = vst.msk [vmem:[%s1089_s1 + $0x82] ss:$4 sm:$0xff] %vm81_vm1, %v367_v51  }
  0x99   :  { %v400_v52 = vpop.permute.xlu1 %399   ;;  %v389_v53 = vpop.permute.xlu0 %388  }
  0x9a   :  { %617 = vst.msk [vmem:[%s1089_s1 + $0x62] ss:$4 sm:$0xff] %vm81_vm1, %v400_v52   ;;  %616 = vst.msk [vmem:[%s1089_s1 + $0x22] ss:$4 sm:$0xff] %vm81_vm1, %v389_v53  }
  0x9d   :  { %v422_v54 = vpop.permute.xlu1 %421   ;;  %v411_v55 = vpop.permute.xlu0 %410  }
  0x9e   :  { %619 = vst.msk [vmem:[%s1089_s1 + $0xe2] ss:$4 sm:$0xff] %vm81_vm1, %v422_v54   ;;  %618 = vst.msk [vmem:[%s1089_s1 + $0xa2] ss:$4 sm:$0xff] %vm81_vm1, %v411_v55  }
  0xa1   :  { %v442_v56 = vpop.permute.xlu1 %441   ;;  %v431_v57 = vpop.permute.xlu0 %430  }
  0xa2   :  { %621 = vst.msk [vmem:[%s1089_s1 + $0x43] ss:$4 sm:$0xff] %vm81_vm1, %v442_v56   ;;  %620 = vst.msk [vmem:[%s1089_s1 + $0x3] ss:$4 sm:$0xff] %vm81_vm1, %v431_v57  }
  0xa5   :  { %v464_v58 = vpop.permute.xlu1 %463   ;;  %v453_v59 = vpop.permute.xlu0 %452  }
  0xa6   :  { %623 = vst.msk [vmem:[%s1089_s1 + $0xc3] ss:$4 sm:$0xff] %vm81_vm1, %v464_v58   ;;  %622 = vst.msk [vmem:[%s1089_s1 + $0x83] ss:$4 sm:$0xff] %vm81_vm1, %v453_v59  }
  0xa9   :  { %v486_v60 = vpop.permute.xlu1 %485   ;;  %v475_v61 = vpop.permute.xlu0 %474  }
  0xaa   :  { %625 = vst.msk [vmem:[%s1089_s1 + $0x63] ss:$4 sm:$0xff] %vm81_vm1, %v486_v60   ;;  %624 = vst.msk [vmem:[%s1089_s1 + $0x23] ss:$4 sm:$0xff] %vm81_vm1, %v475_v61  }
  0xb8   :  { %v508_v62 = vpop.permute.xlu1 %507   ;;  %v497_v63 = vpop.permute.xlu0 %496  }
  0xb9   :  { %627 = vst.msk [vmem:[%s1089_s1 + $0xe3] ss:$4 sm:$0xff] %vm81_vm1, %v508_v62   ;;  %626 = vst.msk [vmem:[%s1089_s1 + $0xa3] ss:$4 sm:$0xff] %vm81_vm1, %v497_v63  }

</bundles_post_ra>
